<compile_context>
chip_gen: v7x
topology: tpu7x:2x2x1
jax: 0.10.0
libtpu: 0.0.40
codegen_flags: <defaults>
</compile_context>

<pallas_src>
import math
from functools import partial

import jax
import jax.numpy as jnp
from jax import lax
from jax.experimental import pallas as pl
from jax.experimental.pallas import tpu as pltpu

_LOG_SQRT_2PI = 0.5 * math.log(2.0 * math.pi)
# softplus(rho) == 1 at this rho: padded bias rows (mu=0, rho=RHO_UNIT, eps=0)
# contribute exactly 0 to the posterior / prior partial sums.
_RHO_UNIT_SIGMA = math.log(math.e - 1.0)
_LANES = 128
_TILE_CANDS = (2048, 1024, 512, 256, 128)


def _softplus(x):
    """Numerically stable softplus (log1p(exp(rho)) overflows for rho >~ 88 in f32)."""
    return jnp.maximum(x, 0.0) + jnp.log1p(jnp.exp(-jnp.abs(x)))


def _prior_term(v_sq, *, pi, s1, s2):
    """Data-dependent part (per element) of CenteredGaussianMixture.log_prob.

    Static per-element constants are hoisted to the wrapper; the mixture branch is
    normalized so the term is exactly 0 at v == 0 (masked / padded elements add 0).
    """
    a1 = 1.0 / (2.0 * s1 * s1)
    a2 = 1.0 / (2.0 * s2 * s2)
    if pi >= 1.0:
        return -a1 * v_sq
    if pi <= 0.0:
        return -a2 * v_sq
    c1, c2 = pi / s1, (1.0 - pi) / s2
    if a1 >= a2:                       # factor out the slower-decaying component
        a_lo, c_hi, c_lo, delta = a2, c1, c2, a1 - a2
    else:
        a_lo, c_hi, c_lo, delta = a1, c2, c1, a2 - a1
    z = c1 + c2
    q_hi, q_lo = c_hi / z, c_lo / z    # q_hi + q_lo == 1  ->  term(0) == 0
    return -a_lo * v_sq + jnp.log(q_hi * jnp.exp(-delta * v_sq) + q_lo)


def _fold8(t):
    """(R, C) -> (8, C) partial sums with vreg-aligned VPU adds when R % 8 == 0."""
    r, c = t.shape
    if r % 8 == 0:
        return t.reshape(r // 8, 8, c).sum(axis=0)
    # rare tiny-layer fallback (R not a multiple of 8): single column reduce
    return jnp.concatenate(
        [jnp.sum(t, axis=0, keepdims=True), jnp.zeros((7, c), t.dtype)], axis=0)


def _bayes_linear_kernel(x_ref, wmu_ref, wrho_ref, weps_ref, bmu_ref, brho_ref, beps_ref,
                         y_ref, lv_ref, lp_ref, acc_ref, lv_acc, lp_acc,
                         *, pi, s1, s2, out_f, in_f, mask_rows, mask_cols):
    n = pl.program_id(0)
    k = pl.program_id(1)
    last_k = pl.num_programs(1) - 1
    tn, tk = wmu_ref.shape
    f32 = jnp.float32

    # Weight streams arrive in native (out, in) layout / storage dtype (e.g. bf16);
    # all sampling / KL math runs in f32 on-chip.
    mu = wmu_ref[...].astype(f32)
    rho = wrho_ref[...].astype(f32)
    eps = weps_ref[...].astype(f32)

    # Edge-tile masking replaces any wrapper-side padding of weight-sized arrays.
    # mask_rows / mask_cols are trace-time bools: aligned layers pay nothing here.
    keep = None
    if mask_rows:
        rows = lax.broadcasted_iota(jnp.int32, (tn, tk), 0) + n * tn
        keep = rows < out_f
    if mask_cols:
        cols = lax.broadcasted_iota(jnp.int32, (tn, tk), 1) + k * tk
        cmask = cols < in_f
        keep = cmask if keep is None else keep & cmask

    sigma = _softplus(rho)
    w = mu + sigma * eps
    log_sigma = jnp.log(sigma)
    eps_sq = eps * eps
    if keep is not None:
        w = jnp.where(keep, w, 0.0)            # also guards the matmul against OOB garbage
        log_sigma = jnp.where(keep, log_sigma, 0.0)
        eps_sq = jnp.where(keep, eps_sq, 0.0)

    lv_terms = -(log_sigma + 0.5 * eps_sq)
    lp_terms = _prior_term(w * w, pi=pi, s1=s1, s2=s2)   # exactly 0 where w == 0

    @pl.when(k == 0)
    def _init():
        acc_ref[...] = jnp.zeros_like(acc_ref)
        lv_acc[...] = jnp.zeros_like(lv_acc)
        lp_acc[...] = jnp.zeros_like(lp_acc)

    # x^T is resident in VMEM (fetched once); take the K window on the sublane axis.
    start = k * tk
    if tk % 8 == 0:
        start = pl.multiple_of(start, 8)
    xk = x_ref[pl.ds(start, tk), :]                                   # (tk, B)
    acc_ref[...] += jnp.dot(w, xk, preferred_element_type=f32)        # (tn, B) on the MXU

    # Lane-dense KL partial-sum accumulators: VPU-only adds per step; the single
    # cross-lane reduce per N tile happens at k == last_k.
    lv_acc[...] += _fold8(lv_terms)
    lp_acc[...] += _fold8(lp_terms)

    @pl.when(k == last_k)
    def _finalize():
        b_mu = bmu_ref[...].astype(f32)
        b_rho = brho_ref[...].astype(f32)
        b_eps = beps_ref[...].astype(f32)
        b_sigma = _softplus(b_rho)
        b = b_mu + b_sigma * b_eps            # (tn, 1); wrapper-padded rows are exact zeros
        lv_b = -(jnp.sum(jnp.log(b_sigma)) + 0.5 * jnp.sum(b_eps * b_eps))
        lp_b = jnp.sum(_prior_term(b * b, pi=pi, s1=s1, s2=s2))

        y_ref[...] = (acc_ref[...] + b).astype(y_ref.dtype)
        # lane-dense (1, 128) stores of the per-N-tile scalar partials
        lv_ref[...] = jnp.broadcast_to(jnp.sum(lv_acc[...]) + lv_b, lv_ref.shape)
        lp_ref[...] = jnp.broadcast_to(jnp.sum(lp_acc[...]) + lp_b, lp_ref.shape)


def _round_up(v, m):
    return (v + m - 1) // m * m


def _pick_tile_n(out_f, preferred):
    """N tile: multiple of 128 (unless out_f < 128 fits in one full-extent tile).
    Prefers >= 2 N tiles so the 'parallel' axis can split across v7x TensorCores."""
    if out_f < 128:
        return out_f
    cands = [c for c in _TILE_CANDS if c <= min(preferred, out_f)] or [128]
    tn = cands[0]
    if pl.cdiv(out_f, tn) < 2:
        for c in cands:
            if pl.cdiv(out_f, c) >= 2:
                tn = c
                break
    return tn


def _pick_tile_k(in_f, preferred):
    """K tile: the full dim when it fits (no K padding), else a 128-multiple."""
    if in_f <= preferred:
        return in_f
    cands = [c for c in _TILE_CANDS if c <= preferred]
    return cands[0] if cands else 128


def bayes_linear_forward(
    x, weight_mu, weight_rho, bias_mu, bias_rho,
    eps_weight=None, eps_bias=None, *, rng_key=None,
    prior_sigma_1=0.1, prior_sigma_2=0.4, prior_pi=1.0,
    tile_n=1024, tile_k=1024,
):
    """Non-frozen BayesLinear forward.  Returns (y, lvposterior, lprior).

    `weight_rho` / `bias_rho` are the pre-softplus parameters exactly as stored by the
    PyTorch module (its `weight_sigma` / `bias_sigma`).  Parameters are streamed in
    their native (out_features, in_features) layout and storage dtype; pass bf16
    copies to halve HBM traffic (all math is f32 in-kernel).
    """
    batch, in_f = x.shape
    out_f, in_f_w = weight_mu.shape
    assert in_f_w == in_f and weight_rho.shape == (out_f, in_f)
    assert bias_mu.shape == (out_f,) and bias_rho.shape == (out_f,)

    if eps_weight is None:
        # TODO(synk): sample eps on-chip with pltpu.prng_seed/prng_random_bits once the
        # target runtime has the TPU PRNG lowering (drops one weight-sized HBM stream);
        # host-side sampling mirrors the PyTorch module's external sampler for now.
        key = jax.random.PRNGKey(0) if rng_key is None else rng_key
        kw, kb = jax.random.split(key)
        eps_weight = jax.random.normal(kw, (out_f, in_f), weight_mu.dtype)
        eps_bias = jax.random.normal(kb, (out_f,), bias_mu.dtype)
    assert eps_weight.shape == (out_f, in_f) and eps_bias.shape == (out_f,)

    s1, s2, pi = float(prior_sigma_1), float(prior_sigma_2), float(prior_pi)
    f32 = jnp.float32

    # ---- tiling: no padding / relayout / cast of any weight-sized array ----
    tn = _pick_tile_n(out_f, max(128, int(tile_n)))
    tk = _pick_tile_k(in_f, max(128, int(tile_k)))
    n_n, n_k = pl.cdiv(out_f, tn), pl.cdiv(in_f, tk)
    n_pad, k_pad = n_n * tn, n_k * tk
    mask_rows, mask_cols = (n_pad != out_f), (k_pad != in_f)
    b_pad = _round_up(max(batch, 1), 8)
    # TODO(synk): add an M (batch) grid axis once b_pad * (k_pad + 2 * tn) * 4B nears
    # the VMEM budget; this kernel targets the small-batch regime.

    # Small arrays only: x goes in transposed as (K, B) so the MXU needs no operand
    # transpose and the K window is a sublane slice; bias vectors become padded columns.
    x_p = jnp.pad(x.T, ((0, k_pad - in_f), (0, b_pad - batch)))
    bmu_c = jnp.pad(bias_mu.reshape(out_f, 1), ((0, n_pad - out_f), (0, 0)))
    brho_c = jnp.pad(bias_rho.reshape(out_f, 1), ((0, n_pad - out_f), (0, 0)),
                     constant_values=_RHO_UNIT_SIGMA)
    beps_c = jnp.pad(eps_bias.reshape(out_f, 1), ((0, n_pad - out_f), (0, 0)))

    x_spec = pl.BlockSpec((k_pad, b_pad), lambda n, k: (0, 0))   # resident; fetched once
    w_spec = pl.BlockSpec((tn, tk), lambda n, k: (n, k))         # native (out, in) layout
    c_spec = pl.BlockSpec((tn, 1), lambda n, k: (n, 0))
    y_spec = pl.BlockSpec((tn, b_pad), lambda n, k: (n, 0))
    s_spec = pl.BlockSpec((1, _LANES), lambda n, k: (0, n))

    out_shape = (
        jax.ShapeDtypeStruct((n_pad, b_pad), x.dtype),           # y^T (sliced + transposed below)
        jax.ShapeDtypeStruct((1, n_n * _LANES), f32),            # per-N-tile log-posterior partials
        jax.ShapeDtypeStruct((1, n_n * _LANES), f32),            # per-N-tile log-prior partials
    )
    scratch = [pltpu.VMEM((tn, b_pad), f32),                     # y accumulator over K tiles
               pltpu.VMEM((8, tk), f32),                         # lane-dense KL partial sums
               pltpu.VMEM((8, tk), f32)]

    # Generation-aware VMEM budget (v7x: 64 MiB physical vs 128 MiB on v5e/v6e).
    w_bytes = jnp.dtype(weight_mu.dtype).itemsize
    x_bytes = jnp.dtype(x.dtype).itemsize
    est = (2 * 3 * tn * tk * w_bytes            # double-buffered mu / rho / eps streams
           + k_pad * b_pad * x_bytes            # resident x
           + 2 * 3 * tn * w_bytes               # bias columns
           + 2 * (tn * b_pad + 2 * _LANES) * 4  # outputs
           + (tn * b_pad + 2 * 8 * tk) * 4)     # scratch
    try:
        cap = int(pltpu.get_tpu_info().vmem_capacity_bytes)
    except Exception:
        cap = 64 * 2 ** 20                      # conservative (v7x) when no TPU is attached
    vmem_limit = int(min(max(2 * est, 16 * 2 ** 20), int(0.70 * cap)))

    kernel = partial(_bayes_linear_kernel, pi=pi, s1=s1, s2=s2,
                     out_f=out_f, in_f=in_f, mask_rows=mask_rows, mask_cols=mask_cols)

    yt, lv_lanes, lp_lanes = pl.pallas_call(
        kernel,
        grid_spec=pltpu.PrefetchScalarGridSpec(
            num_scalar_prefetch=0, grid=(n_n, n_k),
            in_specs=[x_spec, w_spec, w_spec, w_spec, c_spec, c_spec, c_spec],
            out_specs=[y_spec, s_spec, s_spec],
            scratch_shapes=scratch),
        out_shape=out_shape,
        compiler_params=pltpu.CompilerParams(
            dimension_semantics=("parallel", "arbitrary"),       # N across cores, K sequential
            vmem_limit_bytes=vmem_limit),
    )(x_p, weight_mu, weight_rho, eps_weight, bmu_c, brho_c, beps_c)

    # hoisted per-element constants (computed from the real, un-padded element count)
    n_elems = out_f * in_f + out_f
    c_post = -n_elems * (_LOG_SQRT_2PI + 0.5)
    if pi >= 1.0:
        c_prior = n_elems * (-math.log(s1) - _LOG_SQRT_2PI)
    elif pi <= 0.0:
        c_prior = n_elems * (-math.log(s2) - _LOG_SQRT_2PI)
    else:
        c_prior = n_elems * (math.log(pi / s1 + (1.0 - pi) / s2) - _LOG_SQRT_2PI)

    y = yt[:out_f, :batch].T                                     # tiny (out_f x batch) transpose
    lvposterior = lv_lanes.reshape(n_n, _LANES)[:, 0].sum() + f32(c_post)
    lprior = lp_lanes.reshape(n_n, _LANES)[:, 0].sum() + f32(c_prior)
    return y, lvposterior, lprior


def _reference_forward(x, w_mu, w_rho, b_mu, b_rho, eps_w, eps_b, *, s1, s2, pi):
    """Pure-JAX mirror of the PyTorch module's _forward (given explicit eps)."""
    w_s, b_s = _softplus(w_rho), _softplus(b_rho)
    w = w_mu + w_s * eps_w
    b = b_mu + b_s * eps_b
    y = x @ w.T + b

    def log_post(v, mu, s):
        return -jnp.sum(_LOG_SQRT_2PI + jnp.log(s) + (v - mu) ** 2 / (2.0 * s ** 2) + 0.5)

    def log_prior(v):
        lp1 = -jnp.log(s1) - _LOG_SQRT_2PI - v ** 2 / (2.0 * s1 ** 2)
        lp2 = -jnp.log(s2) - _LOG_SQRT_2PI - v ** 2 / (2.0 * s2 ** 2)
        if pi >= 1.0:
            return jnp.sum(lp1)
        if pi <= 0.0:
            return jnp.sum(lp2)
        return jnp.sum(jnp.logaddexp(math.log(pi) + lp1, math.log(1.0 - pi) + lp2))

    return y, log_post(w, w_mu, w_s) + log_post(b, b_mu, b_s), log_prior(w) + log_prior(b)


if __name__ == "__main__":
    IN_F, OUT_F, BATCH = 160, 192, 4          # small, but exercises tiling + edge masking
    S1, S2 = 0.1, 0.4

    key = jax.random.PRNGKey(0)
    ks = jax.random.split(key, 7)
    w_mu = 0.1 * jax.random.normal(ks[0], (OUT_F, IN_F), jnp.float32)
    w_rho = -7.0 + 0.1 * jax.random.normal(ks[1], (OUT_F, IN_F), jnp.float32)
    b_mu = 0.1 * jax.random.normal(ks[2], (OUT_F,), jnp.float32)
    b_rho = -7.0 + 0.1 * jax.random.normal(ks[3], (OUT_F,), jnp.float32)
    eps_w = jax.random.normal(ks[4], (OUT_F, IN_F), jnp.float32)
    eps_b = jax.random.normal(ks[5], (OUT_F,), jnp.float32)
    x = jax.random.normal(ks[6], (BATCH, IN_F), jnp.float32)

    # 1) f32 params, single-component prior, small tiles -> N and K edge masking exercised
    y, lv, lp = bayes_linear_forward(
        x, w_mu, w_rho, b_mu, b_rho, eps_w, eps_b,
        prior_sigma_1=S1, prior_sigma_2=S2, prior_pi=1.0, tile_n=128, tile_k=128)
    jax.block_until_ready((y, lv, lp))
    y_r, lv_r, lp_r = _reference_forward(x, w_mu, w_rho, b_mu, b_rho, eps_w, eps_b,
                                         s1=S1, s2=S2, pi=1.0)
    assert y.shape == (BATCH, OUT_F)
    assert jnp.allclose(y, y_r, atol=1e-3, rtol=1e-3)
    assert jnp.allclose(lv, lv_r, rtol=1e-3)
    assert jnp.allclose(lp, lp_r, rtol=1e-3)

    # 2) mixture prior (0 < pi < 1), default (larger) tiles -> single K tile
    y2, lv2, lp2 = bayes_linear_forward(
        x, w_mu, w_rho, b_mu, b_rho, eps_w, eps_b,
        prior_sigma_1=S1, prior_sigma_2=S2, prior_pi=0.75)
    jax.block_until_ready((y2, lv2, lp2))
    _, _, lp2_r = _reference_forward(x, w_mu, w_rho, b_mu, b_rho, eps_w, eps_b,
                                     s1=S1, s2=S2, pi=0.75)
    assert jnp.allclose(y2, y_r, atol=1e-3, rtol=1e-3)
    assert jnp.allclose(lv2, lv_r, rtol=1e-3)
    assert jnp.allclose(lp2, lp2_r, rtol=2e-3)

    # 3) bf16 parameter/eps streams (half the HBM bytes); in-kernel math stays f32
    bf = lambda a: a.astype(jnp.bfloat16)
    up = lambda a: a.astype(jnp.float32)
    y3, lv3, lp3 = bayes_linear_forward(
        x, bf(w_mu), bf(w_rho), bf(b_mu), bf(b_rho), bf(eps_w), bf(eps_b),
        prior_sigma_1=S1, prior_sigma_2=S2, prior_pi=1.0)
    jax.block_until_ready((y3, lv3, lp3))
    y3_r, lv3_r, lp3_r = _reference_forward(
        x, up(bf(w_mu)), up(bf(w_rho)), up(bf(b_mu)), up(bf(b_rho)),
        up(bf(eps_w)), up(bf(eps_b)), s1=S1, s2=S2, pi=1.0)
    assert jnp.allclose(y3, y3_r, atol=5e-3, rtol=5e-3)
    assert jnp.allclose(lv3, lv3_r, rtol=1e-3)
    assert jnp.allclose(lp3, lp3_r, rtol=2e-3)

    print("KERNEL_OK")
</pallas_src>

<mosaic_0001>
module attributes {stable_mosaic.version = 11 : i64} {
  func.func @_bayes_linear_kernel(%arg0: i32, %arg1: i32, %arg2: memref<256x8xf32, #tpu.memory_space<vmem>>, %arg3: memref<128x128xf32, #tpu.memory_space<vmem>>, %arg4: memref<128x128xf32, #tpu.memory_space<vmem>>, %arg5: memref<128x128xf32, #tpu.memory_space<vmem>>, %arg6: memref<128x1xf32, #tpu.memory_space<vmem>>, %arg7: memref<128x1xf32, #tpu.memory_space<vmem>>, %arg8: memref<128x1xf32, #tpu.memory_space<vmem>>, %arg9: memref<128x8xf32, #tpu.memory_space<vmem>>, %arg10: memref<1x128xf32, #tpu.memory_space<vmem>>, %arg11: memref<1x128xf32, #tpu.memory_space<vmem>>, %arg12: memref<128x8xf32, #tpu.memory_space<vmem>>, %arg13: memref<8x128xf32, #tpu.memory_space<vmem>>, %arg14: memref<8x128xf32, #tpu.memory_space<vmem>>) attributes {dimension_semantics = [#tpu.dimension_semantics<parallel>, #tpu.dimension_semantics<arbitrary>], iteration_bounds = array<i64: 2, 2>, scalar_prefetch = 0 : i64, scratch_operands = 3 : i64, tpu.core_type = #tpu.core_type<tc>, window_params = [{pipeline_mode = #tpu.pipeline_mode<synchronous>, transform_indices = @transform_0, window_bounds = array<i64: 256, 8>}, {transform_indices = @transform_1, window_bounds = array<i64: 128, 128>}, {transform_indices = @transform_2, window_bounds = array<i64: 128, 128>}, {transform_indices = @transform_3, window_bounds = array<i64: 128, 128>}, {transform_indices = @transform_4, window_bounds = array<i64: 128, 1>}, {transform_indices = @transform_5, window_bounds = array<i64: 128, 1>}, {transform_indices = @transform_6, window_bounds = array<i64: 128, 1>}, {transform_indices = @transform_7, window_bounds = array<i64: 128, 8>}, {transform_indices = @transform_8, window_bounds = array<i64: 1, 128>}, {transform_indices = @transform_9, window_bounds = array<i64: 1, 128>}]} {
    %c0 = arith.constant 0 : index
    %c0_0 = arith.constant 0 : index
    %0 = vector.load %arg3[%c0, %c0_0] : memref<128x128xf32, #tpu.memory_space<vmem>>, vector<128x128xf32>
    %c0_1 = arith.constant 0 : index
    %c0_2 = arith.constant 0 : index
    %1 = vector.load %arg4[%c0_1, %c0_2] : memref<128x128xf32, #tpu.memory_space<vmem>>, vector<128x128xf32>
    %c0_3 = arith.constant 0 : index
    %c0_4 = arith.constant 0 : index
    %2 = vector.load %arg5[%c0_3, %c0_4] : memref<128x128xf32, #tpu.memory_space<vmem>>, vector<128x128xf32>
    %3 = tpu.iota {dimensions = array<i32: 0>} : vector<128x128xi32>
    %c128_i32 = arith.constant 128 : i32
    %4 = arith.muli %arg0, %c128_i32 : i32
    %5 = vector.broadcast %4 : i32 to vector<128x128xi32>
    %6 = arith.addi %3, %5 : vector<128x128xi32>
    %c192_i32 = arith.constant 192 : i32
    %7 = vector.broadcast %c192_i32 : i32 to vector<128x128xi32>
    %8 = arith.cmpi slt, %6, %7 : vector<128x128xi32>
    %9 = tpu.iota {dimensions = array<i32: 1>} : vector<128x128xi32>
    %c128_i32_5 = arith.constant 128 : i32
    %10 = arith.muli %arg1, %c128_i32_5 : i32
    %11 = vector.broadcast %10 : i32 to vector<128x128xi32>
    %12 = arith.addi %9, %11 : vector<128x128xi32>
    %c160_i32 = arith.constant 160 : i32
    %13 = vector.broadcast %c160_i32 : i32 to vector<128x128xi32>
    %14 = arith.cmpi slt, %12, %13 : vector<128x128xi32>
    %15 = arith.andi %8, %14 : vector<128x128xi1>
    %cst = arith.constant 0.000000e+00 : f32
    %16 = vector.broadcast %cst : f32 to vector<128x128xf32>
    %17 = arith.maximumf %1, %16 : vector<128x128xf32>
    %18 = math.absf %1 : vector<128x128xf32>
    %cst_6 = arith.constant 0.000000e+00 : f32
    %19 = vector.broadcast %cst_6 : f32 to vector<128x128xf32>
    %20 = arith.subf %19, %18 : vector<128x128xf32>
    %21 = math.exp %20 : vector<128x128xf32>
    %22 = math.log1p %21 : vector<128x128xf32>
    %23 = arith.addf %17, %22 : vector<128x128xf32>
    %24 = arith.mulf %23, %2 : vector<128x128xf32>
    %25 = arith.addf %0, %24 : vector<128x128xf32>
    %26 = math.log %23 : vector<128x128xf32>
    %27 = arith.mulf %2, %2 : vector<128x128xf32>
    %cst_7 = arith.constant 0.000000e+00 : f32
    %28 = vector.broadcast %cst_7 : f32 to vector<128x128xf32>
    %29 = arith.select %15, %25, %28 : vector<128x128xi1>, vector<128x128xf32>
    %cst_8 = arith.constant 0.000000e+00 : f32
    %30 = vector.broadcast %cst_8 : f32 to vector<128x128xf32>
    %31 = arith.select %15, %26, %30 : vector<128x128xi1>, vector<128x128xf32>
    %cst_9 = arith.constant 0.000000e+00 : f32
    %32 = vector.broadcast %cst_9 : f32 to vector<128x128xf32>
    %33 = arith.select %15, %27, %32 : vector<128x128xi1>, vector<128x128xf32>
    %cst_10 = arith.constant 5.000000e-01 : f32
    %34 = vector.broadcast %cst_10 : f32 to vector<128x128xf32>
    %35 = arith.mulf %34, %33 : vector<128x128xf32>
    %36 = arith.addf %31, %35 : vector<128x128xf32>
    %cst_11 = arith.constant 0.000000e+00 : f32
    %37 = vector.broadcast %cst_11 : f32 to vector<128x128xf32>
    %38 = arith.subf %37, %36 : vector<128x128xf32>
    %39 = arith.mulf %29, %29 : vector<128x128xf32>
    %cst_12 = arith.constant -5.000000e+01 : f32
    %40 = vector.broadcast %cst_12 : f32 to vector<128x128xf32>
    %41 = arith.mulf %40, %39 : vector<128x128xf32>
    %c0_i32 = arith.constant 0 : i32
    %42 = arith.cmpi eq, %arg1, %c0_i32 : i32
    %43 = arith.extui %42 : i1 to i32
    %c0_i32_13 = arith.constant 0 : i32
    %44 = arith.cmpi ne, %43, %c0_i32_13 : i32
    scf.if %44 {
      %cst_32 = arith.constant 0.000000e+00 : f32
      %66 = vector.broadcast %cst_32 : f32 to vector<128x8xf32>
      %c0_33 = arith.constant 0 : index
      %c0_34 = arith.constant 0 : index
      %67 = vector.load %arg12[%c0_33, %c0_34] : memref<128x8xf32, #tpu.memory_space<vmem>>, vector<128x8xf32>
      tpu.vector_store %arg12[%c0_33, %c0_34], %66 {strides = array<i32>} : memref<128x8xf32, #tpu.memory_space<vmem>>, vector<128x8xf32>,
      %cst_35 = arith.constant 0.000000e+00 : f32
      %68 = vector.broadcast %cst_35 : f32 to vector<8x128xf32>
      %c0_36 = arith.constant 0 : index
      %c0_37 = arith.constant 0 : index
      %69 = vector.load %arg13[%c0_36, %c0_37] : memref<8x128xf32, #tpu.memory_space<vmem>>, vector<8x128xf32>
      tpu.vector_store %arg13[%c0_36, %c0_37], %68 {strides = array<i32>} : memref<8x128xf32, #tpu.memory_space<vmem>>, vector<8x128xf32>,
      %cst_38 = arith.constant 0.000000e+00 : f32
      %70 = vector.broadcast %cst_38 : f32 to vector<8x128xf32>
      %c0_39 = arith.constant 0 : index
      %c0_40 = arith.constant 0 : index
      %71 = vector.load %arg14[%c0_39, %c0_40] : memref<8x128xf32, #tpu.memory_space<vmem>>, vector<8x128xf32>
      tpu.vector_store %arg14[%c0_39, %c0_40], %70 {strides = array<i32>} : memref<8x128xf32, #tpu.memory_space<vmem>>, vector<8x128xf32>,
    } else {
    }
    %c128_i32_14 = arith.constant 128 : i32
    %45 = arith.muli %arg1, %c128_i32_14 : i32
    %46 = tpu.assume_multiple %45, 8 : i32
    %47 = arith.index_cast %46 : i32 to index
    %c0_15 = arith.constant 0 : index
    %48 = vector.load %arg2[%47, %c0_15] : memref<256x8xf32, #tpu.memory_space<vmem>>, vector<128x8xf32>
    %c0_16 = arith.constant 0 : index
    %c0_17 = arith.constant 0 : index
    %49 = vector.load %arg12[%c0_16, %c0_17] : memref<128x8xf32, #tpu.memory_space<vmem>>, vector<128x8xf32>
    %cst_18 = arith.constant dense<0.000000e+00> : vector<128x8xf32>
    %50 = tpu.matmul %29, %48, %cst_18 {dimension_numbers = #tpu.dot_dimension_numbers<[1], [0], [0], [1], [0, 0, 1, 1], [], []>} : vector<128x128xf32>, vector<128x8xf32>, vector<128x8xf32> -> vector<128x8xf32>
    %51 = arith.addf %49, %50 : vector<128x8xf32>
    %c0_19 = arith.constant 0 : index
    %c0_20 = arith.constant 0 : index
    %52 = vector.load %arg12[%c0_19, %c0_20] : memref<128x8xf32, #tpu.memory_space<vmem>>, vector<128x8xf32>
    tpu.vector_store %arg12[%c0_19, %c0_20], %51 {strides = array<i32>} : memref<128x8xf32, #tpu.memory_space<vmem>>, vector<128x8xf32>,
    %c0_21 = arith.constant 0 : index
    %c0_22 = arith.constant 0 : index
    %53 = vector.load %arg13[%c0_21, %c0_22] : memref<8x128xf32, #tpu.memory_space<vmem>>, vector<8x128xf32>
    %54 = vector.shape_cast %38 : vector<128x128xf32> to vector<16x8x128xf32>
    %cst_23 = arith.constant dense<0.000000e+00> : vector<8x128xf32>
    %55 = vector.multi_reduction <add>, %54, %cst_23 [0] : vector<16x8x128xf32> to vector<8x128xf32>
    %56 = arith.addf %53, %55 : vector<8x128xf32>
    %c0_24 = arith.constant 0 : index
    %c0_25 = arith.constant 0 : index
    %57 = vector.load %arg13[%c0_24, %c0_25] : memref<8x128xf32, #tpu.memory_space<vmem>>, vector<8x128xf32>
    tpu.vector_store %arg13[%c0_24, %c0_25], %56 {strides = array<i32>} : memref<8x128xf32, #tpu.memory_space<vmem>>, vector<8x128xf32>,
    %c0_26 = arith.constant 0 : index
    %c0_27 = arith.constant 0 : index
    %58 = vector.load %arg14[%c0_26, %c0_27] : memref<8x128xf32, #tpu.memory_space<vmem>>, vector<8x128xf32>
    %59 = vector.shape_cast %41 : vector<128x128xf32> to vector<16x8x128xf32>
    %cst_28 = arith.constant dense<0.000000e+00> : vector<8x128xf32>
    %60 = vector.multi_reduction <add>, %59, %cst_28 [0] : vector<16x8x128xf32> to vector<8x128xf32>
    %61 = arith.addf %58, %60 : vector<8x128xf32>
    %c0_29 = arith.constant 0 : index
    %c0_30 = arith.constant 0 : index
    %62 = vector.load %arg14[%c0_29, %c0_30] : memref<8x128xf32, #tpu.memory_space<vmem>>, vector<8x128xf32>
    tpu.vector_store %arg14[%c0_29, %c0_30], %61 {strides = array<i32>} : memref<8x128xf32, #tpu.memory_space<vmem>>, vector<8x128xf32>,
    %c1_i32 = arith.constant 1 : i32
    %63 = arith.cmpi eq, %arg1, %c1_i32 : i32
    %64 = arith.extui %63 : i1 to i32
    %c0_i32_31 = arith.constant 0 : i32
    %65 = arith.cmpi ne, %64, %c0_i32_31 : i32
    scf.if %65 {
      %c0_32 = arith.constant 0 : index
      %c0_33 = arith.constant 0 : index
      %66 = vector.load %arg6[%c0_32, %c0_33] : memref<128x1xf32, #tpu.memory_space<vmem>>, vector<128x1xf32>
      %c0_34 = arith.constant 0 : index
      %c0_35 = arith.constant 0 : index
      %67 = vector.load %arg7[%c0_34, %c0_35] : memref<128x1xf32, #tpu.memory_space<vmem>>, vector<128x1xf32>
      %c0_36 = arith.constant 0 : index
      %c0_37 = arith.constant 0 : index
      %68 = vector.load %arg8[%c0_36, %c0_37] : memref<128x1xf32, #tpu.memory_space<vmem>>, vector<128x1xf32>
      %cst_38 = arith.constant 0.000000e+00 : f32
      %69 = vector.broadcast %cst_38 : f32 to vector<128x1xf32>
      %70 = arith.maximumf %67, %69 : vector<128x1xf32>
      %71 = math.absf %67 : vector<128x1xf32>
      %cst_39 = arith.constant 0.000000e+00 : f32
      %72 = vector.broadcast %cst_39 : f32 to vector<128x1xf32>
      %73 = arith.subf %72, %71 : vector<128x1xf32>
      %74 = math.exp %73 : vector<128x1xf32>
      %75 = math.log1p %74 : vector<128x1xf32>
      %76 = arith.addf %70, %75 : vector<128x1xf32>
      %77 = arith.mulf %76, %68 : vector<128x1xf32>
      %78 = arith.addf %66, %77 : vector<128x1xf32>
      %79 = math.log %76 : vector<128x1xf32>
      %80 = vector.shape_cast %79 : vector<128x1xf32> to vector<1x128x1xf32>
      %cst_40 = arith.constant dense<0.000000e+00> : vector<1xf32>
      %81 = vector.multi_reduction <add>, %80, %cst_40 [1, 2] : vector<1x128x1xf32> to vector<1xf32>
      %82 = vector.shape_cast %81 : vector<1xf32> to vector<1x1x1xf32>
      %83 = vector.extract %82[0, 0, 0] : f32 from vector<1x1x1xf32>
      %84 = arith.mulf %68, %68 : vector<128x1xf32>
      %85 = vector.shape_cast %84 : vector<128x1xf32> to vector<1x128x1xf32>
      %cst_41 = arith.constant dense<0.000000e+00> : vector<1xf32>
      %86 = vector.multi_reduction <add>, %85, %cst_41 [1, 2] : vector<1x128x1xf32> to vector<1xf32>
      %87 = vector.shape_cast %86 : vector<1xf32> to vector<1x1x1xf32>
      %88 = vector.extract %87[0, 0, 0] : f32 from vector<1x1x1xf32>
      %cst_42 = arith.constant 5.000000e-01 : f32
      %89 = arith.mulf %cst_42, %88 : f32
      %90 = arith.addf %83, %89 : f32
      %cst_43 = arith.constant 0.000000e+00 : f32
      %91 = arith.subf %cst_43, %90 : f32
      %92 = arith.mulf %78, %78 : vector<128x1xf32>
      %cst_44 = arith.constant -5.000000e+01 : f32
      %93 = vector.broadcast %cst_44 : f32 to vector<128x1xf32>
      %94 = arith.mulf %93, %92 : vector<128x1xf32>
      %95 = vector.shape_cast %94 : vector<128x1xf32> to vector<1x128x1xf32>
      %cst_45 = arith.constant dense<0.000000e+00> : vector<1xf32>
      %96 = vector.multi_reduction <add>, %95, %cst_45 [1, 2] : vector<1x128x1xf32> to vector<1xf32>
      %97 = vector.shape_cast %96 : vector<1xf32> to vector<1x1x1xf32>
      %98 = vector.extract %97[0, 0, 0] : f32 from vector<1x1x1xf32>
      %c0_46 = arith.constant 0 : index
      %c0_47 = arith.constant 0 : index
      %99 = vector.load %arg12[%c0_46, %c0_47] : memref<128x8xf32, #tpu.memory_space<vmem>>, vector<128x8xf32>
      %100 = vector.broadcast %78 : vector<128x1xf32> to vector<128x8xf32>
      %101 = arith.addf %99, %100 : vector<128x8xf32>
      %c0_48 = arith.constant 0 : index
      %c0_49 = arith.constant 0 : index
      %102 = vector.load %arg9[%c0_48, %c0_49] : memref<128x8xf32, #tpu.memory_space<vmem>>, vector<128x8xf32>
      tpu.vector_store %arg9[%c0_48, %c0_49], %101 {strides = array<i32>} : memref<128x8xf32, #tpu.memory_space<vmem>>, vector<128x8xf32>,
      %c0_50 = arith.constant 0 : index
      %c0_51 = arith.constant 0 : index
      %103 = vector.load %arg13[%c0_50, %c0_51] : memref<8x128xf32, #tpu.memory_space<vmem>>, vector<8x128xf32>
      %104 = vector.shape_cast %103 : vector<8x128xf32> to vector<1x8x128xf32>
      %cst_52 = arith.constant dense<0.000000e+00> : vector<1xf32>
      %105 = vector.multi_reduction <add>, %104, %cst_52 [1, 2] : vector<1x8x128xf32> to vector<1xf32>
      %106 = vector.shape_cast %105 : vector<1xf32> to vector<1x1x1xf32>
      %107 = vector.extract %106[0, 0, 0] : f32 from vector<1x1x1xf32>
      %108 = arith.addf %107, %91 : f32
      %109 = vector.broadcast %108 : f32 to vector<1x128xf32>
      %c0_53 = arith.constant 0 : index
      %c0_54 = arith.constant 0 : index
      %110 = vector.load %arg10[%c0_53, %c0_54] : memref<1x128xf32, #tpu.memory_space<vmem>>, vector<1x128xf32>
      tpu.vector_store %arg10[%c0_53, %c0_54], %109 {strides = array<i32>} : memref<1x128xf32, #tpu.memory_space<vmem>>, vector<1x128xf32>,
      %c0_55 = arith.constant 0 : index
      %c0_56 = arith.constant 0 : index
      %111 = vector.load %arg14[%c0_55, %c0_56] : memref<8x128xf32, #tpu.memory_space<vmem>>, vector<8x128xf32>
      %112 = vector.shape_cast %111 : vector<8x128xf32> to vector<1x8x128xf32>
      %cst_57 = arith.constant dense<0.000000e+00> : vector<1xf32>
      %113 = vector.multi_reduction <add>, %112, %cst_57 [1, 2] : vector<1x8x128xf32> to vector<1xf32>
      %114 = vector.shape_cast %113 : vector<1xf32> to vector<1x1x1xf32>
      %115 = vector.extract %114[0, 0, 0] : f32 from vector<1x1x1xf32>
      %116 = arith.addf %115, %98 : f32
      %117 = vector.broadcast %116 : f32 to vector<1x128xf32>
      %c0_58 = arith.constant 0 : index
      %c0_59 = arith.constant 0 : index
      %118 = vector.load %arg11[%c0_58, %c0_59] : memref<1x128xf32, #tpu.memory_space<vmem>>, vector<1x128xf32>
      tpu.vector_store %arg11[%c0_58, %c0_59], %117 {strides = array<i32>} : memref<1x128xf32, #tpu.memory_space<vmem>>, vector<1x128xf32>,
    } else {
    }
    return
  }
  func.func @transform_0(%arg0: i32, %arg1: i32) -> (i32, i32) {
    %c0_i32 = arith.constant 0 : i32
    %c0_i32_0 = arith.constant 0 : i32
    %c0_i32_1 = arith.constant 0 : i32
    return %c0_i32, %c0_i32_0 : i32, i32
  }
  func.func @transform_1(%arg0: i32, %arg1: i32) -> (i32, i32) {
    %c0_i32 = arith.constant 0 : i32
    return %arg0, %arg1 : i32, i32
  }
  func.func @transform_2(%arg0: i32, %arg1: i32) -> (i32, i32) {
    %c0_i32 = arith.constant 0 : i32
    return %arg0, %arg1 : i32, i32
  }
  func.func @transform_3(%arg0: i32, %arg1: i32) -> (i32, i32) {
    %c0_i32 = arith.constant 0 : i32
    return %arg0, %arg1 : i32, i32
  }
  func.func @transform_4(%arg0: i32, %arg1: i32) -> (i32, i32) {
    %c0_i32 = arith.constant 0 : i32
    %c0_i32_0 = arith.constant 0 : i32
    return %arg0, %c0_i32 : i32, i32
  }
  func.func @transform_5(%arg0: i32, %arg1: i32) -> (i32, i32) {
    %c0_i32 = arith.constant 0 : i32
    %c0_i32_0 = arith.constant 0 : i32
    return %arg0, %c0_i32 : i32, i32
  }
  func.func @transform_6(%arg0: i32, %arg1: i32) -> (i32, i32) {
    %c0_i32 = arith.constant 0 : i32
    %c0_i32_0 = arith.constant 0 : i32
    return %arg0, %c0_i32 : i32, i32
  }
  func.func @transform_7(%arg0: i32, %arg1: i32) -> (i32, i32) {
    %c0_i32 = arith.constant 0 : i32
    %c0_i32_0 = arith.constant 0 : i32
    return %arg0, %c0_i32 : i32, i32
  }
  func.func @transform_8(%arg0: i32, %arg1: i32) -> (i32, i32) {
    %c0_i32 = arith.constant 0 : i32
    %c0_i32_0 = arith.constant 0 : i32
    return %c0_i32, %arg0 : i32, i32
  }
  func.func @transform_9(%arg0: i32, %arg1: i32) -> (i32, i32) {
    %c0_i32 = arith.constant 0 : i32
    %c0_i32_0 = arith.constant 0 : i32
    return %c0_i32, %arg0 : i32, i32
  }
}

</mosaic_0001>

<bundles_post_ra>
// kernel: tpu_custom_call.1
= control target key start
LH: loop header
LB: loop body
LE: loop exit
PB: predicated region body
PF: predicated region fallthrough
CT: control target
= control target key end

     0   :  { %s6505_s0 = inlined_call_operand.vmem [shape: f32[256,8], index: 0, kind: input, shape index: {}]   ;;  %s6506_s1 = inlined_call_operand.vmem [shape: f32[192,160], index: 1, kind: input, shape index: {}]   ;;  %s6507_s2 = inlined_call_operand.vmem [shape: f32[192,160], index: 2, kind: input, shape index: {}]   ;;  %s6508_s3 = inlined_call_operand.vmem [shape: f32[192,160], index: 3, kind: input, shape index: {}]   ;;  %s6509_s4 = inlined_call_operand.vmem [shape: f32[256,1], index: 4, kind: input, shape index: {}]   ;;  %s6510_s5 = inlined_call_operand.vmem [shape: f32[256,1], index: 5, kind: input, shape index: {}]   ;;  %s6511_s6 = inlined_call_operand.vmem [shape: f32[256,1], index: 6, kind: input, shape index: {}]   ;;  %s6512_s7 = inlined_call_operand.vmem [shape: f32[256,8], index: 7, kind: output, shape index: {0}]   ;;  %s6513_s8 = inlined_call_operand.hbm [shape: f32[1,256], index: 8, kind: output, shape index: {1}]   ;;  %s6514_s9 = inlined_call_operand.hbm [shape: f32[1,256], index: 9, kind: output, shape index: {2}]  }
   0x1   :  { %6610 = sst [smem:[#allocation83_spill]] %s6506_s1 }
   0x2   :  { %6611 = sst [smem:[#allocation84_spill]] %s6513_s8 }
   0x3   :  { %6612 = sst [smem:[#allocation85_spill]] %s6514_s9 }
   0x4   :  { %15 = vsyncpa [#allocation9], 0 }
   0x5   :  { %17 = vsyncpa [#allocation9 + $0x1], 0 }
   0x6   :  { %18 = vsyncpa [#allocation11], 0 }
   0x7   :  { %20 = vsyncpa [#allocation11 + $0x1], 0  ;;  %s4027_s30 = smov 0   ;;  %s4029_s10 = smov 0  }
   0x8   :  { %s4031_s11 = smov 0   ;;  %s4033_s12 = smov 0  }
   0x9   :  { %s4035_s13 = smov 0   ;;  %s4037_s14 = smov 0  }
   0xa   :  { %s4039_s15 = smov 0   ;;  %s4041_s16 = smov 0  }
   0xb   :  { %s4043_s17 = smov 0   ;;  %s4045_s18 = smov 0  }
   0xc LB: > { %6613 = sst [smem:[#allocation14_spill]] %s3839_s30  ;;  %s2914_s19 = sadd.s32 4294967295, %s3875_s18   ;;  %s3875_s18 = sphi %s4045_s18, %s26_s18   ;;  %s3871_s17 = sphi %s4043_s17, %s6980_s17   ;;  %s3867_s16 = sphi %s4041_s16, %s6979_s16   ;;  %s3863_s15 = sphi %s4039_s15, %s6978_s15   ;;  %s3859_s14 = sphi %s4037_s14, %s6977_s14   ;;  %s3855_s13 = sphi %s4035_s13, %s6976_s13   ;;  %s3851_s12 = sphi %s4033_s12, %s6975_s12   ;;  %s3847_s11 = sphi %s4031_s11, %s6969_s11   ;;  %s3843_s10 = sphi %s4029_s10, %s6974_s10   ;;  %s3839_s30 = sphi %s4027_s30, %s6973_s30  }
   0xd   : > { %6614 = sst [smem:[#allocation15_spill]] %s3847_s11  ;;  %s2915_s20 = sadd.s32 4294967294, %s3875_s18  }
   0xe   : > { %s35_s21 = sadd.s32 1, %s3867_s16  ;;  %s38_s22 = sadd.s32 1, %s3871_s17 }
   0xf   : > { %p36_p0 = scmp.ge.s32.totalorder %s35_s21, 2  ;;  %s68_s23 = sadd.s32 1, %s3855_s13 }
  0x10   : > { %p75_p1 = scmp.ne.s32.totalorder %s3855_s13, %s3851_s12  ;;  %p76_p2 = scmp.eq.s32.totalorder %s3875_s18, 0 }
  0x11   : > { %s6982_s21 = smov (%p36_p0, %s35_s21), 0  ;;  %s6984_s22 = smov (!%p36_p0, %s38_s22), %s3871_s17 }
  0x12   : > { %6615 = sst [smem:[#allocation16_spill]] %s6982_s21  ;;  %s64_s24 = ssub.s32 %s3867_s16, %s6982_s21 }
  0x13   : > { %p4090_p3 = por %p76_p2, %p75_p1  ;;  %p40_p4 = scmp.ge.s32.totalorder %s6984_s22, 2 }
  0x14   : > { %s254_s26 = sadd.s32 1, %s3847_s11  ;;  %p264_p5 = scmp.ne.s32.totalorder %s3847_s11, %s3843_s10 }
  0x15   : > { %p265_p6 = scmp.eq.s32.totalorder %s2914_s19, 3  ;;  %s6986_s22 = smov (%p40_p4, %s6984_s22), 0 }
  0x16   : > { %6617 = sst [smem:[#allocation17_spill]] %s6986_s22  ;;  %p270_p8 = scmp.ne.s32.totalorder %s3843_s10, %s3839_s30 }
  0x17   : > { %p4099_p7 = por %p265_p6, %p264_p5  ;;  %s63_s28 = ssub.s32 %s3871_s17, %s6986_s22 }
  0x18   : > { %p271_p9 = scmp.eq.s32.totalorder %s2915_s20, 3  ;;  %s65_s29 = sor.u32 %s64_s24, %s63_s28 }
  0x19   : > { %s6618_s27 = scalar_select %p4099_p7, 1, 0 }
  0x1a   : > { %p252_p10 = scmp.eq.s32.totalorder %s63_s28, 0  ;;  %p66_p11 = scmp.eq.s32.totalorder %s65_s29, 0 }
  0x1b   : > { %6619 = sst [smem:[#allocation18_spill]] %s6618_s27  ;;  %p4107_p12 = por %p271_p9, %p270_p8 }
  0x1c   : > { %s4112_s9 = scalar_select %p252_p10, %s3847_s11, %s254_s26  }
  0x1d   : > { %s6620_s21 = scalar_select %p4107_p12, 1, 0 }
  0x1e   : > { %6622 = sst [smem:[#allocation20_spill]] %s4112_s9  ;;  %p2917_p13 = scmp.ge.s32.totalorder %s3875_s18, 4 }
  0x1f   : > { %6621 = sst [smem:[#allocation19_spill]] %s6620_s21 }
  0x20   : > { %s4115_s19 = scalar_select %p66_p11, %s3855_s13, %s68_s23  }
  0x21   : > { %316 = sbr.rel (%p2917_p13) target bundleno = 208 (0xd0), region = 20 }
  0x22   : > { %6623 = sst [smem:[#allocation21_spill]] %s4115_s19 }
  0x28   : > { %319 = sbr.rel (!%p4090_p3) target bundleno = 96 (0x60), region = 24  ;;  %s321_s20 = sand.u32 (%p4090_p3), 1, %s3855_s13  }
  0x29   : > { %s2919_s24 = sshll.u32 (%p4090_p3), %s3871_s17, 4  ;;  %s2918_s28 = sshll.u32 (%p4090_p3), %s321_s20, 7 }
  0x2a   : > { %s325_s29 = ssub.s32 (%p4090_p3), 24, %s2919_s24  ;;  %s3002_s22 = sshll.u32 (%p4090_p3), %s3871_s17, 5 }
  0x2b   : > { %p326_p0 = scmp.lt.s32.totalorder (%p4090_p3), %s325_s29, 16  ;;  %s331_s23 = sadd.s32 (%p4090_p3), %s3867_s16, %s3002_s22 }
  0x2c   : > { %s2923_s19 = sshll.u32 (%p4090_p3), %s331_s23, 3  ;;  %s6624_s1 = sld [smem:[#allocation83_spill]] (%p4090_p3) }
  0x2d   : > { %s4132_s30 = scalar_lea.vmem (%p4090_p3), [#allocation5], %s2918_s28  }
  0x2f   : > { %s6988_s29 = smov (!%p326_p0, %s325_s29), 16 }
  0x30   : > { %s2920_s26 = sshll.u32 %s6988_s29, 7 }
  0x31   : > { %p2924_p1 = scmp.eq.s32.totalorder %s2920_s26, 0 }
  0x32   : > { %s4130_s21 = scalar_lea.vmem %s6624_s1, %s2923_s19   ;;  %s4135_s20 = sshrl.u32 (!%p2924_p1), %s6988_s29, 4 }
  0x33   : > { %336 = sbr.rel (%p2924_p1) target bundleno = 96 (0x60), region = 28  ;;  %p2925_p2 = scmp.le.s32.totalorder (!%p2924_p1), %s4135_s20, 0 }
  0x3a   : > { %2755 = sbr.rel (%p2925_p2) target bundleno = 75 (0x4b), region = 325  ;;  %s6625_s22 = smov (!%p2925_p2), %s4132_s30 }
  0x3b   : > { %s6626_s24 = smov (!%p2925_p2), %s4130_s21  ;;  %s4144_s23 = smov (!%p2925_p2), 0  }
  0x3c   : > { %s4146_s9 = smov (!%p2925_p2), 0  }
  0x41 LB: >> { %v428_v0 = vld [vmem:[%s3883_s24] sm:$0xff]  ;;  %v430_v1 = vld [vmem:[%s3883_s24 + $0x10] sm:$0xff]  ;;  %s460_s11 = sadd.s32 1, %s3887_s23  ;;  %s422_s9 = sadd.s32 1, %s3891_s9   ;;  %s3891_s9 = sphi %s4146_s9, %s422_s9   ;;  %s3887_s23 = sphi %s4144_s23, %s6627_s23   ;;  %s3883_s24 = sphi %s6626_s24, %s465_s24   ;;  %s3879_s22 = sphi %s6625_s22, %s466_s22  }
  0x42   : >> { %v432_v2 = vld [vmem:[%s3883_s24 + $0x20] sm:$0xff]  ;;  %429 = vst [vmem:[%s3879_s22] sm:$0xff] %v428_v0  ;;  %431 = vst [vmem:[%s3879_s22 + $0x8] sm:$0xff] %v430_v1  ;;  %v434_v3 = vld [vmem:[%s3883_s24 + $0x30] sm:$0xff]  ;;  %p461_p4 = scmp.ge.s32.totalorder %s460_s11, %s4135_s20  ;;  %p421_p5 = scmp.ge.s32.totalorder %s422_s9, %s4135_s20 }
  0x43   : >> { %433 = vst [vmem:[%s3879_s22 + $0x10] sm:$0xff] %v432_v2  ;;  %v436_v4 = vld [vmem:[%s3883_s24 + $0x40] sm:$0xff]  ;;  %v438_v5 = vld [vmem:[%s3883_s24 + $0x50] sm:$0xff]  ;;  %435 = vst [vmem:[%s3879_s22 + $0x18] sm:$0xff] %v434_v3 }
  0x44   : >> { %437 = vst [vmem:[%s3879_s22 + $0x20] sm:$0xff] %v436_v4  ;;  %439 = vst [vmem:[%s3879_s22 + $0x28] sm:$0xff] %v438_v5  ;;  %v440_v6 = vld [vmem:[%s3883_s24 + $0x60] sm:$0xff]  ;;  %v442_v7 = vld [vmem:[%s3883_s24 + $0x70] sm:$0xff]  ;;  %s6990_s11 = smov (%p461_p4, %s460_s11), 0  ;;  %424 = sbr.rel (!%p421_p5) target bundleno = 65 (0x41), region = 331 }
  0x45   : >> { %v444_v8 = vld [vmem:[%s3883_s24 + $0x80] sm:$0xff]  ;;  %441 = vst [vmem:[%s3879_s22 + $0x30] sm:$0xff] %v440_v6  ;;  %443 = vst [vmem:[%s3879_s22 + $0x38] sm:$0xff] %v442_v7  ;;  %v446_v9 = vld [vmem:[%s3883_s24 + $0x90] sm:$0xff]  ;;  %s2926_s19 = sshll.u32 %s6990_s11, 8  ;;  %s2927_s28 = sshll.u32 %s6990_s11, 7 }
  0x46   : >> { %445 = vst [vmem:[%s3879_s22 + $0x40] sm:$0xff] %v444_v8  ;;  %v448_v10 = vld [vmem:[%s3883_s24 + $0xa0] sm:$0xff]  ;;  %v450_v11 = vld [vmem:[%s3883_s24 + $0xb0] sm:$0xff]  ;;  %447 = vst [vmem:[%s3879_s22 + $0x48] sm:$0xff] %v446_v9  ;;  %s6627_s23 = smov %s6990_s11 }
  0x47   : >> { %449 = vst [vmem:[%s3879_s22 + $0x50] sm:$0xff] %v448_v10  ;;  %451 = vst [vmem:[%s3879_s22 + $0x58] sm:$0xff] %v450_v11  ;;  %v452_v12 = vld [vmem:[%s3883_s24 + $0xc0] sm:$0xff]  ;;  %v454_v13 = vld [vmem:[%s3883_s24 + $0xd0] sm:$0xff] }
  0x48   : >> { %v456_v14 = vld [vmem:[%s3883_s24 + $0xe0] sm:$0xff]  ;;  %453 = vst [vmem:[%s3879_s22 + $0x60] sm:$0xff] %v452_v12  ;;  %455 = vst [vmem:[%s3879_s22 + $0x68] sm:$0xff] %v454_v13  ;;  %v458_v15 = vld [vmem:[%s3883_s24 + $0xf0] sm:$0xff]  ;;  %s465_s24 = scalar_lea.vmem %s4130_s21, %s2926_s19  }
  0x49   : >> { %457 = vst [vmem:[%s3879_s22 + $0x70] sm:$0xff] %v456_v14  ;;  %459 = vst [vmem:[%s3879_s22 + $0x78] sm:$0xff] %v458_v15  ;;  %s466_s22 = scalar_lea.vmem %s4132_s30, %s2927_s28 [#allocation5]  }
  0x4b PF: > { %s4204_s26 = sand.u32 15, %s6988_s29   ;;  %s3003_s19 = sshll.u32 %s4135_s20, 8 }
  0x4c   : > { %s4208_s28 = scalar_lea.vmem %s4130_s21, %s3003_s19   ;;  %s3004_s1 = sshll.u32 %s4135_s20, 7 }
  0x4d   : > { %s473_s27 = scalar_lea.vmem %s4132_s30, %s3004_s1 [#allocation5]   ;;  %p2931_p6 = scmp.le.s32.totalorder %s4204_s26, 0 }
  0x4e   : > { %s3893_s11 = smov (!%p2931_p6), %s473_s27   ;;  %s3897_s9 = smov (!%p2931_p6), %s4208_s28  }
  0x4f   : > { %2769 = sbr.rel (%p2931_p6) target bundleno = 96 (0x60), region = 336  ;;  %s3901_s8 = smov (!%p2931_p6), 0  }
  0x50   : > { %s3905_s22 = smov (!%p2931_p6), 0  }
  0x56 LB: >> { %v483_v16 = vld [vmem:[%s3899_s9] sm:$0xff]  ;;  %s485_s21 = sadd.s32 1, %s3903_s8  ;;  %s477_s22 = sadd.s32 1, %s3907_s22   ;;  %s3907_s22 = sphi %s3905_s22, %s477_s22   ;;  %s3903_s8 = sphi %s3901_s8, %s3902_s8   ;;  %s3899_s9 = sphi %s3897_s9, %s490_s9   ;;  %s3895_s11 = sphi %s3893_s11, %s491_s11  }
  0x57   : >> { %484 = vst [vmem:[%s3895_s11] sm:$0xff] %v483_v16  ;;  %p486_p8 = scmp.ge.s32.totalorder %s485_s21, %s4204_s26  ;;  %p476_p9 = scmp.ge.s32.totalorder %s477_s22, %s4204_s26 }
  0x59   : >> { %s6992_s21 = smov (%p486_p8, %s485_s21), 0  ;;  %479 = sbr.rel (!%p476_p9) target bundleno = 86 (0x56), region = 342 }
  0x5a   : >> { %s2932_s1 = sshll.u32 %s6992_s21, 4  ;;  %s2933_s30 = sshll.u32 %s6992_s21, 3 }
  0x5b   : >> { %s490_s9 = scalar_lea.vmem %s4208_s28, %s2932_s1   ;;  %s491_s11 = scalar_lea.vmem %s473_s27, %s2933_s30 [#allocation5]  }
  0x5c   : >> { %s3902_s8 = smov %s6992_s21  }
  0x60 PF: > { %497 = sbr.rel (!%p4090_p3) target bundleno = 152 (0x98), region = 76  ;;  %s499_s8 = sand.u32 (%p4090_p3), 1, %s3855_s13  }
  0x61   : > { %s2935_s29 = sshll.u32 (%p4090_p3), %s3871_s17, 4  ;;  %s2934_s20 = sshll.u32 (%p4090_p3), %s499_s8, 7 }
  0x62   : > { %s503_s24 = ssub.s32 (%p4090_p3), 24, %s2935_s29  ;;  %s3005_s23 = sshll.u32 (%p4090_p3), %s3871_s17, 5 }
  0x63   : > { %p504_p10 = scmp.lt.s32.totalorder (%p4090_p3), %s503_s24, 16  ;;  %s509_s19 = sadd.s32 (%p4090_p3), %s3867_s16, %s3005_s23 }
  0x64   : > { %s2939_s26 = sshll.u32 (%p4090_p3), %s509_s19, 3  ;;  %s4231_s22 = scalar_lea.vmem (%p4090_p3), [#allocation6], %s2934_s20  }
  0x65   : > { %s4229_s9 = scalar_lea.vmem (%p4090_p3), %s6507_s2, %s2939_s26  }
  0x67   : > { %s6994_s24 = smov (!%p504_p10, %s503_s24), 16 }
  0x68   : > { %s2936_s27 = sshll.u32 %s6994_s24, 7 }
  0x69   : > { %p2940_p11 = scmp.eq.s32.totalorder %s2936_s27, 0 }
  0x6a   : > { %s4234_s21 = sshrl.u32 (!%p2940_p11), %s6994_s24, 4 }
  0x6b   : > { %514 = sbr.rel (%p2940_p11) target bundleno = 152 (0x98), region = 80  ;;  %p2941_p13 = scmp.le.s32.totalorder (!%p2940_p11), %s4234_s21, 0 }
  0x72   : > { %2783 = sbr.rel (%p2941_p13) target bundleno = 131 (0x83), region = 347  ;;  %s6628_s1 = smov (!%p2941_p13), %s4231_s22 }
  0x73   : > { %s6629_s30 = smov (!%p2941_p13), %s4229_s9  ;;  %s4243_s8 = smov (!%p2941_p13), 0  }
  0x74   : > { %s4245_s29 = smov (!%p2941_p13), 0  }
  0x79 LB: >> { %v606_v17 = vld [vmem:[%s3915_s30] sm:$0xff]  ;;  %v608_v18 = vld [vmem:[%s3915_s30 + $0x10] sm:$0xff]  ;;  %s638_s20 = sadd.s32 1, %s3919_s8  ;;  %s600_s29 = sadd.s32 1, %s3923_s29   ;;  %s3923_s29 = sphi %s4245_s29, %s600_s29   ;;  %s3919_s8 = sphi %s4243_s8, %s6630_s8   ;;  %s3915_s30 = sphi %s6629_s30, %s643_s30   ;;  %s3911_s1 = sphi %s6628_s1, %s644_s1  }
  0x7a   : >> { %v610_v19 = vld [vmem:[%s3915_s30 + $0x20] sm:$0xff]  ;;  %607 = vst [vmem:[%s3911_s1] sm:$0xff] %v606_v17  ;;  %609 = vst [vmem:[%s3911_s1 + $0x8] sm:$0xff] %v608_v18  ;;  %v612_v20 = vld [vmem:[%s3915_s30 + $0x30] sm:$0xff]  ;;  %p639_p0 = scmp.ge.s32.totalorder %s638_s20, %s4234_s21  ;;  %p599_p1 = scmp.ge.s32.totalorder %s600_s29, %s4234_s21 }
  0x7b   : >> { %611 = vst [vmem:[%s3911_s1 + $0x10] sm:$0xff] %v610_v19  ;;  %v614_v21 = vld [vmem:[%s3915_s30 + $0x40] sm:$0xff]  ;;  %v616_v22 = vld [vmem:[%s3915_s30 + $0x50] sm:$0xff]  ;;  %613 = vst [vmem:[%s3911_s1 + $0x18] sm:$0xff] %v612_v20 }
  0x7c   : >> { %615 = vst [vmem:[%s3911_s1 + $0x20] sm:$0xff] %v614_v21  ;;  %617 = vst [vmem:[%s3911_s1 + $0x28] sm:$0xff] %v616_v22  ;;  %v618_v23 = vld [vmem:[%s3915_s30 + $0x60] sm:$0xff]  ;;  %v620_v24 = vld [vmem:[%s3915_s30 + $0x70] sm:$0xff]  ;;  %s6996_s20 = smov (%p639_p0, %s638_s20), 0  ;;  %602 = sbr.rel (!%p599_p1) target bundleno = 121 (0x79), region = 353 }
  0x7d   : >> { %v622_v25 = vld [vmem:[%s3915_s30 + $0x80] sm:$0xff]  ;;  %619 = vst [vmem:[%s3911_s1 + $0x30] sm:$0xff] %v618_v23  ;;  %621 = vst [vmem:[%s3911_s1 + $0x38] sm:$0xff] %v620_v24  ;;  %v624_v26 = vld [vmem:[%s3915_s30 + $0x90] sm:$0xff]  ;;  %s2942_s23 = sshll.u32 %s6996_s20, 8  ;;  %s2943_s19 = sshll.u32 %s6996_s20, 7 }
  0x7e   : >> { %623 = vst [vmem:[%s3911_s1 + $0x40] sm:$0xff] %v622_v25  ;;  %v626_v27 = vld [vmem:[%s3915_s30 + $0xa0] sm:$0xff]  ;;  %v628_v28 = vld [vmem:[%s3915_s30 + $0xb0] sm:$0xff]  ;;  %625 = vst [vmem:[%s3911_s1 + $0x48] sm:$0xff] %v624_v26  ;;  %s6630_s8 = smov %s6996_s20 }
  0x7f   : >> { %627 = vst [vmem:[%s3911_s1 + $0x50] sm:$0xff] %v626_v27  ;;  %629 = vst [vmem:[%s3911_s1 + $0x58] sm:$0xff] %v628_v28  ;;  %v630_v29 = vld [vmem:[%s3915_s30 + $0xc0] sm:$0xff]  ;;  %v632_v30 = vld [vmem:[%s3915_s30 + $0xd0] sm:$0xff] }
  0x80   : >> { %v634_v31 = vld [vmem:[%s3915_s30 + $0xe0] sm:$0xff]  ;;  %631 = vst [vmem:[%s3911_s1 + $0x60] sm:$0xff] %v630_v29  ;;  %633 = vst [vmem:[%s3911_s1 + $0x68] sm:$0xff] %v632_v30  ;;  %v636_v32 = vld [vmem:[%s3915_s30 + $0xf0] sm:$0xff]  ;;  %s643_s30 = scalar_lea.vmem %s4229_s9, %s2942_s23  }
  0x81   : >> { %635 = vst [vmem:[%s3911_s1 + $0x70] sm:$0xff] %v634_v31  ;;  %637 = vst [vmem:[%s3911_s1 + $0x78] sm:$0xff] %v636_v32  ;;  %s644_s1 = scalar_lea.vmem %s4231_s22, %s2943_s19 [#allocation6]  }
  0x83 PF: > { %s4303_s27 = sand.u32 15, %s6994_s24   ;;  %s3006_s26 = sshll.u32 %s4234_s21, 8 }
  0x84   : > { %s4307_s28 = scalar_lea.vmem %s4229_s9, %s3006_s26   ;;  %s3007_s11 = sshll.u32 %s4234_s21, 7 }
  0x85   : > { %s651_s23 = scalar_lea.vmem %s4231_s22, %s3007_s11 [#allocation6]   ;;  %p2947_p2 = scmp.le.s32.totalorder %s4303_s27, 0 }
  0x86   : > { %s3925_s20 = smov (!%p2947_p2), %s651_s23   ;;  %s3929_s29 = smov (!%p2947_p2), %s4307_s28  }
  0x87   : > { %2797 = sbr.rel (%p2947_p2) target bundleno = 152 (0x98), region = 358  ;;  %s3933_s19 = smov (!%p2947_p2), 0  }
  0x88   : > { %s3937_s1 = smov (!%p2947_p2), 0  }
  0x8e LB: >> { %v661_v33 = vld [vmem:[%s3931_s29] sm:$0xff]  ;;  %s663_s24 = sadd.s32 1, %s3935_s19  ;;  %s655_s1 = sadd.s32 1, %s3939_s1   ;;  %s3939_s1 = sphi %s3937_s1, %s655_s1   ;;  %s3935_s19 = sphi %s3933_s19, %s3934_s19   ;;  %s3931_s29 = sphi %s3929_s29, %s668_s29   ;;  %s3927_s20 = sphi %s3925_s20, %s669_s20  }
  0x8f   : >> { %662 = vst [vmem:[%s3927_s20] sm:$0xff] %v661_v33  ;;  %p664_p4 = scmp.ge.s32.totalorder %s663_s24, %s4303_s27  ;;  %p654_p5 = scmp.ge.s32.totalorder %s655_s1, %s4303_s27 }
  0x91   : >> { %s6998_s24 = smov (%p664_p4, %s663_s24), 0  ;;  %657 = sbr.rel (!%p654_p5) target bundleno = 142 (0x8e), region = 364 }
  0x92   : >> { %s2948_s9 = sshll.u32 %s6998_s24, 4  ;;  %s2949_s22 = sshll.u32 %s6998_s24, 3 }
  0x93   : >> { %s668_s29 = scalar_lea.vmem %s4307_s28, %s2948_s9   ;;  %s669_s20 = scalar_lea.vmem %s651_s23, %s2949_s22 [#allocation6]  }
  0x94   : >> { %s3934_s19 = smov %s6998_s24  }
  0x98 PF: > { %675 = sbr.rel (!%p4090_p3) target bundleno = 208 (0xd0), region = 128  ;;  %s677_s21 = sand.u32 (%p4090_p3), 1, %s3855_s13  }
  0x99   : > { %s2951_s30 = sshll.u32 (%p4090_p3), %s3871_s17, 4  ;;  %s2950_s8 = sshll.u32 (%p4090_p3), %s677_s21, 7 }
  0x9a   : > { %s681_s26 = ssub.s32 (%p4090_p3), 24, %s2951_s30  ;;  %s3008_s11 = sshll.u32 (%p4090_p3), %s3871_s17, 5 }
  0x9b   : > { %p682_p6 = scmp.lt.s32.totalorder (%p4090_p3), %s681_s26, 16  ;;  %s687_s20 = sadd.s32 (%p4090_p3), %s3867_s16, %s3008_s11 }
  0x9c   : > { %s2955_s28 = sshll.u32 (%p4090_p3), %s687_s20, 3  ;;  %s4330_s19 = scalar_lea.vmem (%p4090_p3), [#allocation7], %s2950_s8  }
  0x9d   : > { %s4328_s25 = scalar_lea.vmem (%p4090_p3), %s6508_s3, %s2955_s28  }
  0x9f   : > { %s7000_s26 = smov (!%p682_p6, %s681_s26), 16 }
  0xa0   : > { %s2952_s27 = sshll.u32 %s7000_s26, 7 }
  0xa1   : > { %p2956_p3 = scmp.eq.s32.totalorder %s2952_s27, 0 }
  0xa2   : > { %s4333_s1 = sshrl.u32 (!%p2956_p3), %s7000_s26, 4 }
  0xa3   : > { %692 = sbr.rel (%p2956_p3) target bundleno = 208 (0xd0), region = 132  ;;  %p2957_p8 = scmp.le.s32.totalorder (!%p2956_p3), %s4333_s1, 0 }
  0xaa   : > { %2811 = sbr.rel (%p2957_p8) target bundleno = 187 (0xbb), region = 369  ;;  %s6631_s24 = smov (!%p2957_p8), %s4330_s19 }
  0xab   : > { %s6632_s9 = smov (!%p2957_p8), %s4328_s25  ;;  %s4342_s22 = smov (!%p2957_p8), 0  }
  0xac   : > { %s4344_s21 = smov (!%p2957_p8), 0  }
  0xb1 LB: >> { %v784_v34 = vld [vmem:[%s3947_s9] sm:$0xff]  ;;  %v786_v35 = vld [vmem:[%s3947_s9 + $0x10] sm:$0xff]  ;;  %s816_s30 = sadd.s32 1, %s3951_s22  ;;  %s778_s21 = sadd.s32 1, %s3955_s21   ;;  %s3955_s21 = sphi %s4344_s21, %s778_s21   ;;  %s3951_s22 = sphi %s4342_s22, %s6633_s22   ;;  %s3947_s9 = sphi %s6632_s9, %s821_s9   ;;  %s3943_s24 = sphi %s6631_s24, %s822_s24  }
  0xb2   : >> { %v788_v36 = vld [vmem:[%s3947_s9 + $0x20] sm:$0xff]  ;;  %785 = vst [vmem:[%s3943_s24] sm:$0xff] %v784_v34  ;;  %787 = vst [vmem:[%s3943_s24 + $0x8] sm:$0xff] %v786_v35  ;;  %v790_v37 = vld [vmem:[%s3947_s9 + $0x30] sm:$0xff]  ;;  %p817_p9 = scmp.ge.s32.totalorder %s816_s30, %s4333_s1  ;;  %p777_p10 = scmp.ge.s32.totalorder %s778_s21, %s4333_s1 }
  0xb3   : >> { %789 = vst [vmem:[%s3943_s24 + $0x10] sm:$0xff] %v788_v36  ;;  %v792_v38 = vld [vmem:[%s3947_s9 + $0x40] sm:$0xff]  ;;  %v794_v39 = vld [vmem:[%s3947_s9 + $0x50] sm:$0xff]  ;;  %791 = vst [vmem:[%s3943_s24 + $0x18] sm:$0xff] %v790_v37 }
  0xb4   : >> { %793 = vst [vmem:[%s3943_s24 + $0x20] sm:$0xff] %v792_v38  ;;  %795 = vst [vmem:[%s3943_s24 + $0x28] sm:$0xff] %v794_v39  ;;  %v796_v40 = vld [vmem:[%s3947_s9 + $0x60] sm:$0xff]  ;;  %v798_v41 = vld [vmem:[%s3947_s9 + $0x70] sm:$0xff]  ;;  %s7002_s30 = smov (%p817_p9, %s816_s30), 0  ;;  %780 = sbr.rel (!%p777_p10) target bundleno = 177 (0xb1), region = 375 }
  0xb5   : >> { %v800_v42 = vld [vmem:[%s3947_s9 + $0x80] sm:$0xff]  ;;  %797 = vst [vmem:[%s3943_s24 + $0x30] sm:$0xff] %v796_v40  ;;  %799 = vst [vmem:[%s3943_s24 + $0x38] sm:$0xff] %v798_v41  ;;  %v802_v43 = vld [vmem:[%s3947_s9 + $0x90] sm:$0xff]  ;;  %s2958_s8 = sshll.u32 %s7002_s30, 8  ;;  %s2959_s11 = sshll.u32 %s7002_s30, 7 }
  0xb6   : >> { %801 = vst [vmem:[%s3943_s24 + $0x40] sm:$0xff] %v800_v42  ;;  %v804_v44 = vld [vmem:[%s3947_s9 + $0xa0] sm:$0xff]  ;;  %v806_v45 = vld [vmem:[%s3947_s9 + $0xb0] sm:$0xff]  ;;  %803 = vst [vmem:[%s3943_s24 + $0x48] sm:$0xff] %v802_v43  ;;  %s6633_s22 = smov %s7002_s30 }
  0xb7   : >> { %805 = vst [vmem:[%s3943_s24 + $0x50] sm:$0xff] %v804_v44  ;;  %807 = vst [vmem:[%s3943_s24 + $0x58] sm:$0xff] %v806_v45  ;;  %v808_v46 = vld [vmem:[%s3947_s9 + $0xc0] sm:$0xff]  ;;  %v810_v47 = vld [vmem:[%s3947_s9 + $0xd0] sm:$0xff] }
  0xb8   : >> { %v812_v48 = vld [vmem:[%s3947_s9 + $0xe0] sm:$0xff]  ;;  %809 = vst [vmem:[%s3943_s24 + $0x60] sm:$0xff] %v808_v46  ;;  %811 = vst [vmem:[%s3943_s24 + $0x68] sm:$0xff] %v810_v47  ;;  %v814_v49 = vld [vmem:[%s3947_s9 + $0xf0] sm:$0xff]  ;;  %s821_s9 = scalar_lea.vmem %s4328_s25, %s2958_s8  }
  0xb9   : >> { %813 = vst [vmem:[%s3943_s24 + $0x70] sm:$0xff] %v812_v48  ;;  %815 = vst [vmem:[%s3943_s24 + $0x78] sm:$0xff] %v814_v49  ;;  %s822_s24 = scalar_lea.vmem %s4330_s19, %s2959_s11 [#allocation7]  }
  0xbb PF: > { %s4402_s20 = sand.u32 15, %s7000_s26   ;;  %s3009_s27 = sshll.u32 %s4333_s1, 8 }
  0xbc   : > { %s4406_s28 = scalar_lea.vmem %s4328_s25, %s3009_s27   ;;  %s3010_s23 = sshll.u32 %s4333_s1, 7 }
  0xbd   : > { %s829_s29 = scalar_lea.vmem %s4330_s19, %s3010_s23 [#allocation7]   ;;  %p2963_p11 = scmp.le.s32.totalorder %s4402_s20, 0 }
  0xbe   : > { %s3957_s30 = smov (!%p2963_p11), %s829_s29   ;;  %s3961_s21 = smov (!%p2963_p11), %s4406_s28  }
  0xbf   : > { %2825 = sbr.rel (%p2963_p11) target bundleno = 208 (0xd0), region = 380  ;;  %s3965_s8 = smov (!%p2963_p11), 0  }
  0xc0   : > { %s3969_s24 = smov (!%p2963_p11), 0  }
  0xc6 LB: >> { %v839_v50 = vld [vmem:[%s3963_s21] sm:$0xff]  ;;  %s841_s26 = sadd.s32 1, %s3967_s8  ;;  %s833_s24 = sadd.s32 1, %s3971_s24   ;;  %s3971_s24 = sphi %s3969_s24, %s833_s24   ;;  %s3967_s8 = sphi %s3965_s8, %s3966_s8   ;;  %s3963_s21 = sphi %s3961_s21, %s846_s21   ;;  %s3959_s30 = sphi %s3957_s30, %s847_s30  }
  0xc7   : >> { %840 = vst [vmem:[%s3959_s30] sm:$0xff] %v839_v50  ;;  %p842_p13 = scmp.ge.s32.totalorder %s841_s26, %s4402_s20  ;;  %p832_p0 = scmp.ge.s32.totalorder %s833_s24, %s4402_s20 }
  0xc9   : >> { %s7004_s26 = smov (%p842_p13, %s841_s26), 0  ;;  %835 = sbr.rel (!%p832_p0) target bundleno = 198 (0xc6), region = 386 }
  0xca   : >> { %s2964_s25 = sshll.u32 %s7004_s26, 4  ;;  %s2965_s19 = sshll.u32 %s7004_s26, 3 }
  0xcb   : >> { %s846_s21 = scalar_lea.vmem %s4406_s28, %s2964_s25   ;;  %s847_s30 = scalar_lea.vmem %s829_s29, %s2965_s19 [#allocation7]  }
  0xcc   : >> { %s3966_s8 = smov %s7004_s26  }
  0xd0 PF: > { %p2966_p1 = scmp.ge.s32.totalorder %s3875_s18, 1  ;;  %p879_p2 = scmp.lt.s32.totalorder %s3875_s18, 5 }
  0xd2   : > { %p880_p4 = pnand %p2966_p1, %p879_p2 }
  0xd4   : > { %883 = sbr.rel (%p880_p4) target bundleno = 1026 (0x402), region = 192 }
  0xdb   : > { %s4418_s1 = sand.u32 1, %s3843_s10   ;;  %s886_s9 = sand.u32 1, %s3851_s12   ;;  %v1053_v51 = vlaneseq }
  0xdc   : > { %s4422_s22 = sshll.u32 %s3863_s15, 4  ;;  %s4425_s11 = sshll.u32 %s886_s9, 7 }
  0xdd   : > { %p982_p5 = scmp.lt.s32.totalorder %s4422_s22, 31  ;;  %v1054_v52 = vshrl.u32 %v1053_v51, 7  ;;  %v1105_v54 = vand.u32 127, %v1053_v51  ;;  %s4450_s28 = scalar_lea.vmem [#allocation6], %s4425_s11 }
  0xde   : > { %v4453_v59 = vld [vmem:[%s4450_s28] sm:$0xff]  ;;  %v4456_v0 = vld [vmem:[%s4450_s28 + $0x8] sm:$0xff]  ;;  %v4459_v1 = vld [vmem:[%s4450_s28 + $0x10] sm:$0xff]  ;;  %s5092_s23 = scalar_lea.vmem [#allocation5], %s4425_s11  ;;  %s965_s30 = scalar_lea.vmem [#allocation10], %s4418_s1 }
  0xdf   : > { %s983_s20 = scalar_select %p982_p5, %s4422_s22, 31  ;;  %v1055_v53 = vadd.s32 8, %v1054_v52  ;;  %v1056_v55 = vadd.s32 16, %v1054_v52  ;;  %v1057_v56 = vadd.s32 24, %v1054_v52  ;;  %v1058_v57 = vadd.s32 32, %v1054_v52  ;;  %v4462_v2 = vld [vmem:[%s4450_s28 + $0x18] sm:$0xff] }
  0xe0   : > { %v1059_v58 = vadd.s32 40, %v1054_v52  ;;  %v1060_v60 = vadd.s32 48, %v1054_v52  ;;  %v1061_v61 = vadd.s32 56, %v1054_v52  ;;  %v1062_v62 = vadd.s32 64, %v1054_v52  ;;  %v4465_v6 = vld [vmem:[%s4450_s28 + $0x20] sm:$0xff]  ;;  %v4468_v7 = vld [vmem:[%s4450_s28 + $0x28] sm:$0xff] }
  0xe1   : > { %s2971_s27 = sshll.u32 %s983_s20, 3  ;;  %s2978_s20 = sshll.u32 %s3863_s15, 7  ;;  %v1063_v63 = vadd.s32 72, %v1054_v52  ;;  %v1064_v3 = vadd.s32 80, %v1054_v52  ;;  %v1065_v4 = vadd.s32 88, %v1054_v52  ;;  %v1066_v5 = vadd.s32 96, %v1054_v52 }
  0xe2   : > { %s4431_s29 = scalar_lea.vmem %s6509_s4, %s2971_s27  ;;  %s4436_s21 = scalar_lea.vmem %s6510_s5, %s2971_s27  ;;  %v1067_v8 = vadd.s32 104, %v1054_v52  ;;  %v1068_v9 = vadd.s32 112, %v1054_v52  ;;  %v1069_v10 = vadd.s32 120, %v1054_v52  ;;  %v1071_v11 = vstv %s2978_s20  ;;  %v4472_v12 = vld [vmem:[%s4450_s28 + $0x30] sm:$0xff]  ;;  %v4475_v13 = vld [vmem:[%s4450_s28 + $0x38] sm:$0xff]  ;;  %v4482_v18 = vld [vmem:[%s4450_s28 + $0x40] sm:$0xff] }
  0xe3   : > { %s4441_s26 = scalar_lea.vmem %s6511_s6, %s2971_s27  ;;  %s4446_s9 = scalar_lea.vmem %s6512_s7, %s2971_s27  ;;  %v4488_v23 = vadd.s32 %v1071_v11, %v1054_v52  ;;  %v4490_v24 = vadd.s32 %v1071_v11, %v1055_v53  ;;  %v4495_v27 = vadd.s32 %v1071_v11, %v1056_v55  ;;  %v4497_v28 = vadd.s32 %v1071_v11, %v1057_v56  ;;  %v4504_v31 = vld [vmem:[%s4450_s28 + $0x48] sm:$0xff]  ;;  %v4507_v32 = vld [vmem:[%s4450_s28 + $0x50] sm:$0xff]  ;;  %v4518_v37 = vld [vmem:[%s4450_s28 + $0x58] sm:$0xff] }
  0xe4   : > { %s2979_s15 = sshll.u32 %s3859_s14, 7  ;;  %v4499_v29 = vadd.s32 %v1071_v11, %v1058_v57  ;;  %v4501_v30 = vadd.s32 %v1071_v11, %v1059_v58  ;;  %v4509_v33 = vadd.s32 %v1071_v11, %v1060_v60  ;;  %v4511_v34 = vadd.s32 %v1071_v11, %v1061_v61  ;;  %v4521_v38 = vld [vmem:[%s4450_s28 + $0x60] sm:$0xff]  ;;  %v4524_v39 = vld [vmem:[%s4450_s28 + $0x68] sm:$0xff]  ;;  %v4535_v44 = vld [vmem:[%s4450_s28 + $0x70] sm:$0xff]  ;;  %s4541_s27 = scalar_lea.vmem [#allocation7], %s4425_s11 }
  0xe5   : > { %v1107_v25 = vstv %s2979_s15  ;;  %v4513_v35 = vadd.s32 %v1071_v11, %v1062_v62  ;;  %v4515_v36 = vadd.s32 %v1071_v11, %v1063_v63  ;;  %6634 = vst [vmem:[#allocation22_spill] sm:$0xff] %v4521_v38  ;;  %6635 = vst [vmem:[#allocation23_spill] sm:$0xff] %v4524_v39  ;;  %v4526_v40 = vadd.s32 %v1071_v11, %v1064_v3  ;;  %v4538_v45 = vld [vmem:[%s4450_s28 + $0x78] sm:$0xff]  ;;  %v4544_v46 = vld [vmem:[%s4541_s27] sm:$0xff]  ;;  %s959_s11 = scalar_lea.vmem [#allocation8], %s4418_s1  ;;  %p2980_p6 = scmp.ne.s32.totalorder %s3859_s14, 0 }
  0xe6   : > { %v4528_v41 = vadd.s32 %v1071_v11, %v1065_v4  ;;  %v4530_v42 = vadd.s32 %v1071_v11, %v1066_v5  ;;  %v4532_v43 = vadd.s32 %v1107_v25, %v1105_v54  ;;  %6637 = vst [vmem:[#allocation25_spill] sm:$0xff] %v4535_v44  ;;  %6638 = vst [vmem:[#allocation26_spill] sm:$0xff] %v4538_v45  ;;  %v4553_v51 = vld [vmem:[%s4541_s27 + $0x8] sm:$0xff]  ;;  %v4556_v52 = vld [vmem:[%s4541_s27 + $0x10] sm:$0xff]  ;;  %vm1088_vm0 = vcmp.lt.s32.totalorder %v4488_v23, 192 }
  0xe7   : > { %v4546_v47 = vadd.s32 %v1071_v11, %v1067_v8  ;;  %v4548_v48 = vadd.s32 %v1071_v11, %v1068_v9  ;;  %6641 = vst [vmem:[#allocation29_spill] sm:$0xff] %v4556_v52  ;;  %v1142_v58 = vand.u32 2147483647, %v4453_v59  ;;  %v1143_v60 = vand.u32 2147483647, %v4456_v0  ;;  %v4568_v61 = vld [vmem:[%s4541_s27 + $0x18] sm:$0xff] }
  0xe8   : > { %6636 = vst [vmem:[#allocation24_spill] sm:$0xff] %v4532_v43  ;;  %vm6559_vm1 = vcmp.lt.s32.totalorder %v4532_v43, 160  ;;  %6642 = vst [vmem:[#allocation30_spill] sm:$0xff] %v4568_v61  ;;  %v4570_v62 = vadd.s32 %v1071_v11, %v1069_v10  ;;  %vm1089_vm2 = vcmp.lt.s32.totalorder %v4490_v24, 192  ;;  %v1144_v63 = vand.u32 2147483647, %v4459_v1 }
  0xe9   : > { %6639 = vst [vmem:[#allocation27_spill] sm:$0xff] %v4546_v47  ;;  %6640 = vst [vmem:[#allocation28_spill] sm:$0xff] %v4548_v48  ;;  %v1145_v3 = vand.u32 2147483647, %v4462_v2  ;;  %v1146_v4 = vand.u32 2147483647, %v4465_v6  ;;  %v4582_v10 = vmul.f32 %v4544_v46, %v4544_v46  ;;  %v4590_v56 = vmul.f32 %v4553_v51, %v4553_v51 }
  0xea   : > { %6643 = vst [vmem:[#allocation31_spill] sm:$0xff] %v4570_v62  ;;  %vm1090_vm3 = vcmp.lt.s32.totalorder %v4495_v27, 192  ;;  %v1147_v5 = vand.u32 2147483647, %v4468_v7  ;;  %v1148_v8 = vand.u32 2147483647, %v4472_v12  ;;  %v4596_v50 = vmul.f32 %v4556_v52, %v4556_v52  ;;  %vm4633_vm11 = vmand %vm1088_vm0, %vm6559_vm1 }
  0xeb   : > { %v1149_v9 = vand.u32 2147483647, %v4475_v13  ;;  %6644 = vst [vmem:[#allocation32_spill] sm:$0xff] %v4582_v10  ;;  %vm1091_vm4 = vcmp.lt.s32.totalorder %v4497_v28, 192  ;;  %v1150_v11 = vand.u32 2147483647, %v4482_v18  ;;  %vm4654_vm12 = vmand %vm1089_vm2, %vm6559_vm1 }
  0xec   : > { %v1151_v25 = vand.u32 2147483647, %v4504_v31  ;;  %v1152_v57 = vand.u32 2147483647, %v4507_v32  ;;  %6645 = vst [vmem:[#allocation33_spill] sm:$0xff] %v4590_v56  ;;  %vm1092_vm5 = vcmp.lt.s32.totalorder %v4499_v29, 192  ;;  %vm4666_vm14 = vmand %vm1090_vm3, %vm6559_vm1 }
  0xed   : > { %v1153_v55 = vand.u32 2147483647, %v4518_v37  ;;  %v1158_v54 = vsub.f32 0.0, %v1142_v58  ;;  %v1159_v53 = vsub.f32 0.0, %v1143_v60  ;;  %6646 = vst [vmem:[#allocation34_spill] sm:$0xff] %v4596_v50  ;;  %vm1093_vm6 = vcmp.lt.s32.totalorder %v4501_v30, 192  ;;  %vm4674_vm15 = vmand %vm1091_vm4, %vm6559_vm1 }
  0xee   : > { %v1154_v49 = vand.u32 2147483647, %v4521_v38  ;;  %v1155_v26 = vand.u32 2147483647, %v4524_v39  ;;  %v1160_v22 = vsub.f32 0.0, %v1144_v63  ;;  %v1161_v21 = vsub.f32 0.0, %v1145_v3  ;;  %vm4688_vm0 = vmand %vm1092_vm5, %vm6559_vm1 }
  0xef   : > { %vm1094_vm7 = vcmp.lt.s32.totalorder %v4509_v33, 192  ;;  %v1156_v20 = vand.u32 2147483647, %v4535_v44  ;;  %v1157_v19 = vand.u32 2147483647, %v4538_v45  ;;  %v1162_v58 = vsub.f32 0.0, %v1146_v4  ;;  %vm4704_vm2 = vmand %vm1093_vm6, %vm6559_vm1 }
  0xf0   : > { %v4606_v60 = vmul.f32 %v4568_v61, %v4568_v61  ;;  %v4609_v17 = vld [vmem:[%s4541_s27 + $0x20] sm:$0xff]  ;;  %vm1095_vm8 = vcmp.lt.s32.totalorder %v4511_v34, 192  ;;  %v1163_v16 = vsub.f32 0.0, %v1147_v5  ;;  %v1164_v63 = vsub.f32 0.0, %v1148_v8  ;;  %v4615_v5 = vld [vmem:[%s4541_s27 + $0x28] sm:$0xff]  ;;  %v4618_v8 = vld [vmem:[%s4541_s27 + $0x30] sm:$0xff] }
  0xf1   : > { %6648 = vst [vmem:[#allocation36_spill] sm:$0xff] %v4609_v17  ;;  %v1165_v3 = vsub.f32 0.0, %v1149_v9  ;;  %v1166_v15 = vsub.f32 0.0, %v1150_v11  ;;  %vm1096_vm9 = vcmp.lt.s32.totalorder %v4513_v35, 192  ;;  %v1167_v14 = vsub.f32 0.0, %v1151_v25  ;;  %v4621_v25 = vld [vmem:[%s4541_s27 + $0x38] sm:$0xff]  ;;  %vm4724_vm3 = vmand %vm1094_vm7, %vm6559_vm1 }
  0xf2   : > { %6647 = vst [vmem:[#allocation35_spill] sm:$0xff] %v4606_v60  ;;  %v1168_v4 = vsub.f32 0.0, %v1152_v57  ;;  %v1174_v45 = vmul.f32 1.442695, %v1158_v54  ;;  %v1176_v44 = vmul.f32 1.442695, %v1159_v53  ;;  %vm4744_vm4 = vmand %vm1095_vm8, %vm6559_vm1 }
  0xf3   : > { %vm1097_vm10 = vcmp.lt.s32.totalorder %v4515_v36, 192  ;;  %v1169_v39 = vsub.f32 0.0, %v1153_v55  ;;  %v1170_v62 = vsub.f32 0.0, %v1154_v49  ;;  %v1178_v48 = vmul.f32 1.442695, %v1160_v22  ;;  %v4624_v53 = vld [vmem:[%s4541_s27 + $0x40] sm:$0xff]  ;;  %vm4764_vm5 = vmand %vm1096_vm9, %vm6559_vm1 }
  0xf4   : > { %v1180_v38 = vmul.f32 1.442695, %v1161_v21  ;;  %v1171_v9 = vsub.f32 0.0, %v1155_v26  ;;  %v1172_v11 = vsub.f32 0.0, %v1156_v20  ;;  %3443 = vpow2.f32 %v1174_v45  ;;  %v4627_v54 = vld [vmem:[%s4541_s27 + $0x48] sm:$0xff]  ;;  %v4642_v45 = vld [vmem:[%s4541_s27 + $0x50] sm:$0xff]  ;;  %vm4781_vm6 = vmand %vm1097_vm10, %vm6559_vm1 }
  0xf5   : > { %v1182_v57 = vmul.f32 1.442695, %v1162_v58  ;;  %v6649_v21 = vmov 0  ;;  %v1173_v22 = vsub.f32 0.0, %v1157_v19  ;;  %3445 = vpow2.f32 %v1176_v44  ;;  %6653 = vst [vmem:[#allocation39_spill] sm:$0xff] %v4642_v45  ;;  %v4645_v49 = vld [vmem:[%s4541_s27 + $0x58] sm:$0xff] }
  0xf6   : > { %v6650_v21 = vsel %vm4633_vm11, 4294967295, %v6649_v21  ;;  %v1184_v20 = vmul.f32 1.442695, %v1163_v16  ;;  %v4639_v26 = vmul.f32 %v4609_v17, %v4609_v17  ;;  %6654 = vst [vmem:[#allocation40_spill] sm:$0xff] %v4645_v49  ;;  %v4648_v55 = vld [vmem:[%s4541_s27 + $0x60] sm:$0xff]  ;;  %v6656_v23 = vmov 0 }
  0xf7   : > { %6651 = vst [vmem:[#allocation37_spill] sm:$0xff] %v6650_v21  ;;  %6655 = vst [vmem:[#allocation41_spill] sm:$0xff] %v4648_v55  ;;  %v6657_v23 = vsel %vm4654_vm12, 4294967295, %v6656_v23  ;;  %3447 = vpow2.f32 %v1178_v48  ;;  %v1186_v16 = vmul.f32 1.442695, %v1164_v63  ;;  %v4659_v58 = vld [vmem:[%s4541_s27 + $0x68] sm:$0xff] }
  0xf8   : > { %6652 = vst [vmem:[#allocation38_spill] sm:$0xff] %v4639_v26  ;;  %6658 = vst [vmem:[#allocation42_spill] sm:$0xff] %v6657_v23  ;;  %v1188_v19 = vmul.f32 1.442695, %v1165_v3  ;;  %v1190_v44 = vmul.f32 1.442695, %v1166_v15  ;;  %3449 = vpow2.f32 %v1180_v38  ;;  %v4694_v38 = vmul.f32 %v4615_v5, %v4615_v5 }
  0xf9   : > { %6659 = vst [vmem:[#allocation43_spill] sm:$0xff] %v4659_v58  ;;  %vm1098_vm13 = vcmp.lt.s32.totalorder %v4526_v40, 192  ;;  %v6660_v24 = vmov 0  ;;  %v1192_v17 = vmul.f32 1.442695, %v1167_v14  ;;  %v6663_v15 = vmov 0 }
  0xfa   : > { %v6661_v24 = vsel %vm4666_vm14, 4294967295, %v6660_v24  ;;  %v1194_v48 = vmul.f32 1.442695, %v1168_v4  ;;  %v1196_v47 = vmul.f32 1.442695, %v1169_v39  ;;  %v6664_v15 = vsel %vm4674_vm15, 4294967295, %v6663_v15  ;;  %vm4810_vm7 = vmand %vm1098_vm13, %vm6559_vm1 }
  0xfb   : > { %6662 = vst [vmem:[#allocation44_spill] sm:$0xff] %v6661_v24  ;;  %6665 = vst [vmem:[#allocation45_spill] sm:$0xff] %v6664_v15  ;;  %3451 = vpow2.f32 %v1182_v57  ;;  %v1198_v63 = vmul.f32 1.442695, %v1170_v62  ;;  %v1200_v3 = vmul.f32 1.442695, %v1171_v9  ;;  %v4698_v39 = vmul.f32 %v4618_v8, %v4618_v8 }
  0xfc   : > { %v1202_v27 = vmul.f32 1.442695, %v1172_v11  ;;  %v4679_v61 = vld [vmem:[%s4541_s27 + $0x70] sm:$0xff]  ;;  %v4682_v52 = vld [vmem:[%s4541_s27 + $0x78] sm:$0xff]  ;;  %v6668_v14 = vmov 0  ;;  %3453 = vpow2.f32 %v1184_v20  ;;  %6671 = vst [vmem:[#allocation49_spill] sm:$0xff] %v4694_v38  ;;  %v4710_v62 = vmul.f32 %v4621_v25, %v4621_v25 }
  0xfd   : > { %6666 = vst [vmem:[#allocation46_spill] sm:$0xff] %v4679_v61  ;;  %6667 = vst [vmem:[#allocation47_spill] sm:$0xff] %v4682_v52  ;;  %v6669_v14 = vsel %vm4688_vm0, 4294967295, %v6668_v14  ;;  %v1204_v28 = vmul.f32 1.442695, %v1173_v22  ;;  %v6673_v29 = vmov 0  ;;  %3455 = vpow2.f32 %v1186_v16 }
  0xfe   : > { %6670 = vst [vmem:[#allocation48_spill] sm:$0xff] %v6669_v14  ;;  %6672 = vst [vmem:[#allocation50_spill] sm:$0xff] %v4698_v39  ;;  %v6674_v29 = vsel %vm4704_vm2, 4294967295, %v6673_v29  ;;  %v4714_v4 = vmul.f32 %v4624_v53, %v4624_v53  ;;  %v4718_v9 = vmul.f32 %v4627_v54, %v4627_v54  ;;  %v6679_v30 = vmov 0 }
  0xff   : > { %6675 = vst [vmem:[#allocation51_spill] sm:$0xff] %v6674_v29  ;;  %6676 = vst [vmem:[#allocation52_spill] sm:$0xff] %v4710_v62  ;;  %v6680_v30 = vsel %vm4724_vm3, 4294967295, %v6679_v30  ;;  %3457 = vpow2.f32 %v1188_v19  ;;  %v4730_v11 = vmul.f32 %v4642_v45, %v4642_v45  ;;  %v4734_v57 = vmul.f32 %v4645_v49, %v4645_v49 }
 0x100   : > { %6677 = vst [vmem:[#allocation53_spill] sm:$0xff] %v4714_v4  ;;  %6678 = vst [vmem:[#allocation54_spill] sm:$0xff] %v4718_v9  ;;  %v4738_v22 = vmul.f32 %v4648_v55, %v4648_v55  ;;  %v6685_v33 = vmov 0  ;;  %3459 = vpow2.f32 %v1190_v44  ;;  %v4750_v20 = vmul.f32 %v4659_v58, %v4659_v58 }
 0x101   : > { %6681 = vst [vmem:[#allocation55_spill] sm:$0xff] %v6680_v30  ;;  %6682 = vst [vmem:[#allocation56_spill] sm:$0xff] %v4730_v11  ;;  %v6686_v33 = vsel %vm4744_vm4, 4294967295, %v6685_v33  ;;  %v4754_v16 = vmul.f32 %v4679_v61, %v4679_v61  ;;  %v4758_v19 = vmul.f32 %v4682_v52, %v4682_v52  ;;  %v6691_v34 = vmov 0 }
 0x102   : > { %6683 = vst [vmem:[#allocation57_spill] sm:$0xff] %v4734_v57  ;;  %6684 = vst [vmem:[#allocation58_spill] sm:$0xff] %v4738_v22  ;;  %v6692_v34 = vsel %vm4764_vm5, 4294967295, %v6691_v34  ;;  %3461 = vpow2.f32 %v1192_v17  ;;  %v6694_v35 = vmov 0 }
 0x103   : > { %6687 = vst [vmem:[#allocation59_spill] sm:$0xff] %v6686_v33  ;;  %6688 = vst [vmem:[#allocation60_spill] sm:$0xff] %v4750_v20  ;;  %v3444_v20 = vpop.eup %3443  ;;  %v6695_v35 = vsel %vm4781_vm6, 4294967295, %v6694_v35  ;;  %3463 = vpow2.f32 %v1194_v48 }
 0x104   : > { %6689 = vst [vmem:[#allocation61_spill] sm:$0xff] %v4754_v16  ;;  %6690 = vst [vmem:[#allocation62_spill] sm:$0xff] %v4758_v19  ;;  %v3446_v44 = vpop.eup %3445  ;;  %3465 = vpow2.f32 %v1196_v47  ;;  %v1209_v36 = vmul.f32 -0.5, %v3444_v20  ;;  %v1206_v60 = vadd.f32 1.0, %v3444_v20  ;;  %v1212_v47 = vand.u32 2147483647, %v3444_v20 }
 0x105   : > { %6693 = vst [vmem:[#allocation63_spill] sm:$0xff] %v6692_v34  ;;  %6696 = vst [vmem:[#allocation64_spill] sm:$0xff] %v6695_v35  ;;  %v3448_v17 = vpop.eup %3447  ;;  %3467 = vpow2.f32 %v1198_v63  ;;  %v1218_v56 = vmul.f32 -0.5, %v3446_v44  ;;  %v1215_v38 = vadd.f32 1.0, %v3446_v44  ;;  %v6697_v63 = vmov 0 }
 0x106   : > { %v3450_v19 = vpop.eup %3449  ;;  %3469 = vpow2.f32 %v1200_v3  ;;  %v6698_v63 = vsel %vm4810_vm7, 4294967295, %v6697_v63  ;;  %v1210_v48 = vadd.f32 1.0, %v1209_v36  ;;  %v1224_v16 = vadd.f32 1.0, %v3448_v17 }
 0x107   : > { %v3452_v39 = vpop.eup %3451  ;;  %6699 = vst [vmem:[#allocation65_spill] sm:$0xff] %v6698_v63  ;;  %3471 = vpow2.f32 %v1202_v27  ;;  %v1227_v4 = vmul.f32 -0.5, %v3448_v17  ;;  %v1219_v62 = vadd.f32 1.0, %v1218_v56  ;;  %v1221_v26 = vand.u32 2147483647, %v3446_v44 }
 0x108   : > { %v3454_v3 = vpop.eup %3453  ;;  %3473 = vpow2.f32 %v1204_v28  ;;  %v1233_v10 = vadd.f32 1.0, %v3450_v19  ;;  %v1230_v9 = vand.u32 2147483647, %v3448_v17  ;;  %v1236_v57 = vmul.f32 -0.5, %v3450_v19 }
 0x109   : > { %v3456_v22 = vpop.eup %3455  ;;  %3475 = vlog2.f32 %v1206_v60  ;;  %v1228_v50 = vadd.f32 1.0, %v1227_v4  ;;  %v1239_v40 = vand.u32 2147483647, %v3450_v19  ;;  %v1242_v34 = vadd.f32 1.0, %v3452_v39 }
 0x10a   : > { %v4814_v35 = vpop.eup %3457  ;;  %3477 = vlog2.f32 %v1215_v38  ;;  %v4821_v28 = vmul.f32 %v3444_v20, %v1210_v48  ;;  %vm4823_vm8 = vcmp.lt.f32.partialorder %v1212_v47, 0.0004427343  ;;  %v1237_v60 = vadd.f32 1.0, %v1236_v57 }
 0x10b   : > { %v4819_v36 = vpop.eup %3459  ;;  %3479 = vlog2.f32 %v1224_v16  ;;  %v1245_v4 = vmul.f32 -0.5, %v3452_v39  ;;  %v4829_v38 = vmul.f32 %v3446_v44, %v1219_v62  ;;  %v1248_v30 = vand.u32 2147483647, %v3452_v39 }
 0x10c   : > { %v4827_v33 = vpop.eup %3461  ;;  %3481 = vlog2.f32 %v1233_v10  ;;  %v1251_v29 = vadd.f32 1.0, %v3454_v3  ;;  %vm4833_vm9 = vcmp.lt.f32.partialorder %v1221_v26, 0.0004427343  ;;  %v4837_v20 = vmul.f32 %v3448_v17, %v1228_v50 }
 0x10d   : > { %v4831_v63 = vpop.eup %3463  ;;  %vm4839_vm10 = vcmp.lt.f32.partialorder %v1230_v9, 0.0004427343  ;;  %3483 = vlog2.f32 %v1242_v34  ;;  %v1246_v57 = vadd.f32 1.0, %v1245_v4  ;;  %v1254_v16 = vmul.f32 -0.5, %v3454_v3 }
 0x10e   : > { %v4843_v62 = vpop.eup %3465  ;;  %vm4845_vm13 = vcmp.lt.f32.partialorder %v1239_v40, 0.0004427343  ;;  %3485 = vlog2.f32 %v1251_v29  ;;  %v1257_v26 = vand.u32 2147483647, %v3454_v3  ;;  %v1260_v44 = vadd.f32 1.0, %v3456_v22 }
 0x10f   : > { %v4849_v47 = vpop.eup %3467  ;;  %v4851_v50 = vmul.f32 %v3450_v19, %v1237_v60  ;;  %v1255_v9 = vadd.f32 1.0, %v1254_v16  ;;  %v1263_v17 = vmul.f32 -0.5, %v3456_v22  ;;  %v1266_v11 = vand.u32 2147483647, %v3456_v22 }
 0x110   : > { %v4853_v14 = vpop.eup %3469  ;;  %vm4855_vm1 = vcmp.lt.f32.partialorder %v1248_v30, 0.0004427343  ;;  %3487 = vlog2.f32 %v1260_v44  ;;  %v1269_v40 = vadd.f32 1.0, %v4814_v35  ;;  %v1272_v29 = vmul.f32 -0.5, %v4814_v35 }
 0x111   : > { %v4861_v4 = vpop.eup %3471  ;;  %v4863_v15 = vmul.f32 %v3452_v39, %v1246_v57  ;;  %vm4865_vm7 = vcmp.lt.f32.partialorder %v1257_v26, 0.0004427343  ;;  %v1264_v60 = vadd.f32 1.0, %v1263_v17  ;;  %v1275_v16 = vand.u32 2147483647, %v4814_v35 }
 0x112   : > { %v4870_v30 = vpop.eup %3473  ;;  %3489 = vlog2.f32 %v1269_v40  ;;  %v1273_v24 = vadd.f32 1.0, %v1272_v29  ;;  %v1278_v44 = vadd.f32 1.0, %v4819_v36  ;;  %v1281_v23 = vmul.f32 -0.5, %v4819_v36 }
 0x113   : > { %v3476_v52 = vpop.eup %3475  ;;  %v4874_v43 = vmul.f32 %v3454_v3, %v1255_v9  ;;  %vm4876_vm6 = vcmp.lt.f32.partialorder %v1266_v11, 0.0004427343  ;;  %v1284_v57 = vand.u32 2147483647, %v4819_v36  ;;  %v1287_v26 = vadd.f32 1.0, %v4827_v33 }
 0x114   : > { %v3478_v17 = vpop.eup %3477  ;;  %v4882_v21 = vmul.f32 0.6931472, %v3476_v52  ;;  %v4884_v40 = vmul.f32 %v3456_v22, %v1264_v60  ;;  %3491 = vlog2.f32 %v1278_v44  ;;  %v1282_v29 = vadd.f32 1.0, %v1281_v23 }
 0x115   : > { %v3480_v61 = vpop.eup %3479  ;;  %v4886_v58 = vmul.f32 0.6931472, %v3478_v17  ;;  %vm4888_vm5 = vcmp.lt.f32.partialorder %v1275_v16, 0.0004427343  ;;  %3493 = vlog2.f32 %v1287_v26  ;;  %v1290_v11 = vmul.f32 -0.5, %v4827_v33 }
 0x116   : > { %v3482_v9 = vpop.eup %3481  ;;  %v4897_v22 = vmul.f32 0.6931472, %v3480_v61  ;;  %v4900_v23 = vmul.f32 %v4814_v35, %v1273_v24  ;;  %v1293_v60 = vand.u32 2147483647, %v4827_v33  ;;  %v4906_v26 = vmul.f32 %v4819_v36, %v1282_v29 }
 0x117   : > { %v3484_v16 = vpop.eup %3483  ;;  %v4903_v44 = vmul.f32 0.6931472, %v3482_v9  ;;  %vm4908_vm4 = vcmp.lt.f32.partialorder %v1284_v57, 0.0004427343  ;;  %v1291_v55 = vadd.f32 1.0, %v1290_v11  ;;  %v1296_v52 = vadd.f32 1.0, %v4831_v63 }
 0x118   : > { %v3486_v61 = vpop.eup %3485  ;;  %v1223_v24 = vsel %vm4833_vm9, %v4829_v38, %v4886_v58  ;;  %v4921_v36 = vmul.f32 0.6931472, %v3484_v16  ;;  %v1299_v57 = vmul.f32 -0.5, %v4831_v63  ;;  %vm4930_vm3 = vcmp.lt.f32.partialorder %v1293_v60, 0.0004427343 }
 0x119   : > { %v4928_v11 = vmul.f32 0.6931472, %v3486_v61  ;;  %3495 = vlog2.f32 %v1296_v52  ;;  %v4935_v27 = vmul.f32 %v4827_v33, %v1291_v55  ;;  %v1302_v16 = vand.u32 2147483647, %v4831_v63 }
 0x11a   : > { %v3488_v58 = vpop.eup %3487  ;;  %v1300_v38 = vadd.f32 1.0, %v1299_v57  ;;  %v1305_v35 = vadd.f32 1.0, %v4843_v62  ;;  %v1250_v61 = vsel %vm4855_vm1, %v4863_v15, %v4921_v36  ;;  %v1308_v60 = vmul.f32 -0.5, %v4843_v62 }
 0x11b   : > { %v1262_v29 = vmul.f32 0.6931472, %v3488_v58  ;;  %v1311_v49 = vand.u32 2147483647, %v4843_v62  ;;  %v1259_v55 = vsel %vm4865_vm7, %v4874_v43, %v4928_v11  ;;  %v1314_v57 = vadd.f32 1.0, %v4849_v47 }
 0x11c   : > { %v3490_v52 = vpop.eup %3489  ;;  %v4950_v33 = vmul.f32 %v4831_v63, %v1300_v38  ;;  %3497 = vlog2.f32 %v1305_v35  ;;  %vm4956_vm1 = vcmp.lt.f32.partialorder %v1302_v16, 0.0004427343  ;;  %v1309_v58 = vadd.f32 1.0, %v1308_v60 }
 0x11d   : > { %v1268_v15 = vsel %vm4876_vm6, %v4884_v40, %v1262_v29  ;;  %v1271_v34 = vmul.f32 0.6931472, %v3490_v52  ;;  %3499 = vlog2.f32 %v1314_v57  ;;  %v1317_v43 = vmul.f32 -0.5, %v4849_v47  ;;  %v1007_v52 = vld [vmem:[%s5092_s23 + $0x10] sm:$0xff] }
 0x11e   : > { %v3492_v45 = vpop.eup %3491  ;;  %v1320_v63 = vand.u32 2147483647, %v4849_v47  ;;  %v1323_v19 = vadd.f32 1.0, %v4853_v14  ;;  %vm4966_vm6 = vcmp.lt.f32.partialorder %v1311_v49, 0.0004427343  ;;  %v1326_v11 = vmul.f32 -0.5, %v4853_v14 }
 0x11f   : > { %v3494_v35 = vpop.eup %3493  ;;  %v1277_v39 = vsel %vm4888_vm5, %v4900_v23, %v1271_v34  ;;  %v1280_v40 = vmul.f32 0.6931472, %v3492_v45  ;;  %v1310_v16 = vmul.f32 %v4843_v62, %v1309_v58  ;;  %v1318_v60 = vadd.f32 1.0, %v1317_v43 }
 0x120   : > { %v1289_v38 = vmul.f32 0.6931472, %v3494_v35  ;;  %3501 = vlog2.f32 %v1323_v19  ;;  %vm4972_vm7 = vcmp.lt.f32.partialorder %v1320_v63, 0.0004427343  ;;  %v1327_v57 = vadd.f32 1.0, %v1326_v11 }
 0x121   : > { %v1329_v3 = vand.u32 2147483647, %v4853_v14  ;;  %v1332_v45 = vadd.f32 1.0, %v4861_v4  ;;  %v1286_v49 = vsel %vm4908_vm4, %v4906_v26, %v1280_v40  ;;  %v1335_v62 = vmul.f32 -0.5, %v4861_v4  ;;  %v6755_v26 = vld [vmem:[#allocation23_spill] sm:$0xff] }
 0x122   : > { %v1295_v23 = vsel %vm4930_vm3, %v4935_v27, %v1289_v38  ;;  %v1338_v34 = vand.u32 2147483647, %v4861_v4  ;;  %v1319_v43 = vmul.f32 %v4849_v47, %v1318_v60  ;;  %v4988_v63 = vmul.f32 %v4853_v14, %v1327_v57  ;;  %v1019_v27 = vld [vmem:[%s5092_s23 + $0x70] sm:$0xff] }
 0x123   : > { %v3496_v58 = vpop.eup %3495  ;;  %3503 = vlog2.f32 %v1332_v45  ;;  %v1341_v19 = vadd.f32 1.0, %v4870_v30  ;;  %vm4991_vm5 = vcmp.lt.f32.partialorder %v1329_v3, 0.0004427343  ;;  %v1336_v17 = vadd.f32 1.0, %v1335_v62 }
 0x124   : > { %v1298_v35 = vmul.f32 0.6931472, %v3496_v58  ;;  %v1344_v9 = vmul.f32 -0.5, %v4870_v30  ;;  %vm4996_vm3 = vcmp.lt.f32.partialorder %v1338_v34, 0.0004427343  ;;  %v6730_v14 = vmax.f32 %v4453_v59, 0.0 }
 0x125   : > { %3505 = vlog2.f32 %v1341_v19  ;;  %v1347_v47 = vand.u32 2147483647, %v4870_v30  ;;  %v6731_v40 = vsel %vm4823_vm8, %v4821_v28, %v4882_v21  ;;  %v6732_v38 = vmax.f32 %v4456_v0, 0.0  ;;  %v6748_v19 = vld [vmem:[#allocation30_spill] sm:$0xff] }
 0x126   : > { %v5008_v11 = vadd.f32 %v6731_v40, %v6730_v14  ;;  %v3498_v57 = vpop.eup %3497  ;;  %v1304_v3 = vsel %vm4956_vm1, %v4950_v33, %v1298_v35  ;;  %v5018_v45 = vmul.f32 %v4861_v4, %v1336_v17  ;;  %v1345_v59 = vadd.f32 1.0, %v1344_v9  ;;  %v6750_v35 = vld [vmem:[#allocation22_spill] sm:$0xff] }
 0x127   : > { %v5012_v60 = vadd.f32 %v1223_v24, %v6732_v38  ;;  %v6733_v56 = vmax.f32 %v4459_v1, 0.0  ;;  %v6734_v21 = vsel %vm4839_vm10, %v4837_v20, %v4897_v22  ;;  %v1307_v0 = vmul.f32 0.6931472, %v3498_v57  ;;  %v3500_v20 = vpop.eup %3499 }
 0x128   : > { %vm5029_vm4 = vcmp.lt.f32.partialorder %v1347_v47, 0.0004427343  ;;  %v6737_v33 = vmax.f32 %v4462_v2, 0.0  ;;  %v6738_v4 = vsel %vm4845_vm13, %v4851_v50, %v4903_v44  ;;  %v6739_v48 = vmax.f32 %v4465_v6, 0.0  ;;  %v6752_v47 = vld [vmem:[#allocation36_spill] sm:$0xff] }
 0x129   : > { %v5027_v28 = vadd.f32 %v6734_v21, %v6733_v56  ;;  %v5047_v22 = vmul.f32 %v4870_v30, %v1345_v59  ;;  %v6740_v62 = vmax.f32 %v4468_v7, 0.0  ;;  %v6741_v2 = vmax.f32 %v4472_v12, 0.0  ;;  %v6753_v59 = vld [vmem:[#allocation28_spill] sm:$0xff] }
 0x12a   : > { %v5040_v1 = vadd.f32 %v6738_v4, %v6737_v33  ;;  %v5044_v36 = vadd.f32 %v1250_v61, %v6739_v48  ;;  %v6742_v50 = vmax.f32 %v4475_v13, 0.0  ;;  %v1313_v6 = vsel %vm4966_vm6, %v1310_v16, %v1307_v0  ;;  %v3502_v12 = vpop.eup %3501  ;;  %v1009_v0 = vld [vmem:[%s5092_s23 + $0x20] sm:$0xff]  ;;  %v1010_v33 = vld [vmem:[%s5092_s23 + $0x28] sm:$0xff]  ;;  %v1011_v4 = vld [vmem:[%s5092_s23 + $0x30] sm:$0xff] }
 0x12b   : > { %v5051_v34 = vadd.f32 %v1259_v55, %v6740_v62  ;;  %v5055_v10 = vadd.f32 %v1268_v15, %v6741_v2  ;;  %v1316_v61 = vmul.f32 0.6931472, %v3500_v20  ;;  %v6743_v30 = vmax.f32 %v4482_v18, 0.0  ;;  %v6754_v48 = vld [vmem:[#allocation31_spill] sm:$0xff] }
 0x12c   : > { %v5059_v44 = vadd.f32 %v1277_v39, %v6742_v50  ;;  %v6744_v7 = vmax.f32 %v4504_v31, 0.0  ;;  %vm1099_vm8 = vcmp.lt.s32.totalorder %v4528_v41, 192  ;;  %v6745_v13 = vmax.f32 %v4507_v32, 0.0  ;;  %v6757_v2 = vld [vmem:[#allocation39_spill] sm:$0xff]  ;;  %v6758_v50 = vld [vmem:[#allocation40_spill] sm:$0xff] }
 0x12d   : > { %v5065_v58 = vadd.f32 %v1286_v49, %v6743_v30  ;;  %v6746_v39 = vmax.f32 %v4518_v37, 0.0  ;;  %v1366_v18 = vmul.f32 %v5008_v11, %v4544_v46  ;;  %v1367_v16 = vmul.f32 %v5012_v60, %v4553_v51  ;;  %v1005_v46 = vld [vmem:[%s5092_s23] sm:$0xff]  ;;  %v1006_v51 = vld [vmem:[%s5092_s23 + $0x8] sm:$0xff]  ;;  %v3504_v57 = vpop.eup %3503 }
 0x12e   : > { %v5069_v55 = vadd.f32 %v1295_v23, %v6744_v7  ;;  %v5074_v15 = vadd.f32 %v1304_v3, %v6745_v13  ;;  %vm1100_vm9 = vcmp.lt.s32.totalorder %v4530_v42, 192  ;;  %v1322_v31 = vsel %vm4972_vm7, %v1319_v43, %v1316_v61  ;;  %v6747_v23 = vld [vmem:[#allocation29_spill] sm:$0xff]  ;;  %v6749_v43 = vld [vmem:[#allocation27_spill] sm:$0xff] }
 0x12f   : > { %v5078_v29 = vadd.f32 %v1313_v6, %v6746_v39  ;;  %v1325_v49 = vmul.f32 0.6931472, %v3502_v12  ;;  %v1368_v32 = vmul.f32 %v5027_v28, %v6747_v23  ;;  %v1369_v37 = vmul.f32 %v5040_v1, %v6748_v19  ;;  %v1008_v3 = vld [vmem:[%s5092_s23 + $0x18] sm:$0xff]  ;;  %v1013_v61 = vld [vmem:[%s5092_s23 + $0x40] sm:$0xff]  ;;  %v1014_v30 = vld [vmem:[%s5092_s23 + $0x48] sm:$0xff] }
 0x130   : > { %vm1101_vm10 = vcmp.lt.s32.totalorder %v6749_v43, 192  ;;  %v6751_v17 = vmax.f32 %v6750_v35, 0.0  ;;  %v1370_v14 = vmul.f32 %v5044_v36, %v6752_v47  ;;  %v1371_v40 = vmul.f32 %v5051_v34, %v4615_v5  ;;  %v1012_v6 = vld [vmem:[%s5092_s23 + $0x38] sm:$0xff] }
 0x131   : > { %v1372_v38 = vmul.f32 %v5055_v10, %v4618_v8  ;;  %vm1102_vm13 = vcmp.lt.s32.totalorder %v6753_v59, 192  ;;  %v1331_v56 = vsel %vm4991_vm5, %v4988_v63, %v1325_v49  ;;  %v1373_v21 = vmul.f32 %v5059_v44, %v4621_v25  ;;  %v6759_v7 = vld [vmem:[#allocation41_spill] sm:$0xff]  ;;  %v1015_v49 = vld [vmem:[%s5092_s23 + $0x50] sm:$0xff] }
 0x132   : > { %v5100_v9 = vadd.f32 %v1322_v31, %v6751_v17  ;;  %v1374_v5 = vmul.f32 %v5065_v58, %v4624_v53  ;;  %v1375_v8 = vmul.f32 %v5069_v55, %v4627_v54  ;;  %v1334_v20 = vmul.f32 0.6931472, %v3504_v57  ;;  %v3506_v54 = vpop.eup %3505  ;;  %v1016_v23 = vld [vmem:[%s5092_s23 + $0x58] sm:$0xff]  ;;  %v6763_v17 = vld [vmem:[#allocation43_spill] sm:$0xff] }
 0x133   : > { %v6756_v62 = vmax.f32 %v6755_v26, 0.0  ;;  %v1376_v25 = vmul.f32 %v5074_v15, %v6757_v2  ;;  %v1377_v53 = vmul.f32 %v5078_v29, %v6758_v50  ;;  %v5136_v13 = vadd.f32 %v1366_v18, %v1005_v46  ;;  %v1018_v18 = vld [vmem:[%s5092_s23 + $0x68] sm:$0xff]  ;;  %v6765_v46 = vld [vmem:[#allocation25_spill] sm:$0xff] }
 0x134   : > { %v1378_v12 = vmul.f32 %v5100_v9, %v6759_v7  ;;  %v5138_v39 = vadd.f32 %v1367_v16, %v1006_v51  ;;  %v5140_v31 = vadd.f32 %v1368_v32, %v1007_v52  ;;  %v1340_v19 = vsel %vm4996_vm3, %v5018_v45, %v1334_v20 }
 0x135   : > { %v5125_v63 = vadd.f32 %v1331_v56, %v6756_v62  ;;  %6760 = vst [vmem:[#allocation29_spill] sm:$0xff] %v5136_v13  ;;  %v1343_v35 = vmul.f32 0.6931472, %v3506_v54  ;;  %v5149_v57 = vadd.f32 %v1369_v37, %v1008_v3  ;;  %v1017_v56 = vld [vmem:[%s5092_s23 + $0x60] sm:$0xff]  ;;  %v6766_v16 = vmax.f32 %v6765_v46, 0.0  ;;  %v6808_v46 = vld [vmem:[#allocation64_spill] sm:$0xff] }
 0x136   : > { %6761 = vst [vmem:[#allocation30_spill] sm:$0xff] %v5138_v39  ;;  %6762 = vst [vmem:[#allocation27_spill] sm:$0xff] %v5140_v31  ;;  %v5157_v32 = vadd.f32 %v1370_v14, %v1009_v0  ;;  %v5159_v52 = vadd.f32 %v1371_v40, %v1010_v33  ;;  %v5161_v26 = vadd.f32 %v1372_v38, %v1011_v4  ;;  %v6773_v62 = vld [vmem:[#allocation26_spill] sm:$0xff]  ;;  %v1020_v33 = vld [vmem:[%s5092_s23 + $0x78] sm:$0xff]  ;;  %3507 = vlog2.f32 %v5008_v11 }
 0x137   : > { %v1379_v47 = vmul.f32 %v5125_v63, %v6763_v17  ;;  %6764 = vst [vmem:[#allocation22_spill] sm:$0xff] %v5149_v57  ;;  %v5155_v51 = vadd.f32 %v1340_v19, %v6766_v16  ;;  %v1349_v45 = vsel %vm5029_vm4, %v5047_v22, %v1343_v35  ;;  %v5167_v37 = vadd.f32 %v1373_v21, %v1012_v6  ;;  %v6775_v14 = vld [vmem:[#allocation46_spill] sm:$0xff]  ;;  %v6799_v35 = vld [vmem:[#allocation55_spill] sm:$0xff]  ;;  %v6814_v16 = vld [vmem:[#allocation65_spill] sm:$0xff] }
 0x138   : > { %6767 = vst [vmem:[#allocation36_spill] sm:$0xff] %v5157_v32  ;;  %6768 = vst [vmem:[#allocation28_spill] sm:$0xff] %v5159_v52  ;;  %v5169_v3 = vadd.f32 %v1374_v5, %v1013_v61  ;;  %v5171_v20 = vadd.f32 %v1375_v8, %v1014_v30  ;;  %v6774_v2 = vmax.f32 %v6773_v62, 0.0  ;;  %v5179_v38 = vadd.f32 %v1376_v25, %v1015_v49  ;;  %v6781_v8 = vld [vmem:[#allocation24_spill] sm:$0xff]  ;;  %v6785_v25 = vld [vmem:[#allocation47_spill] sm:$0xff] }
 0x139   : > { %6769 = vst [vmem:[#allocation31_spill] sm:$0xff] %v5161_v26  ;;  %6770 = vst [vmem:[#allocation23_spill] sm:$0xff] %v5167_v37  ;;  %v1380_v40 = vmul.f32 %v5155_v51, %v6775_v14  ;;  %v5181_v0 = vadd.f32 %v1377_v53, %v1016_v23  ;;  %v5184_v24 = vadd.f32 %v1378_v12, %v1017_v56  ;;  %v5192_v5 = vsel %vm4633_vm11, %v5136_v13, 0.0  ;;  %v6806_v56 = vld [vmem:[#allocation63_spill] sm:$0xff]  ;;  %v6818_v14 = vld [vmem:[#allocation57_spill] sm:$0xff] }
 0x13a   : > { %6771 = vst [vmem:[#allocation39_spill] sm:$0xff] %v5169_v3  ;;  %6772 = vst [vmem:[#allocation40_spill] sm:$0xff] %v5171_v20  ;;  %v5175_v50 = vadd.f32 %v1349_v45, %v6774_v2  ;;  %v5186_v22 = vadd.f32 %v1379_v47, %v1018_v18  ;;  %vm6782_vm6 = vcmp.lt.s32.totalorder %v6781_v8, 160  ;;  %3509 = vlog2.f32 %v5012_v60  ;;  %v6820_v8 = vld [vmem:[#allocation60_spill] sm:$0xff] }
 0x13b   : > { %6776 = vst [vmem:[#allocation41_spill] sm:$0xff] %v5179_v38  ;;  %6777 = vst [vmem:[#allocation43_spill] sm:$0xff] %v5181_v0  ;;  %v5204_v54 = vadd.f32 %v1380_v40, %v1019_v27  ;;  %v5210_v6 = vsel %vm4654_vm12, %v5138_v39, 0.0  ;;  %3511 = vlog2.f32 %v5027_v28  ;;  %v5224_v30 = vsel %vm4666_vm14, %v5140_v31, 0.0  ;;  %v6819_v40 = vld [vmem:[#allocation58_spill] sm:$0xff] }
 0x13c   : > { %6778 = vst [vmem:[#allocation25_spill] sm:$0xff] %v5184_v24  ;;  %6779 = vst [vmem:[#allocation26_spill] sm:$0xff] %v5186_v22  ;;  %v1381_v53 = vmul.f32 %v5175_v50, %v6785_v25  ;;  %v5229_v7 = vsel %vm4674_vm15, %v5149_v57, 0.0  ;;  %v5234_v42 = vsel %vm4688_vm0, %v5157_v32, 0.0  ;;  %3513 = vlog2.f32 %v5040_v1  ;;  %v6804_v1 = vld [vmem:[#allocation59_spill] sm:$0xff] }
 0x13d   : > { %vm5198_vm7 = vmand %vm1099_vm8, %vm6782_vm6  ;;  %6786 = vst [vmem:[#allocation46_spill] sm:$0xff] %v5204_v54  ;;  %v5250_v19 = vsel %vm4704_vm2, %v5159_v52, 0.0  ;;  %3515 = vlog2.f32 %v5044_v36  ;;  %vm6809_vm1 = vnez %v6808_v46 }
 0x13e   : > { %vm6788_vm5 = vmmov %vm6782_vm6  ;;  %v5244_v49 = vadd.f32 %v1381_v53, %v1020_v33  ;;  %v5279_v59 = vsel %vm6809_vm1, %v5171_v20, 0.0  ;;  %3517 = vlog2.f32 %v5051_v34  ;;  %v5298_v45 = vsel %vm5198_vm7, %v5181_v0, 0.0  ;;  %v6821_v53 = vld [vmem:[#allocation61_spill] sm:$0xff] }
 0x13f   : > { %vm5216_vm3 = vmand %vm1100_vm9, %vm6788_vm5  ;;  %vm6800_vm9 = vnez %v6799_v35  ;;  %3519 = vlog2.f32 %v5055_v10  ;;  %v1489_v10 = vsel %vm5198_vm7, %v6818_v14, 0.0  ;;  %v6823_v14 = vld [vmem:[#allocation32_spill] sm:$0xff] }
 0x140   : > { %vm6794_vm4 = vmmov %vm6788_vm5  ;;  %6797 = vst [vmem:[#allocation24_spill] sm:$0xff] %v5244_v49  ;;  %v5255_v17 = vsel %vm6800_vm9, %v5161_v26, 0.0  ;;  %vm6805_vm5 = vnez %v6804_v1  ;;  %3521 = vlog2.f32 %v5059_v44  ;;  %v1490_v33 = vsel %vm5216_vm3, %v6819_v40, 0.0  ;;  %v6825_v40 = vld [vmem:[#allocation33_spill] sm:$0xff]  ;;  %v3508_v0 = vpop.eup %3507 }
 0x141   : > { %vm5240_vm8 = vmand %vm1101_vm10, %vm6794_vm4  ;;  %v5269_v47 = vsel %vm6805_vm5, %v5167_v37, 0.0  ;;  %vm6815_vm5 = vnez %v6814_v16  ;;  %3523 = vlog2.f32 %v5065_v58  ;;  %v6822_v37 = vld [vmem:[#allocation62_spill] sm:$0xff] }
 0x142   : > { %vm6801_vm6 = vmmov %vm6794_vm4  ;;  %vm6807_vm4 = vnez %v6806_v56  ;;  %v5293_v27 = vsel %vm6815_vm5, %v5179_v38, 0.0  ;;  %v5309_v34 = vsel %vm5240_vm8, %v5186_v22, 0.0  ;;  %v1491_v25 = vsel %vm5240_vm8, %v6820_v8, 0.0  ;;  %v6827_v22 = vld [vmem:[#allocation34_spill] sm:$0xff] }
 0x143   : > { %vm5261_vm10 = vmand %vm1102_vm13, %vm6801_vm6  ;;  %v5274_v18 = vsel %vm6807_vm4, %v5169_v3, 0.0  ;;  %3525 = vlog2.f32 %v5069_v55  ;;  %v6826_v8 = vsel %vm4654_vm12, %v6825_v40, 0.0  ;;  %v6831_v55 = vld [vmem:[#allocation38_spill] sm:$0xff]  ;;  %v6833_v40 = vld [vmem:[#allocation49_spill] sm:$0xff] }
 0x144   : > { %vm6810_vm13 = vmmov %vm6801_vm6  ;;  %vm6811_vm6 = vcmp.lt.s32.totalorder %v6754_v48, 192  ;;  %v5303_v48 = vsel %vm5216_vm3, %v5184_v24, 0.0  ;;  %v5314_v62 = vsel %vm5261_vm10, %v5204_v54, 0.0  ;;  %v6824_v54 = vsel %vm4633_vm11, %v6823_v14, 0.0 }
 0x145   : > { %vm5285_vm9 = vmand %vm6811_vm6, %vm6810_vm13  ;;  %6816 = vst [vmem:[#allocation47_spill] sm:$0xff] %v5314_v62  ;;  %v1494_v26 = vmul.f32 0.5, %v6824_v54  ;;  %v1495_v58 = vmul.f32 0.5, %v6826_v8  ;;  %3527 = vlog2.f32 %v5074_v15  ;;  %v6832_v54 = vsel %vm4688_vm0, %v6831_v55, 0.0  ;;  %v6839_v15 = vld [vmem:[#allocation52_spill] sm:$0xff] }
 0x146   : > { %v5319_v2 = vsel %vm5285_vm9, %v5244_v49, 0.0  ;;  %v1492_v49 = vsel %vm5261_vm10, %v6821_v53, 0.0  ;;  %v1493_v44 = vsel %vm5285_vm9, %v6822_v37, 0.0  ;;  %v6828_v53 = vsel %vm4666_vm14, %v6827_v22, 0.0  ;;  %v6829_v37 = vld [vmem:[#allocation35_spill] sm:$0xff]  ;;  %v6836_v22 = vld [vmem:[#allocation50_spill] sm:$0xff] }
 0x147   : > { %6817 = vst [vmem:[#allocation66_spill] sm:$0xff] %v5319_v2  ;;  %v1496_v52 = vmul.f32 0.5, %v6828_v53  ;;  %v6830_v24 = vsel %vm4674_vm15, %v6829_v37, 0.0  ;;  %v1498_v14 = vmul.f32 0.5, %v6832_v54  ;;  %v6834_v8 = vsel %vm4704_vm2, %v6833_v40, 0.0  ;;  %v3510_v37 = vpop.eup %3509  ;;  %v6841_v54 = vld [vmem:[#allocation53_spill] sm:$0xff] }
 0x148   : > { %v1497_v32 = vmul.f32 0.5, %v6830_v24  ;;  %v1499_v57 = vmul.f32 0.5, %v6834_v8  ;;  %vm6835_vm13 = vnez %v6799_v35  ;;  %v1399_v24 = vmul.f32 0.6931472, %v3508_v0  ;;  %v3512_v8 = vpop.eup %3511 }
 0x149   : > { %v6837_v53 = vsel %vm6835_vm13, %v6836_v22, 0.0  ;;  %3529 = vlog2.f32 %v5078_v29  ;;  %vm6838_vm6 = vnez %v6804_v1  ;;  %v6842_v20 = vsel %vm6807_vm4, %v6841_v54, 0.0  ;;  %v6843_v22 = vld [vmem:[#allocation54_spill] sm:$0xff]  ;;  %v6845_v29 = vld [vmem:[#allocation56_spill] sm:$0xff] }
 0x14a   : > { %v1500_v38 = vmul.f32 0.5, %v6837_v53  ;;  %v6840_v31 = vsel %vm6838_vm6, %v6839_v15, 0.0  ;;  %v1502_v40 = vmul.f32 0.5, %v6842_v20  ;;  %v1401_v39 = vmul.f32 0.6931472, %v3510_v37 }
 0x14b   : > { %v1501_v55 = vmul.f32 0.5, %v6840_v31  ;;  %3531 = vlog2.f32 %v5100_v9  ;;  %v6844_v0 = vsel %vm6809_vm1, %v6843_v22, 0.0  ;;  %v6846_v3 = vsel %vm6815_vm5, %v6845_v29, 0.0  ;;  %v3514_v31 = vpop.eup %3513 }
 0x14c   : > { %v1503_v53 = vmul.f32 0.5, %v6844_v0  ;;  %v1504_v15 = vmul.f32 0.5, %v6846_v3  ;;  %v1403_v13 = vmul.f32 0.6931472, %v3512_v8  ;;  %3533 = vlog2.f32 %v5125_v63  ;;  %v3516_v54 = vpop.eup %3515 }
 0x14d   : > { %v1462_v20 = vsel %vm4633_vm11, %v1399_v24, 0.0  ;;  %v1505_v37 = vmul.f32 0.5, %v1489_v10  ;;  %v1405_v9 = vmul.f32 0.6931472, %v3514_v31  ;;  %3535 = vlog2.f32 %v5155_v51  ;;  %v3518_v2 = vpop.eup %3517 }
 0x14e   : > { %v1463_v22 = vsel %vm4654_vm12, %v1401_v39, 0.0  ;;  %v1506_v0 = vmul.f32 0.5, %v1490_v33  ;;  %v1407_v62 = vmul.f32 0.6931472, %v3516_v54  ;;  %3537 = vlog2.f32 %v5175_v50  ;;  %v3520_v8 = vpop.eup %3519 }
 0x14f   : > { %v1464_v3 = vsel %vm4666_vm14, %v1403_v13, 0.0  ;;  %v1507_v63 = vmul.f32 0.5, %v1491_v25  ;;  %v1409_v21 = vmul.f32 0.6931472, %v3518_v2  ;;  %v1465_v10 = vsel %vm4674_vm15, %v1405_v9, 0.0  ;;  %v3522_v51 = vpop.eup %3521 }
 0x150   : > { %v1508_v24 = vmul.f32 0.5, %v1492_v49  ;;  %v1509_v29 = vmul.f32 0.5, %v1493_v44  ;;  %v1411_v31 = vmul.f32 0.6931472, %v3520_v8  ;;  %v1466_v39 = vsel %vm4688_vm0, %v1407_v62, 0.0  ;;  %v3524_v50 = vpop.eup %3523 }
 0x151   : > { %v5399_v11 = vadd.f32 %v1494_v26, %v1462_v20  ;;  %v5401_v33 = vadd.f32 %v1495_v58, %v1463_v22  ;;  %v1413_v61 = vmul.f32 0.6931472, %v3522_v51  ;;  %v1467_v13 = vsel %vm4704_vm2, %v1409_v21, 0.0  ;;  %v3526_v49 = vpop.eup %3525 }
 0x152   : > { %v5405_v2 = vadd.f32 %v1496_v52, %v1464_v3  ;;  %v5407_v60 = vadd.f32 %v1497_v32, %v1465_v10  ;;  %v1415_v25 = vmul.f32 0.6931472, %v3524_v50  ;;  %v1468_v44 = vsel %vm6835_vm13, %v1411_v31, 0.0  ;;  %v3528_v62 = vpop.eup %3527 }
 0x153   : > { %v5411_v12 = vadd.f32 %v1498_v14, %v1466_v39  ;;  %v5413_v26 = vadd.f32 %v1499_v57, %v1467_v13  ;;  %v1417_v58 = vmul.f32 0.6931472, %v3526_v49  ;;  %v1469_v20 = vsel %vm6838_vm6, %v1413_v61, 0.0  ;;  %v3530_v32 = vpop.eup %3529 }
 0x154   : > { %v5417_v23 = vadd.f32 %v1500_v38, %v1468_v44  ;;  %v1526_v52 = vsub.f32 0.0, %v5399_v11  ;;  %v1419_v54 = vmul.f32 0.6931472, %v3528_v62  ;;  %v1470_v9 = vsel %vm6807_vm4, %v1415_v25, 0.0 }
 0x155   : > { %v5422_v35 = vadd.f32 %v1501_v55, %v1469_v20  ;;  %v1527_v14 = vsub.f32 0.0, %v5401_v33  ;;  %v3532_v57 = vpop.eup %3531  ;;  %v1421_v22 = vmul.f32 0.6931472, %v3530_v32  ;;  %v1471_v3 = vsel %vm6809_vm1, %v1417_v58, 0.0 }
 0x156   : > { %v5427_v1 = vadd.f32 %v1502_v40, %v1470_v9  ;;  %v1528_v38 = vsub.f32 0.0, %v5405_v2  ;;  %v3534_v8 = vpop.eup %3533  ;;  %v1423_v21 = vmul.f32 0.6931472, %v3532_v57  ;;  %v1472_v10 = vsel %vm6815_vm5, %v1419_v54, 0.0 }
 0x157   : > { %v5432_v56 = vadd.f32 %v1503_v53, %v1471_v3  ;;  %v1529_v55 = vsub.f32 0.0, %v5407_v60  ;;  %v3536_v51 = vpop.eup %3535  ;;  %v1425_v31 = vmul.f32 0.6931472, %v3534_v8  ;;  %v1473_v39 = vsel %vm5198_vm7, %v1421_v22, 0.0 }
 0x158   : > { %v5437_v46 = vadd.f32 %v1504_v15, %v1472_v10  ;;  %v1530_v40 = vsub.f32 0.0, %v5411_v12  ;;  %v3538_v50 = vpop.eup %3537  ;;  %v1427_v61 = vmul.f32 0.6931472, %v3536_v51  ;;  %v1474_v13 = vsel %vm5216_vm3, %v1423_v21, 0.0 }
 0x159   : > { %v5442_v16 = vadd.f32 %v1505_v37, %v1473_v39  ;;  %v1531_v53 = vsub.f32 0.0, %v5413_v26  ;;  %v1429_v49 = vmul.f32 0.6931472, %v3538_v50  ;;  %v1475_v25 = vsel %vm5240_vm8, %v1425_v31, 0.0 }
 0x15a   : > { %v5447_v44 = vadd.f32 %v1506_v0, %v1474_v13  ;;  %v1532_v15 = vsub.f32 0.0, %v5417_v23  ;;  %v1476_v62 = vsel %vm5261_vm10, %v1427_v61, 0.0  ;;  %v5452_v58 = vadd.f32 %v1507_v63, %v1475_v25  ;;  %v6847_v61 = vld [vmem:[#allocation47_spill] sm:$0xff]  ;;  %v6848_v13 = vld [vmem:[#allocation66_spill] sm:$0xff] }
 0x15b   : > { %v1533_v20 = vsub.f32 0.0, %v5422_v35  ;;  %v1534_v37 = vsub.f32 0.0, %v5427_v1  ;;  %v1477_v32 = vsel %vm5285_vm9, %v1429_v49, 0.0  ;;  %v5458_v54 = vadd.f32 %v1508_v24, %v1476_v62 }
 0x15c   : > { %v1535_v9 = vsub.f32 0.0, %v5432_v56  ;;  %v1536_v0 = vsub.f32 0.0, %v5437_v46  ;;  %v5462_v57 = vadd.f32 %v1509_v29, %v1477_v32  ;;  %v1537_v22 = vsub.f32 0.0, %v5442_v16 }
 0x15d   : > { %v1538_v63 = vsub.f32 0.0, %v5447_v44  ;;  %v1539_v3 = vsub.f32 0.0, %v5452_v58  ;;  %v1540_v8 = vsub.f32 0.0, %v5458_v54  ;;  %v1542_v21 = vmul.f32 %v5192_v5, %v5192_v5 }
 0x15e   : > { %v1543_v24 = vmul.f32 %v5210_v6, %v5210_v6  ;;  %v1544_v10 = vmul.f32 %v5224_v30, %v5224_v30  ;;  %v1545_v51 = vmul.f32 %v5229_v7, %v5229_v7  ;;  %v1546_v31 = vmul.f32 %v5234_v42, %v5234_v42 }
 0x15f   : > { %v1547_v39 = vmul.f32 %v5250_v19, %v5250_v19  ;;  %v1548_v5 = vmul.f32 %v5255_v17, %v5255_v17  ;;  %v1549_v6 = vmul.f32 %v5269_v47, %v5269_v47  ;;  %v1550_v30 = vmul.f32 %v5274_v18, %v5274_v18  ;;  %1577 = sbr.rel (%p2980_p6) target bundleno = 368 (0x170), region = 208 }
 0x160   : > { %v1551_v50 = vmul.f32 %v5279_v59, %v5279_v59  ;;  %v1552_v7 = vmul.f32 %v5293_v27, %v5293_v27  ;;  %v1553_v42 = vmul.f32 %v5298_v45, %v5298_v45  ;;  %v1554_v19 = vmul.f32 %v5303_v48, %v5303_v48 }
 0x161   : > { %v1555_v17 = vmul.f32 %v5309_v34, %v5309_v34  ;;  %v1556_v47 = vmul.f32 %v6847_v61, %v6847_v61  ;;  %v1557_v18 = vmul.f32 %v6848_v13, %v6848_v13  ;;  %v5501_v49 = vmul.f32 -50.0, %v1542_v21 }
 0x162   : > { %v5503_v59 = vmul.f32 -50.0, %v1543_v24  ;;  %v5505_v27 = vmul.f32 -50.0, %v1544_v10  ;;  %v5507_v45 = vmul.f32 -50.0, %v1545_v51  ;;  %v5509_v48 = vmul.f32 -50.0, %v1546_v31 }
 0x163   : > { %v5511_v25 = vmul.f32 -50.0, %v1547_v39  ;;  %v5513_v34 = vmul.f32 -50.0, %v1548_v5  ;;  %v5515_v62 = vmul.f32 -50.0, %v1549_v6  ;;  %v5517_v32 = vmul.f32 -50.0, %v1550_v30 }
 0x164   : > { %v5519_v21 = vmul.f32 -50.0, %v1551_v50  ;;  %v5521_v61 = vmul.f32 -50.0, %v1552_v7  ;;  %v5523_v24 = vmul.f32 -50.0, %v1553_v42  ;;  %v5525_v10 = vmul.f32 -50.0, %v1554_v19 }
 0x165   : > { %v5527_v51 = vmul.f32 -50.0, %v1555_v17  ;;  %v5529_v31 = vmul.f32 -50.0, %v1556_v47  ;;  %v5531_v39 = vmul.f32 -50.0, %v1557_v18  ;;  %vm1578_vm1 = vcmask (!%p2980_p6), 64512  }
 0x166   : > { %v3973_v5 = vmov 0.0  }
 0x167   : > { %1579 = vst.msk [vmem:[#allocation2] sm:$0xff] %vm1578_vm1, %v3973_v5  ;;  %1580 = vst.msk [vmem:[#allocation2 + $0x8] sm:$0xff] %vm1578_vm1, %v3973_v5 }
 0x168   : > { %1581 = vst.msk [vmem:[#allocation2 + $0x10] sm:$0xff] %vm1578_vm1, %v3973_v5  ;;  %1582 = vst.msk [vmem:[#allocation2 + $0x18] sm:$0xff] %vm1578_vm1, %v3973_v5 }
 0x169   : > { %1583 = vst.msk [vmem:[#allocation2 + $0x20] sm:$0xff] %vm1578_vm1, %v3973_v5  ;;  %1584 = vst.msk [vmem:[#allocation2 + $0x28] sm:$0xff] %vm1578_vm1, %v3973_v5 }
 0x16a   : > { %1585 = vst.msk [vmem:[#allocation2 + $0x30] sm:$0xff] %vm1578_vm1, %v3973_v5  ;;  %1586 = vst.msk [vmem:[#allocation2 + $0x38] sm:$0xff] %vm1578_vm1, %v3973_v5 }
 0x16b   : > { %1587 = vst.msk [vmem:[#allocation2 + $0x40] sm:$0xff] %vm1578_vm1, %v3973_v5  ;;  %1588 = vst.msk [vmem:[#allocation2 + $0x48] sm:$0xff] %vm1578_vm1, %v3973_v5 }
 0x16c   : > { %1589 = vst.msk [vmem:[#allocation2 + $0x50] sm:$0xff] %vm1578_vm1, %v3973_v5  ;;  %1590 = vst.msk [vmem:[#allocation2 + $0x58] sm:$0xff] %vm1578_vm1, %v3973_v5 }
 0x16d   : > { %1591 = vst.msk [vmem:[#allocation2 + $0x60] sm:$0xff] %vm1578_vm1, %v3973_v5  ;;  %1592 = vst.msk [vmem:[#allocation2 + $0x68] sm:$0xff] %vm1578_vm1, %v3973_v5 }
 0x16e   : > { %1593 = vst.msk [vmem:[#allocation2 + $0x70] sm:$0xff] %vm1578_vm1, %v3973_v5  ;;  %1594 = vst.msk [vmem:[#allocation2 + $0x78] sm:$0xff] %vm1578_vm1, %v3973_v5 }
 0x16f   : > { %1595 = vst [vmem:[#allocation3] sm:$0xff] %v3973_v5  ;;  %1596 = vst [vmem:[#allocation4] sm:$0xff] %v3973_v5 }
 0x170 PF: > { %s5557_s24 = scalar_lea.vmem %s6505_s0, %s2979_s15  ;;  %v6849_v6 = vld [vmem:[#allocation29_spill] sm:$0xff]  ;;  %v6851_v50 = vld [vmem:[#allocation39_spill] sm:$0xff]  ;;  %v6876_v4 = vld [vmem:[#allocation46_spill] sm:$0xff]  ;;  %v1809_v28 = vadd.f32 %v1527_v14, %v1526_v52  ;;  %v6881_v16 = vsub.f32 0.0, %v5462_v57  ;;  %p2997_p3 = scmp.ne.s32.totalorder %s3859_s14, 1 }
 0x171   : > { %3075 = vmatprep.mubr.msk.f32.mxu0 %vm4633_vm11, %v6849_v6  ;;  %v6852_v7 = vld [vmem:[#allocation63_spill] sm:$0xff]  ;;  %v1599_v19 = vld [vmem:[%s5557_s24 + $0x8] sm:$0xff]  ;;  %v1600_v17 = vld [vmem:[%s5557_s24 + $0x10] sm:$0xff] }
 0x172   : > { %vm6853_vm5 = vnez %v6852_v7  ;;  %v1598_v42 = vld [vmem:[%s5557_s24] sm:$0xff]  ;;  %v1601_v13 = vld [vmem:[%s5557_s24 + $0x18] sm:$0xff]  ;;  %v1603_v30 = vld [vmem:[%s5557_s24 + $0x28] sm:$0xff]  ;;  %v1810_v43 = vadd.f32 %v1809_v28, %v1528_v38 }
 0x173   : > { %3087 = vmatprep.mubr.msk.f32.mxu1 %vm6853_vm5, %v6851_v50  ;;  %v3099_v47 = vpack.c.bf16 %v1599_v19, %v1598_v42  ;;  %v3103_v18 = vpack.c.bf16 %v1601_v13, %v1600_v17  ;;  %v1602_v5 = vld [vmem:[%s5557_s24 + $0x20] sm:$0xff]  ;;  %v1604_v50 = vld [vmem:[%s5557_s24 + $0x30] sm:$0xff]  ;;  %v1605_v7 = vld [vmem:[%s5557_s24 + $0x38] sm:$0xff] }
 0x174   : > { %v3107_v6 = vpack.c.bf16 %v1603_v30, %v1602_v5  ;;  %v3111_v42 = vpack.c.bf16 %v1605_v7, %v1604_v50  ;;  %v1606_v19 = vld [vmem:[%s5557_s24 + $0x40] sm:$0xff]  ;;  %v1607_v17 = vld [vmem:[%s5557_s24 + $0x48] sm:$0xff]  ;;  %v1608_v13 = vld [vmem:[%s5557_s24 + $0x50] sm:$0xff] }
 0x175   : > { %3100 = vmatprep.subr.bf16.mxu0 %v3099_v47  ;;  %3131 = vmatprep.subr.bf16.mxu1 %v3099_v47  ;;  %v1609_v5 = vld [vmem:[%s5557_s24 + $0x58] sm:$0xff]  ;;  %v1610_v30 = vld [vmem:[%s5557_s24 + $0x60] sm:$0xff]  ;;  %v1611_v29 = vld [vmem:[%s5557_s24 + $0x68] sm:$0xff] }
 0x176   : > { %3102 = vmatpush3.bf16.msra.mxu0 %v3099_v47  ;;  %3139 = vmatpush3.bf16.msra.mxu1 %v3099_v47  ;;  %v3115_v47 = vpack.c.bf16 %v1607_v17, %v1606_v19  ;;  %v3123_v50 = vpack.c.bf16 %v1611_v29, %v1610_v30  ;;  %v1613_v7 = vld [vmem:[%s5557_s24 + $0x78] sm:$0xff]  ;;  %v6862_v30 = vld [vmem:[#allocation65_spill] sm:$0xff]  ;;  %v6880_v41 = vld [vmem:[#allocation24_spill] sm:$0xff] }
 0x177   : > { %3104 = vmatprep.subr.bf16.mxu0 %v3103_v18  ;;  %3132 = vmatprep.subr.bf16.mxu1 %v3103_v18  ;;  %v6859_v29 = vld [vmem:[#allocation27_spill] sm:$0xff]  ;;  %vm6863_vm4 = vnez %v6862_v30  ;;  %v6869_v17 = vld [vmem:[#allocation25_spill] sm:$0xff] }
 0x178   : > { %v6877_v30 = vld [vmem:[#allocation23_spill] sm:$0xff]  ;;  %v1615_v58 = vld [vmem:[#allocation2 + $0x8] sm:$0xff] }
 0x17a   : > { %3106 = vmatpush3.bf16.msra.mxu0 %v3103_v18  ;;  %3140 = vmatpush3.bf16.msra.mxu1 %v3103_v18  ;;  %v3119_v18 = vpack.c.bf16 %v1609_v5, %v1608_v13  ;;  %v6857_v13 = vld [vmem:[#allocation64_spill] sm:$0xff]  ;;  %v6873_v5 = vld [vmem:[#allocation31_spill] sm:$0xff] }
 0x17b   : > { %3108 = vmatprep.subr.bf16.mxu0 %v3107_v6  ;;  %3133 = vmatprep.subr.bf16.mxu1 %v3107_v6  ;;  %vm6858_vm11 = vnez %v6857_v13 }
 0x17e   : > { %3110 = vmatpush3.bf16.msra.mxu0 %v3107_v6  ;;  %3141 = vmatpush3.bf16.msra.mxu1 %v3107_v6  ;;  %v1612_v6 = vld [vmem:[%s5557_s24 + $0x70] sm:$0xff] }
 0x17f   : > { %3112 = vmatprep.subr.bf16.mxu0 %v3111_v42  ;;  %3134 = vmatprep.subr.bf16.mxu1 %v3111_v42  ;;  %v3127_v19 = vpack.c.bf16 %v1613_v7, %v1612_v6  ;;  %v6866_v7 = vld [vmem:[#allocation43_spill] sm:$0xff]  ;;  %v1827_v6 = vadd.f32 %v5503_v59, %v5501_v49 }
 0x180   : > { %v1808_v49 = vld [vmem:[#allocation3] sm:$0xff] }
 0x182   : > { %3114 = vmatpush3.bf16.msra.mxu0 %v3111_v42  ;;  %3142 = vmatpush3.bf16.msra.mxu1 %v3111_v42  ;;  %v6854_v42 = vld [vmem:[#allocation30_spill] sm:$0xff] }
 0x183   : > { %3116 = vmatprep.subr.bf16.mxu0 %v3115_v47  ;;  %3135 = vmatprep.subr.bf16.mxu1 %v3115_v47 }
 0x186   : > { %3118 = vmatpush3.bf16.msra.mxu0 %v3115_v47  ;;  %3143 = vmatpush3.bf16.msra.mxu1 %v3115_v47  ;;  %v6856_v47 = vld [vmem:[#allocation40_spill] sm:$0xff] }
 0x187   : > { %3120 = vmatprep.subr.bf16.mxu0 %v3119_v18  ;;  %3136 = vmatprep.subr.bf16.mxu1 %v3119_v18 }
 0x18a   : > { %3122 = vmatpush3.bf16.msra.mxu0 %v3119_v18  ;;  %3144 = vmatpush3.bf16.msra.mxu1 %v3119_v18  ;;  %v6861_v18 = vld [vmem:[#allocation41_spill] sm:$0xff] }
 0x18b   : > { %3124 = vmatprep.subr.bf16.mxu0 %v3123_v50  ;;  %3137 = vmatprep.subr.bf16.mxu1 %v3123_v50 }
 0x18e   : > { %3126 = vmatpush3.bf16.msra.mxu0 %v3123_v50  ;;  %3145 = vmatpush3.bf16.msra.mxu1 %v3123_v50  ;;  %v6864_v50 = vld [vmem:[#allocation22_spill] sm:$0xff] }
 0x18f   : > { %3128 = vmatprep.subr.bf16.mxu0 %v3127_v19  ;;  %3138 = vmatprep.subr.bf16.mxu1 %v3127_v19 }
 0x192   : > { %3130 = vmatpush3.bf16.msra.mxu0 %v3127_v19  ;;  %3146 = vmatpush3.bf16.msra.mxu1 %v3127_v19  ;;  %v6867_v19 = vld [vmem:[#allocation36_spill] sm:$0xff] }
 0x195   : > { %3076 = vmatmul.mubr.msk.f32.vlgmr.msra.gmra.mrb[0].mxu0 %vm4654_vm12, %v6854_v42  ;;  %3088 = vmatmul.mubr.msk.f32.vlgmr.msra.gmra.mrb[0].mxu1 %vm6858_vm11, %v6856_v47  ;;  %v6870_v47 = vld [vmem:[#allocation28_spill] sm:$0xff] }
 0x196   : > { %3078 = vmatprep.mubr.msk.f32.mxu0 %vm4666_vm14, %v6859_v29  ;;  %3090 = vmatprep.mubr.msk.f32.mxu1 %vm6863_vm4, %v6861_v18  ;;  %v6872_v29 = vld [vmem:[#allocation26_spill] sm:$0xff]  ;;  %v6874_v18 = vld [vmem:[#allocation55_spill] sm:$0xff] }
 0x197   : > { %vm6875_vm12 = vnez %v6874_v18  ;;  %v1619_v18 = vld [vmem:[#allocation2 + $0x28] sm:$0xff] }
 0x199   : > { %3079 = vmatmul.mubr.msk.f32.gmra.mrb[2].mxu0 %vm4674_vm15, %v6864_v50  ;;  %3091 = vmatmul.mubr.msk.f32.gmra.mrb[2].mxu1 %vm5198_vm7, %v6866_v7  ;;  %v6878_v50 = vld [vmem:[#allocation59_spill] sm:$0xff]  ;;  %v1828_v7 = vadd.f32 %v1827_v6, %v5505_v27  ;;  %vm1791_vm15 = vcmask 64512  }
 0x19a   : > { %3081 = vmatprep.mubr.msk.f32.mxu0 %vm4688_vm0, %v6867_v19  ;;  %3093 = vmatprep.mubr.msk.f32.mxu1 %vm5216_vm3, %v6869_v17  ;;  %vm6879_vm14 = vnez %v6878_v50  ;;  %v1811_v19 = vadd.f32 %v1810_v43, %v1529_v55  ;;  %v1614_v27 = vld [vmem:[#allocation2] sm:$0xff] }
 0x19b   : > { %v1829_v42 = vadd.f32 %v1828_v7, %v5507_v45  ;;  %v1622_v45 = vld [vmem:[#allocation2 + $0x40] sm:$0xff] }
 0x19c   : > { %v1812_v36 = vadd.f32 %v1811_v19, %v1530_v40  ;;  %v1626_v50 = vld [vmem:[#allocation2 + $0x60] sm:$0xff] }
 0x19d   : > { %3082 = vmatmul.mubr.msk.f32.gmra.mrb[4].mxu0 %vm4704_vm2, %v6870_v47  ;;  %3094 = vmatmul.mubr.msk.f32.gmra.mrb[4].mxu1 %vm5240_vm8, %v6872_v29  ;;  %v1830_v11 = vadd.f32 %v1829_v42, %v5509_v48 }
 0x19e   : > { %3084 = vmatprep.mubr.msk.f32.mxu0 %vm6875_vm12, %v6873_v5  ;;  %3096 = vmatprep.mubr.msk.f32.mxu1 %vm5261_vm10, %v6876_v4  ;;  %v1813_v33 = vadd.f32 %v1812_v36, %v1531_v53  ;;  %v1627_v4 = vld [vmem:[#allocation2 + $0x68] sm:$0xff] }
 0x19f   : > { %v1831_v52 = vadd.f32 %v1830_v11, %v5511_v25  ;;  %v1621_v11 = vld [vmem:[#allocation2 + $0x38] sm:$0xff] }
 0x1a0   : > { %v1814_v2 = vadd.f32 %v1813_v33, %v1532_v15  ;;  %v1629_v33 = vld [vmem:[#allocation2 + $0x78] sm:$0xff] }
 0x1a1   : > { %3085 = vmatmul.mubr.msk.f32.gmra.mrb[6].mxu0 %vm6879_vm14, %v6877_v30  ;;  %3097 = vmatmul.mubr.msk.f32.gmra.mrb[6].mxu1 %vm5285_vm9, %v6880_v41  ;;  %v1832_v14 = vadd.f32 %v1831_v52, %v5513_v34  ;;  %v1618_v30 = vld [vmem:[#allocation2 + $0x20] sm:$0xff]  ;;  %v1620_v52 = vld [vmem:[#allocation2 + $0x30] sm:$0xff] }
 0x1a2   : > { %v1815_v60 = vadd.f32 %v1814_v2, %v1533_v20  ;;  %v1628_v2 = vld [vmem:[#allocation2 + $0x70] sm:$0xff] }
 0x1a3   : > { %v1833_v38 = vadd.f32 %v1832_v14, %v5515_v62 }
 0x1a4   : > { %v1816_v12 = vadd.f32 %v1815_v60, %v1534_v37 }
 0x1a5   : > { %v1834_v55 = vadd.f32 %v1833_v38, %v5517_v32 }
 0x1a6   : > { %v1817_v26 = vadd.f32 %v1816_v12, %v1535_v9 }
 0x1a7   : > { %v1835_v40 = vadd.f32 %v1834_v55, %v5519_v21  ;;  %v1617_v21 = vld [vmem:[#allocation2 + $0x18] sm:$0xff] }
 0x1a8   : > { %v1818_v23 = vadd.f32 %v1817_v26, %v1536_v0 }
 0x1a9   : > { %v1836_v53 = vadd.f32 %v1835_v40, %v5521_v61  ;;  %v1625_v61 = vld [vmem:[#allocation2 + $0x58] sm:$0xff] }
 0x1aa   : > { %v1819_v35 = vadd.f32 %v1818_v23, %v1537_v22 }
 0x1ab   : > { %v1837_v15 = vadd.f32 %v1836_v53, %v5523_v24  ;;  %v1616_v24 = vld [vmem:[#allocation2 + $0x10] sm:$0xff] }
 0x1ac   : > { %v1820_v1 = vadd.f32 %v1819_v35, %v1538_v63  ;;  %v1826_v63 = vld [vmem:[#allocation4] sm:$0xff] }
 0x1ad   : > { %v1838_v20 = vadd.f32 %v1837_v15, %v5525_v10  ;;  %v1624_v10 = vld [vmem:[#allocation2 + $0x50] sm:$0xff] }
 0x1ae   : > { %v1821_v56 = vadd.f32 %v1820_v1, %v1539_v3  ;;  %v1623_v3 = vld [vmem:[#allocation2 + $0x48] sm:$0xff] }
 0x1af   : > { %v1839_v37 = vadd.f32 %v1838_v20, %v5527_v51 }
 0x1b0   : > { %v1822_v46 = vadd.f32 %v1821_v56, %v1540_v8 }
 0x1b1   : > { %v1840_v9 = vadd.f32 %v1839_v37, %v5529_v31 }
 0x1b2   : > { %v1823_v0 = vadd.f32 %v1822_v46, %v6881_v16 }
 0x1b3   : > { %v1841_v22 = vadd.f32 %v1840_v9, %v5531_v39 }
 0x1b4   : > { %v1824_v44 = vadd.f32 %v1823_v0, %v1808_v49 }
 0x1b5   : > { %v1842_v59 = vadd.f32 %v1841_v22, %v1826_v63 }
 0x1b6   : > { %1825 = vst [vmem:[#allocation3] sm:$0xff] %v1824_v44 }
 0x1b7   : > { %1843 = vst [vmem:[#allocation4] sm:$0xff] %v1842_v59 }
 0x268   : > { %v3077_v48 = vpop.f32.mrb[0].mxu0  ;;  %v3089_v54 = vpop.f32.mrb[0].mxu1 }
 0x269   : > { %v1776_v8 = vadd.f32 %v3077_v48, %v1615_v58  ;;  %v1784_v25 = vadd.f32 %v3089_v54, %v1623_v3  ;;  %v1696_v34 = vpop.f32.mrb[1].mxu0  ;;  %v1736_v57 = vpop.f32.mrb[1].mxu1 }
 0x26a   : > { %v1775_v62 = vadd.f32 %v1696_v34, %v1614_v27  ;;  %v1783_v32 = vadd.f32 %v1736_v57, %v1622_v45 }
 0x26b   : > { %1793 = vst.msk [vmem:[#allocation2 + $0x8] sm:$0xff] %vm1791_vm15, %v1776_v8  ;;  %1801 = vst.msk [vmem:[#allocation2 + $0x48] sm:$0xff] %vm1791_vm15, %v1784_v25 }
 0x26c   : > { %1792 = vst.msk [vmem:[#allocation2] sm:$0xff] %vm1791_vm15, %v1775_v62  ;;  %1800 = vst.msk [vmem:[#allocation2 + $0x40] sm:$0xff] %vm1791_vm15, %v1783_v32  ;;  %v3080_v51 = vpop.f32.mrb[2].mxu0  ;;  %v3092_v31 = vpop.f32.mrb[2].mxu1 }
 0x26d   : > { %v1778_v39 = vadd.f32 %v3080_v51, %v1617_v21  ;;  %v1786_v17 = vadd.f32 %v3092_v31, %v1625_v61  ;;  %v1706_v47 = vpop.f32.mrb[3].mxu0  ;;  %v1746_v13 = vpop.f32.mrb[3].mxu1 }
 0x26e   : > { %v1777_v29 = vadd.f32 %v1706_v47, %v1616_v24  ;;  %v1785_v5 = vadd.f32 %v1746_v13, %v1624_v10 }
 0x26f   : > { %1795 = vst.msk [vmem:[#allocation2 + $0x18] sm:$0xff] %vm1791_vm15, %v1778_v39  ;;  %1803 = vst.msk [vmem:[#allocation2 + $0x58] sm:$0xff] %vm1791_vm15, %v1786_v17 }
 0x270   : > { %1794 = vst.msk [vmem:[#allocation2 + $0x10] sm:$0xff] %vm1791_vm15, %v1777_v29  ;;  %1802 = vst.msk [vmem:[#allocation2 + $0x50] sm:$0xff] %vm1791_vm15, %v1785_v5  ;;  %v3083_v41 = vpop.f32.mrb[4].mxu0  ;;  %v3095_v28 = vpop.f32.mrb[4].mxu1 }
 0x271   : > { %v1780_v6 = vadd.f32 %v3083_v41, %v1619_v18  ;;  %v1788_v43 = vadd.f32 %v3095_v28, %v1627_v4  ;;  %v1716_v7 = vpop.f32.mrb[5].mxu0  ;;  %v1756_v19 = vpop.f32.mrb[5].mxu1 }
 0x272   : > { %v1779_v42 = vadd.f32 %v1716_v7, %v1618_v30  ;;  %v1787_v36 = vadd.f32 %v1756_v19, %v1626_v50  ;;  %1847 = sbr.rel (%p2997_p3) target bundleno = 978 (0x3d2), region = 212 }
 0x273   : > { %1797 = vst.msk [vmem:[#allocation2 + $0x28] sm:$0xff] %vm1791_vm15, %v1780_v6  ;;  %1805 = vst.msk [vmem:[#allocation2 + $0x68] sm:$0xff] %vm1791_vm15, %v1788_v43 }
 0x274   : > { %1796 = vst.msk [vmem:[#allocation2 + $0x20] sm:$0xff] %vm1791_vm15, %v1779_v42  ;;  %1804 = vst.msk [vmem:[#allocation2 + $0x60] sm:$0xff] %vm1791_vm15, %v1787_v36  ;;  %v3086_v14 = vpop.f32.mrb[6].mxu0  ;;  %v3098_v60 = vpop.f32.mrb[6].mxu1 }
 0x275   : > { %v1782_v38 = vadd.f32 %v3086_v14, %v1621_v11  ;;  %v1790_v12 = vadd.f32 %v3098_v60, %v1629_v33  ;;  %v1726_v55 = vpop.f32.mrb[7].mxu0  ;;  %v1766_v26 = vpop.f32.mrb[7].mxu1 }
 0x276   : > { %v1781_v40 = vadd.f32 %v1726_v55, %v1620_v52  ;;  %v1789_v23 = vadd.f32 %v1766_v26, %v1628_v2 }
 0x277   : > { %1799 = vst.msk [vmem:[#allocation2 + $0x38] sm:$0xff] %vm1791_vm15, %v1782_v38  ;;  %1807 = vst.msk [vmem:[#allocation2 + $0x78] sm:$0xff] %vm1791_vm15, %v1790_v12 }
 0x278   : > { %1798 = vst.msk [vmem:[#allocation2 + $0x30] sm:$0xff] %vm1791_vm15, %v1781_v40  ;;  %1806 = vst.msk [vmem:[#allocation2 + $0x70] sm:$0xff] %vm1791_vm15, %v1789_v23 }
 0x279   : > { %v5689_v53 = vld [vmem:[%s4436_s21] sm:$0xff]  ;;  %v5692_v35 = vld [vmem:[%s4436_s21 + $0x8] sm:$0xff]  ;;  %v5695_v15 = vld [vmem:[%s4436_s21 + $0x10] sm:$0xff]  ;;  %vm2200_vm0 = vcmask 7168  }
 0x27a   : > { %v1912_v1 = vand.u32 2147483647, %v5689_v53  ;;  %v1913_v20 = vand.u32 2147483647, %v5692_v35  ;;  %v5700_v56 = vld [vmem:[%s4436_s21 + $0x18] sm:$0xff]  ;;  %v5704_v46 = vld [vmem:[%s4436_s21 + $0x20] sm:$0xff] }
 0x27b   : > { %v1914_v37 = vand.u32 2147483647, %v5695_v15  ;;  %v5708_v16 = vld [vmem:[%s4436_s21 + $0x28] sm:$0xff]  ;;  %v5711_v0 = vld [vmem:[%s4436_s21 + $0x30] sm:$0xff]  ;;  %v5714_v22 = vld [vmem:[%s4436_s21 + $0x38] sm:$0xff] }
 0x27c   : > { %v1928_v63 = vsub.f32 0.0, %v1912_v1  ;;  %v5719_v59 = vld [vmem:[%s4436_s21 + $0x40] sm:$0xff]  ;;  %v1915_v27 = vand.u32 2147483647, %v5700_v56  ;;  %v1929_v45 = vsub.f32 0.0, %v1913_v20  ;;  %v5725_v48 = vld [vmem:[%s4436_s21 + $0x48] sm:$0xff] }
 0x27d   : > { %v5728_v54 = vld [vmem:[%s4436_s21 + $0x50] sm:$0xff]  ;;  %v1916_v25 = vand.u32 2147483647, %v5704_v46  ;;  %v1930_v34 = vsub.f32 0.0, %v1914_v37  ;;  %v5733_v57 = vld [vmem:[%s4436_s21 + $0x58] sm:$0xff]  ;;  %v5736_v62 = vld [vmem:[%s4436_s21 + $0x60] sm:$0xff] }
 0x27e   : > { %6882 = vst [vmem:[#allocation67_spill] sm:$0xff] %v5733_v57  ;;  %6883 = vst [vmem:[#allocation68_spill] sm:$0xff] %v5736_v62  ;;  %v1917_v61 = vand.u32 2147483647, %v5708_v16  ;;  %v5742_v24 = vld [vmem:[%s4436_s21 + $0x68] sm:$0xff]  ;;  %v1931_v13 = vsub.f32 0.0, %v1915_v27 }
 0x27f   : > { %6884 = vst [vmem:[#allocation69_spill] sm:$0xff] %v5742_v24  ;;  %v1918_v31 = vand.u32 2147483647, %v5711_v0  ;;  %v1944_v39 = vmul.f32 1.442695, %v1928_v63  ;;  %v5750_v5 = vld [vmem:[%s4436_s21 + $0x70] sm:$0xff] }
 0x280   : > { %v1919_v47 = vand.u32 2147483647, %v5714_v22  ;;  %v1946_v29 = vmul.f32 1.442695, %v1929_v45  ;;  %6885 = vst [vmem:[#allocation70_spill] sm:$0xff] %v5750_v5  ;;  %v1932_v30 = vsub.f32 0.0, %v1916_v25 }
 0x281   : > { %v1948_v50 = vmul.f32 1.442695, %v1930_v34  ;;  %v5755_v41 = vld [vmem:[%s4436_s21 + $0x78] sm:$0xff]  ;;  %v1920_v43 = vand.u32 2147483647, %v5719_v59  ;;  %v1933_v7 = vsub.f32 0.0, %v1917_v61  ;;  %3541 = vpow2.f32 %v1944_v39 }
 0x282   : > { %6886 = vst [vmem:[#allocation71_spill] sm:$0xff] %v5755_v41  ;;  %v5761_v19 = vld [vmem:[%s4441_s26] sm:$0xff]  ;;  %v1921_v36 = vand.u32 2147483647, %v5725_v48  ;;  %v1934_v11 = vsub.f32 0.0, %v1918_v31  ;;  %v5766_v33 = vld [vmem:[%s4441_s26 + $0x8] sm:$0xff]  ;;  %3543 = vpow2.f32 %v1946_v29 }
 0x283   : > { %v1922_v52 = vand.u32 2147483647, %v5728_v54  ;;  %v1935_v2 = vsub.f32 0.0, %v1919_v47  ;;  %v1950_v14 = vmul.f32 1.442695, %v1931_v13  ;;  %3545 = vpow2.f32 %v1948_v50  ;;  %v5772_v55 = vld [vmem:[%s4441_s26 + $0x10] sm:$0xff] }
 0x284   : > { %v1923_v60 = vand.u32 2147483647, %v5733_v57  ;;  %v1924_v38 = vand.u32 2147483647, %v5736_v62  ;;  %v1952_v12 = vmul.f32 1.442695, %v1932_v30  ;;  %v2241_v23 = vmul.f32 %v5761_v19, %v5761_v19 }
 0x285   : > { %v1936_v26 = vsub.f32 0.0, %v1920_v43  ;;  %v1954_v40 = vmul.f32 1.442695, %v1933_v7  ;;  %v2242_v1 = vmul.f32 %v5766_v33, %v5766_v33  ;;  %v1925_v20 = vand.u32 2147483647, %v5742_v24  ;;  %v5783_v39 = vld [vmem:[%s4441_s26 + $0x18] sm:$0xff] }
 0x286   : > { %v1937_v37 = vsub.f32 0.0, %v1921_v36  ;;  %v1956_v63 = vmul.f32 1.442695, %v1934_v11  ;;  %v2243_v27 = vmul.f32 %v5772_v55, %v5772_v55  ;;  %v1926_v45 = vand.u32 2147483647, %v5750_v5  ;;  %v5788_v50 = vld [vmem:[%s4441_s26 + $0x20] sm:$0xff] }
 0x287   : > { %v1938_v25 = vsub.f32 0.0, %v1922_v52  ;;  %3547 = vpow2.f32 %v1950_v14  ;;  %v1958_v34 = vmul.f32 1.442695, %v1935_v2  ;;  %v1939_v61 = vsub.f32 0.0, %v1923_v60  ;;  %v5792_v11 = vld [vmem:[%s4441_s26 + $0x28] sm:$0xff]  ;;  %v5795_v52 = vld [vmem:[%s4441_s26 + $0x30] sm:$0xff] }
 0x288   : > { %v1940_v31 = vsub.f32 0.0, %v1924_v38  ;;  %3549 = vpow2.f32 %v1952_v12  ;;  %v1960_v47 = vmul.f32 1.442695, %v1936_v26  ;;  %v2257_v13 = vsel %vm2200_vm0, %v2241_v23, 0.0  ;;  %v5804_v12 = vld [vmem:[%s4441_s26 + $0x38] sm:$0xff] }
 0x289   : > { %3551 = vpow2.f32 %v1954_v40  ;;  %v2258_v29 = vsel %vm2200_vm0, %v2242_v1, 0.0  ;;  %v3974_v30 = vmov 0   ;;  %v1927_v43 = vand.u32 2147483647, %v5755_v41 }
 0x28a   : > { %3539 = vset.pattern.permute.xlu1 %v3974_v30  ;;  %3540 = vset.pattern.permute.xlu0 %v3974_v30  ;;  %v1941_v7 = vsub.f32 0.0, %v1925_v20  ;;  %3553 = vpow2.f32 %v1956_v63  ;;  %v1962_v36 = vmul.f32 1.442695, %v1937_v37  ;;  %v1964_v2 = vmul.f32 1.442695, %v1938_v25  ;;  %v5823_v30 = vld [vmem:[%s4441_s26 + $0x48] sm:$0xff] }
 0x28b   : > { %3555 = vpow2.f32 %v1958_v34  ;;  %v2244_v14 = vmul.f32 %v5783_v39, %v5783_v39  ;;  %v2245_v60 = vmul.f32 %v5788_v50, %v5788_v50  ;;  %v5801_v38 = vpop.eup %3541  ;;  %v1966_v26 = vmul.f32 1.442695, %v1939_v61  ;;  %v5820_v61 = vld [vmem:[%s4441_s26 + $0x40] sm:$0xff]  ;;  %6889 = vst [vmem:[#allocation74_spill] sm:$0xff] %v5823_v30 }
 0x28c   : > { %v2246_v40 = vmul.f32 %v5792_v11, %v5792_v11  ;;  %v2247_v23 = vmul.f32 %v5795_v52, %v5795_v52  ;;  %v2259_v1 = vadd.f32 %v2258_v29, %v2257_v13  ;;  %v5810_v20 = vpop.eup %3543  ;;  %3557 = vpow2.f32 %v1960_v47  ;;  %6888 = vst [vmem:[#allocation73_spill] sm:$0xff] %v5820_v61  ;;  %v5835_v29 = vld [vmem:[%s4441_s26 + $0x50] sm:$0xff] }
 0x28d   : > { %v1968_v37 = vmul.f32 1.442695, %v1940_v31  ;;  %v5814_v63 = vmul.f32 %v5804_v12, %v5804_v12  ;;  %v2260_v25 = vsel %vm2200_vm0, %v2243_v27, 0.0  ;;  %v5817_v34 = vpop.eup %3545  ;;  %v1942_v42 = vsub.f32 0.0, %v1926_v45  ;;  %6892 = vst [vmem:[#allocation77_spill] sm:$0xff] %v5835_v29 }
 0x28e   : > { %v1943_v6 = vsub.f32 0.0, %v1927_v43  ;;  %3559 = vpow2.f32 %v1962_v36  ;;  %v1970_v13 = vmul.f32 1.442695, %v1941_v7  ;;  %v1976_v47 = vadd.f32 1.0, %v5801_v38 }
 0x28f   : > { %6887 = vst [vmem:[#allocation72_spill] sm:$0xff] %v5814_v63  ;;  %3561 = vpow2.f32 %v1964_v2  ;;  %v5828_v31 = vmul.f32 %v5820_v61, %v5820_v61  ;;  %v5832_v27 = vmul.f32 %v5823_v30, %v5823_v30  ;;  %v1979_v28 = vmul.f32 -0.5, %v5801_v38 }
 0x290   : > { %3563 = vpow2.f32 %v1966_v26  ;;  %v1985_v45 = vadd.f32 1.0, %v5810_v20  ;;  %v2261_v43 = vadd.f32 %v2260_v25, %v2259_v1  ;;  %v1994_v36 = vadd.f32 1.0, %v5817_v34 }
 0x291   : > { %6890 = vst [vmem:[#allocation75_spill] sm:$0xff] %v5828_v31  ;;  %6891 = vst [vmem:[#allocation76_spill] sm:$0xff] %v5832_v27  ;;  %v5839_v7 = vpop.eup %3547  ;;  %3565 = vpow2.f32 %v1968_v37  ;;  %v5844_v2 = vmul.f32 %v5835_v29, %v5835_v29  ;;  %v2262_v4 = vsel %vm2200_vm0, %v2244_v14, 0.0  ;;  %v1972_v26 = vmul.f32 1.442695, %v1942_v42 }
 0x292   : > { %v5847_v18 = vpop.eup %3549  ;;  %3567 = vpow2.f32 %v1970_v13  ;;  %v1974_v17 = vmul.f32 1.442695, %v1943_v6  ;;  %v5850_v51 = vsel %vm2200_vm0, %v2245_v60, 0.0  ;;  %v1988_v37 = vmul.f32 -0.5, %v5810_v20 }
 0x293   : > { %6893 = vst [vmem:[#allocation78_spill] sm:$0xff] %v5844_v2  ;;  %6894 = vst [vmem:[#allocation79_spill] sm:$0xff] %v5850_v51  ;;  %v5852_v1 = vpop.eup %3551  ;;  %3569 = vlog2.f32 %v1976_v47  ;;  %v5856_v25 = vsel %vm2200_vm0, %v2246_v40, 0.0  ;;  %v5859_v10 = vsel %vm2200_vm0, %v2247_v23, 0.0  ;;  %v1980_v21 = vadd.f32 1.0, %v1979_v28 }
 0x294   : > { %6895 = vst [vmem:[#allocation80_spill] sm:$0xff] %v5856_v25  ;;  %6896 = vst [vmem:[#allocation81_spill] sm:$0xff] %v5859_v10  ;;  %v5861_v14 = vpop.eup %3553  ;;  %3571 = vlog2.f32 %v1985_v45  ;;  %v2003_v6 = vadd.f32 1.0, %v5839_v7  ;;  %v5864_v42 = vadd.f32 %v2262_v4, %v2261_v43  ;;  %v1982_v13 = vand.u32 2147483647, %v5801_v38 }
 0x295   : > { %v5866_v60 = vpop.eup %3555  ;;  %3573 = vlog2.f32 %v1994_v36  ;;  %v1997_v47 = vmul.f32 -0.5, %v5817_v34  ;;  %v2012_v40 = vadd.f32 1.0, %v5847_v18  ;;  %v1991_v23 = vand.u32 2147483647, %v5810_v20 }
 0x296   : > { %6897 = vst [vmem:[#allocation82_spill] sm:$0xff] %v5864_v42  ;;  %3575 = vpow2.f32 %v1972_v26  ;;  %v2006_v32 = vmul.f32 -0.5, %v5839_v7  ;;  %v2021_v28 = vadd.f32 1.0, %v5852_v1  ;;  %v5874_v45 = vpop.eup %3557  ;;  %v1989_v4 = vadd.f32 1.0, %v1988_v37 }
 0x297   : > { %3577 = vpow2.f32 %v1974_v17  ;;  %v2015_v43 = vmul.f32 -0.5, %v5847_v18  ;;  %v2030_v8 = vadd.f32 1.0, %v5861_v14  ;;  %v5881_v3 = vmul.f32 %v5801_v38, %v1980_v21 }
 0x298   : > { %v5878_v36 = vpop.eup %3559  ;;  %v2000_v26 = vand.u32 2147483647, %v5817_v34  ;;  %3579 = vlog2.f32 %v2003_v6  ;;  %v2039_v58 = vadd.f32 1.0, %v5866_v60  ;;  %vm5887_vm2 = vcmp.lt.f32.partialorder %v1982_v13, 0.0004427343 }
 0x299   : > { %v5885_v44 = vpop.eup %3561  ;;  %v1998_v17 = vadd.f32 1.0, %v1997_v47  ;;  %v2009_v37 = vand.u32 2147483647, %v5839_v7  ;;  %3581 = vlog2.f32 %v2012_v40  ;;  %v2024_v9 = vmul.f32 -0.5, %v5852_v1 }
 0x29a   : > { %v5893_v2 = vpop.eup %3563  ;;  %vm5895_vm7 = vcmp.lt.f32.partialorder %v1991_v23, 0.0004427343  ;;  %v2007_v38 = vadd.f32 1.0, %v2006_v32  ;;  %v2018_v6 = vand.u32 2147483647, %v5847_v18  ;;  %3583 = vlog2.f32 %v2021_v28 }
 0x29b   : > { %v2033_v13 = vmul.f32 -0.5, %v5861_v14  ;;  %v5901_v27 = vpop.eup %3565  ;;  %v2016_v47 = vadd.f32 1.0, %v2015_v43  ;;  %3585 = vlog2.f32 %v2030_v8  ;;  %v2042_v40 = vmul.f32 -0.5, %v5866_v60 }
 0x29c   : > { %v2048_v31 = vadd.f32 1.0, %v5874_v45  ;;  %v5905_v10 = vpop.eup %3567  ;;  %v5908_v23 = vmul.f32 %v5810_v20, %v1989_v4  ;;  %v2027_v32 = vand.u32 2147483647, %v5852_v1  ;;  %3587 = vlog2.f32 %v2039_v58 }
 0x29d   : > { %v2057_v28 = vadd.f32 1.0, %v5878_v36  ;;  %v3570_v63 = vpop.eup %3569  ;;  %v5913_v25 = vmul.f32 %v5817_v34, %v1998_v17  ;;  %vm5915_vm3 = vcmp.lt.f32.partialorder %v2000_v26, 0.0004427343  ;;  %v2025_v43 = vadd.f32 1.0, %v2024_v9 }
 0x29e   : > { %v2051_v51 = vmul.f32 -0.5, %v5874_v45  ;;  %v3572_v42 = vpop.eup %3571  ;;  %v5921_v20 = vmul.f32 %v5839_v7, %v2007_v38  ;;  %vm5923_vm8 = vcmp.lt.f32.partialorder %v2009_v37, 0.0004427343  ;;  %v2034_v58 = vadd.f32 1.0, %v2033_v13 }
 0x29f   : > { %v2036_v41 = vand.u32 2147483647, %v5861_v14  ;;  %v3574_v34 = vpop.eup %3573  ;;  %v5929_v26 = vmul.f32 %v5847_v18, %v2016_v47  ;;  %vm5931_vm9 = vcmp.lt.f32.partialorder %v2018_v6, 0.0004427343  ;;  %v2043_v9 = vadd.f32 1.0, %v2042_v40 }
 0x2a0   : > { %v2045_v29 = vand.u32 2147483647, %v5866_v60  ;;  %3589 = vlog2.f32 %v2048_v31  ;;  %v5936_v7 = vpop.eup %3575  ;;  %v5938_v37 = vmul.f32 0.6931472, %v3570_v63  ;;  %vm5940_vm10 = vcmp.lt.f32.partialorder %v2027_v32, 0.0004427343 }
 0x2a1   : > { %3591 = vlog2.f32 %v2057_v28  ;;  %v2066_v18 = vadd.f32 1.0, %v5885_v44  ;;  %v5945_v13 = vpop.eup %3577  ;;  %v5947_v6 = vmul.f32 0.6931472, %v3572_v42  ;;  %v5950_v47 = vmul.f32 %v5852_v1, %v2025_v43 }
 0x2a2   : > { %v2052_v40 = vadd.f32 1.0, %v2051_v51  ;;  %v2060_v31 = vmul.f32 -0.5, %v5878_v36  ;;  %v3580_v30 = vpop.eup %3579  ;;  %v1996_v63 = vmul.f32 0.6931472, %v3574_v34  ;;  %v5954_v32 = vmul.f32 %v5861_v14, %v2034_v58 }
 0x2a3   : > { %vm5956_vm13 = vcmp.lt.f32.partialorder %v2036_v41, 0.0004427343  ;;  %v2054_v28 = vand.u32 2147483647, %v5874_v45  ;;  %v3582_v24 = vpop.eup %3581  ;;  %v5962_v42 = vmul.f32 %v5866_v60, %v2043_v9  ;;  %vm5964_vm6 = vcmp.lt.f32.partialorder %v2045_v29, 0.0004427343 }
 0x2a4   : > { %v2063_v51 = vand.u32 2147483647, %v5878_v36  ;;  %v2075_v43 = vadd.f32 1.0, %v5893_v2  ;;  %v3584_v14 = vpop.eup %3583  ;;  %v1984_v41 = vsel %vm5887_vm2, %v5881_v3, %v5938_v37  ;;  %3593 = vlog2.f32 %v2066_v18 }
 0x2a5   : > { %v2069_v58 = vmul.f32 -0.5, %v5885_v44  ;;  %v2084_v60 = vadd.f32 1.0, %v5901_v27  ;;  %v3586_v34 = vpop.eup %3585  ;;  %v1993_v29 = vsel %vm5895_vm7, %v5908_v23, %v5947_v6  ;;  %v2005_v9 = vmul.f32 0.6931472, %v3580_v30 }
 0x2a6   : > { %v5981_v61 = vmul.f32 %v5874_v45, %v2052_v40  ;;  %v2061_v62 = vadd.f32 1.0, %v2060_v31  ;;  %v3588_v57 = vpop.eup %3587  ;;  %v2002_v49 = vsel %vm5915_vm3, %v5913_v25, %v1996_v63  ;;  %v2014_v3 = vmul.f32 0.6931472, %v3582_v24 }
 0x2a7   : > { %vm5986_vm1 = vcmp.lt.f32.partialorder %v2054_v28, 0.0004427343  ;;  %v2078_v18 = vmul.f32 -0.5, %v5893_v2  ;;  %v2093_v21 = vadd.f32 1.0, %v5905_v10  ;;  %v5992_v23 = vmul.f32 0.6931472, %v3584_v14 }
 0x2a8   : > { %vm5994_vm5 = vcmp.lt.f32.partialorder %v2063_v51, 0.0004427343  ;;  %3595 = vlog2.f32 %v2075_v43  ;;  %v2102_v45 = vadd.f32 1.0, %v5936_v7  ;;  %v5999_v8 = vmul.f32 0.6931472, %v3586_v34 }
 0x2a9   : > { %v2070_v24 = vadd.f32 1.0, %v2069_v58  ;;  %v2072_v25 = vand.u32 2147483647, %v5885_v44  ;;  %3597 = vlog2.f32 %v2084_v60  ;;  %v2011_v40 = vsel %vm5923_vm8, %v5921_v20, %v2005_v9 }
 0x2aa   : > { %v3590_v6 = vpop.eup %3589  ;;  %v6005_v31 = vmul.f32 0.6931472, %v3588_v57  ;;  %v6008_v63 = vmul.f32 %v5878_v36, %v2061_v62  ;;  %v2087_v28 = vmul.f32 -0.5, %v5901_v27  ;;  %v2020_v43 = vsel %vm5931_vm9, %v5929_v26, %v2014_v3 }
 0x2ab   : > { %v3592_v51 = vpop.eup %3591  ;;  %v2079_v14 = vadd.f32 1.0, %v2078_v18  ;;  %v2081_v58 = vand.u32 2147483647, %v5893_v2  ;;  %3599 = vlog2.f32 %v2093_v21  ;;  %v2029_v57 = vsel %vm5940_vm10, %v5950_v47, %v5992_v23 }
 0x2ac   : > { %v2096_v20 = vmul.f32 -0.5, %v5905_v10  ;;  %3601 = vlog2.f32 %v2102_v45  ;;  %v2111_v62 = vadd.f32 1.0, %v5945_v13  ;;  %v2038_v36 = vsel %vm5956_vm13, %v5954_v32, %v5999_v8 }
 0x2ad   : > { %v6026_v4 = vmul.f32 %v5885_v44, %v2070_v24  ;;  %vm6028_vm11 = vcmp.lt.f32.partialorder %v2072_v25, 0.0004427343  ;;  %v2090_v17 = vand.u32 2147483647, %v5901_v27  ;;  %v2047_v38 = vsel %vm5964_vm6, %v5962_v42, %v6005_v31 }
 0x2ae   : > { %v6037_v47 = vmul.f32 0.6931472, %v3590_v6  ;;  %v6039_v60 = vmul.f32 0.6931472, %v3592_v51  ;;  %v2088_v5 = vadd.f32 1.0, %v2087_v28  ;;  %v3594_v32 = vpop.eup %3593  ;;  %v6042_v44 = vmul.f32 %v5893_v2, %v2079_v14  ;;  %v1848_v28 = vld [vmem:[%s4431_s29] sm:$0xff] }
 0x2af   : > { %vm6044_vm4 = vcmp.lt.f32.partialorder %v2081_v58, 0.0004427343  ;;  %v6922_v9 = vmax.f32 %v5689_v53, 0.0  ;;  %v6923_v1 = vmax.f32 %v5692_v35, 0.0  ;;  %v6924_v18 = vmax.f32 %v5695_v15, 0.0  ;;  %v1849_v51 = vld [vmem:[%s4431_s29 + $0x8] sm:$0xff] }
 0x2b0   : > { %v2097_v2 = vadd.f32 1.0, %v2096_v20  ;;  %v2099_v23 = vand.u32 2147483647, %v5905_v10  ;;  %v2105_v45 = vmul.f32 -0.5, %v5936_v7  ;;  %3603 = vlog2.f32 %v2111_v62 }
 0x2b1   : > { %v6050_v3 = vadd.f32 %v1984_v41, %v6922_v9  ;;  %v6054_v42 = vadd.f32 %v1993_v29, %v6923_v1  ;;  %v6058_v21 = vadd.f32 %v2002_v49, %v6924_v18  ;;  %vm6062_vm12 = vcmp.lt.f32.partialorder %v2090_v17, 0.0004427343  ;;  %v1851_v17 = vld [vmem:[%s4431_s29 + $0x18] sm:$0xff]  ;;  %v1852_v18 = vld [vmem:[%s4431_s29 + $0x20] sm:$0xff] }
 0x2b2   : > { %v2108_v35 = vand.u32 2147483647, %v5936_v7  ;;  %v2114_v41 = vmul.f32 -0.5, %v5945_v13  ;;  %v6927_v15 = vmax.f32 %v5700_v56, 0.0  ;;  %v3596_v49 = vpop.eup %3595  ;;  %v2056_v8 = vsel %vm5986_vm1, %v5981_v61, %v6037_v47 }
 0x2b3   : > { %v2065_v24 = vsel %vm5994_vm5, %v6008_v63, %v6039_v60  ;;  %v2068_v25 = vmul.f32 0.6931472, %v3594_v32  ;;  %v2089_v6 = vmul.f32 %v5901_v27, %v2088_v5  ;;  %v3598_v31 = vpop.eup %3597  ;;  %v6928_v56 = vmax.f32 %v5704_v46, 0.0  ;;  %v1850_v63 = vld [vmem:[%s4431_s29 + $0x10] sm:$0xff] }
 0x2b4   : > { %v6070_v29 = vadd.f32 %v2011_v40, %v6927_v15  ;;  %v2136_v37 = vmul.f32 %v6050_v3, %v5761_v19  ;;  %v2137_v61 = vmul.f32 %v6054_v42, %v5766_v33  ;;  %v2138_v30 = vmul.f32 %v6058_v21, %v5772_v55  ;;  %v1853_v15 = vld [vmem:[%s4431_s29 + $0x28] sm:$0xff]  ;;  %v6195_v19 = vld [vmem:[%s4441_s26 + $0x58] sm:$0xff] }
 0x2b5   : > { %v6085_v40 = vadd.f32 %v2020_v43, %v6928_v56  ;;  %v2098_v27 = vmul.f32 %v5905_v10, %v2097_v2  ;;  %vm6095_vm14 = vcmp.lt.f32.partialorder %v2099_v23, 0.0004427343  ;;  %v2106_v46 = vadd.f32 1.0, %v2105_v45  ;;  %v3600_v58 = vpop.eup %3599 }
 0x2b6   : > { %v2117_v43 = vand.u32 2147483647, %v5945_v13  ;;  %vm6100_vm2 = vcmp.lt.f32.partialorder %v2108_v35, 0.0004427343  ;;  %v2115_v33 = vadd.f32 1.0, %v2114_v41  ;;  %v6933_v20 = vmax.f32 %v5708_v16, 0.0  ;;  %v3602_v62 = vpop.eup %3601 }
 0x2b7   : > { %v2139_v10 = vmul.f32 %v6070_v29, %v5783_v39  ;;  %v2074_v47 = vsel %vm6028_vm11, %v6026_v4, %v2068_v25  ;;  %v2077_v60 = vmul.f32 0.6931472, %v3596_v49  ;;  %v2086_v5 = vmul.f32 0.6931472, %v3598_v31 }
 0x2b8   : > { %v6106_v55 = vadd.f32 %v2029_v57, %v6933_v20  ;;  %v6934_v32 = vmax.f32 %v5711_v0, 0.0  ;;  %v2140_v16 = vmul.f32 %v6085_v40, %v5788_v50  ;;  %v6120_v57 = vadd.f32 %v2136_v37, %v1848_v28 }
 0x2b9   : > { %v6122_v1 = vadd.f32 %v2137_v61, %v1849_v51  ;;  %v6124_v39 = vadd.f32 %v2138_v30, %v1850_v63  ;;  %v2095_v26 = vmul.f32 0.6931472, %v3600_v58  ;;  %v2107_v4 = vmul.f32 %v5936_v7, %v2106_v46  ;;  %v1855_v30 = vld [vmem:[%s4431_s29 + $0x38] sm:$0xff]  ;;  %v1856_v58 = vld [vmem:[%s4431_s29 + $0x40] sm:$0xff] }
 0x2ba   : > { %v6116_v9 = vadd.f32 %v2038_v36, %v6934_v32  ;;  %vm6128_vm7 = vcmp.lt.f32.partialorder %v2117_v43, 0.0004427343  ;;  %v6937_v0 = vmax.f32 %v5714_v22, 0.0  ;;  %v2104_v50 = vmul.f32 0.6931472, %v3602_v62  ;;  %v3604_v41 = vpop.eup %3603  ;;  %v6948_v32 = vld [vmem:[#allocation70_spill] sm:$0xff] }
 0x2bb   : > { %v2116_v23 = vmul.f32 %v5945_v13, %v2115_v33  ;;  %v2141_v45 = vmul.f32 %v6106_v55, %v5792_v11  ;;  %v6139_v35 = vadd.f32 %v2139_v10, %v1851_v17  ;;  %v2083_v7 = vsel %vm6044_vm4, %v6042_v44, %v2077_v60  ;;  %v1854_v11 = vld [vmem:[%s4431_s29 + $0x30] sm:$0xff]  ;;  %v6198_v33 = vld [vmem:[%s4441_s26 + $0x60] sm:$0xff] }
 0x2bc   : > { %v6134_v36 = vadd.f32 %v2047_v38, %v6937_v0  ;;  %v2092_v49 = vsel %vm6062_vm12, %v2089_v6, %v2086_v5  ;;  %v6938_v22 = vmax.f32 %v5719_v59, 0.0  ;;  %v2142_v13 = vmul.f32 %v6116_v9, %v5795_v52  ;;  %v6951_v0 = vld [vmem:[#allocation77_spill] sm:$0xff] }
 0x2bd   : > { %v6154_v25 = vadd.f32 %v2140_v16, %v1852_v18  ;;  %v2300_v31 = vmul.f32 %v6120_v57, %v6120_v57  ;;  %v2301_v44 = vmul.f32 %v6122_v1, %v6122_v1  ;;  %v2302_v59 = vmul.f32 %v6124_v39, %v6124_v39 }
 0x2be   : > { %v6149_v38 = vadd.f32 %v2056_v8, %v6938_v22  ;;  %v2101_v34 = vsel %vm6095_vm14, %v2098_v27, %v2095_v26  ;;  %v6939_v52 = vmax.f32 %v5725_v48, 0.0  ;;  %v6940_v8 = vmax.f32 %v5728_v54, 0.0  ;;  %v6941_v48 = vld [vmem:[#allocation67_spill] sm:$0xff]  ;;  %v6943_v54 = vld [vmem:[#allocation68_spill] sm:$0xff]  ;;  %v6950_v26 = vld [vmem:[#allocation74_spill] sm:$0xff] }
 0x2bf   : > { %v2143_v28 = vmul.f32 %v6134_v36, %v5804_v12  ;;  %v2110_v51 = vsel %vm6100_vm2, %v2107_v4, %v2104_v50  ;;  %v2113_v56 = vmul.f32 0.6931472, %v3604_v41  ;;  %v6176_v37 = vadd.f32 %v2141_v45, %v1853_v15  ;;  %v6945_v12 = vld [vmem:[#allocation73_spill] sm:$0xff] }
 0x2c0   : > { %v6166_v53 = vadd.f32 %v2065_v24, %v6939_v52  ;;  %v6170_v6 = vadd.f32 %v2074_v47, %v6940_v8  ;;  %v2303_v61 = vmul.f32 %v6139_v35, %v6139_v35  ;;  %v6942_v24 = vmax.f32 %v6941_v48, 0.0  ;;  %v6946_v47 = vld [vmem:[#allocation69_spill] sm:$0xff] }
 0x2c1   : > { %v6944_v27 = vmax.f32 %v6943_v54, 0.0  ;;  %v2144_v46 = vmul.f32 %v6149_v38, %v6945_v12  ;;  %v6191_v43 = vadd.f32 %v2142_v13, %v1854_v11  ;;  %v2304_v20 = vmul.f32 %v6154_v25, %v6154_v25  ;;  %v1857_v45 = vld [vmem:[%s4431_s29 + $0x48] sm:$0xff]  ;;  %v1858_v13 = vld [vmem:[%s4431_s29 + $0x50] sm:$0xff] }
 0x2c2   : > { %v6183_v63 = vadd.f32 %v2083_v7, %v6942_v24  ;;  %v2316_v10 = vmul.f32 -50.0, %v2300_v31  ;;  %v2317_v62 = vmul.f32 -50.0, %v2301_v44  ;;  %v2318_v17 = vmul.f32 -50.0, %v2302_v59  ;;  %v6216_v41 = vld [vmem:[%s4441_s26 + $0x68] sm:$0xff]  ;;  %v6226_v11 = vld [vmem:[%s4441_s26 + $0x70] sm:$0xff] }
 0x2c3   : > { %v6187_v14 = vadd.f32 %v2092_v49, %v6944_v27  ;;  %v6947_v60 = vmax.f32 %v6946_v47, 0.0  ;;  %v6949_v16 = vmax.f32 %v6948_v32, 0.0  ;;  %v2145_v4 = vmul.f32 %v6166_v53, %v6950_v26  ;;  %v6250_v27 = vld [vmem:[%s4441_s26 + $0x78] sm:$0xff] }
 0x2c4   : > { %v2146_v50 = vmul.f32 %v6170_v6, %v6951_v0  ;;  %v2119_v15 = vsel %vm6128_vm7, %v2116_v23, %v2113_v56  ;;  %v6220_v7 = vadd.f32 %v2143_v28, %v1855_v30  ;;  %v2305_v49 = vmul.f32 %v6176_v37, %v6176_v37  ;;  %v1859_v23 = vld [vmem:[%s4431_s29 + $0x58] sm:$0xff] }
 0x2c5   : > { %v6204_v5 = vadd.f32 %v2101_v34, %v6947_v60  ;;  %v6208_v18 = vadd.f32 %v2110_v51, %v6949_v16  ;;  %v2319_v22 = vmul.f32 -50.0, %v2303_v61  ;;  %v2147_v31 = vmul.f32 %v6183_v63, %v6195_v19  ;;  %v1860_v34 = vld [vmem:[%s4431_s29 + $0x60] sm:$0xff]  ;;  %v1861_v60 = vld [vmem:[%s4431_s29 + $0x68] sm:$0xff] }
 0x2c6   : > { %v2148_v44 = vmul.f32 %v6187_v14, %v6198_v33  ;;  %v6232_v59 = vadd.f32 %v2144_v46, %v1856_v58  ;;  %v2306_v2 = vmul.f32 %v6191_v43, %v6191_v43  ;;  %v2320_v52 = vmul.f32 -50.0, %v2304_v20  ;;  %v6952_v56 = vld [vmem:[#allocation71_spill] sm:$0xff] }
 0x2c7   : > { %v2332_v8 = vsel %vm2200_vm0, %v2316_v10, 0.0  ;;  %v2333_v28 = vsel %vm2200_vm0, %v2317_v62, 0.0  ;;  %v2335_v51 = vsel %vm2200_vm0, %v2318_v17, 0.0  ;;  %v6953_v61 = vmax.f32 %v6952_v56, 0.0 }
 0x2c8   : > { %v2149_v48 = vmul.f32 %v6204_v5, %v6216_v41  ;;  %v6247_v24 = vadd.f32 %v2145_v4, %v1857_v45  ;;  %v2334_v54 = vadd.f32 %v2333_v28, %v2332_v8  ;;  %v2150_v12 = vmul.f32 %v6208_v18, %v6226_v11  ;;  %v6955_v45 = vld [vmem:[#allocation79_spill] sm:$0xff] }
 0x2c9   : > { %v6243_v30 = vadd.f32 %v2119_v15, %v6953_v61  ;;  %v2307_v46 = vmul.f32 %v6220_v7, %v6220_v7  ;;  %v2321_v58 = vmul.f32 -50.0, %v2305_v49  ;;  %v2337_v20 = vsel %vm2200_vm0, %v2319_v22, 0.0  ;;  %v1862_v49 = vld [vmem:[%s4431_s29 + $0x70] sm:$0xff]  ;;  %v1863_v22 = vld [vmem:[%s4431_s29 + $0x78] sm:$0xff] }
 0x2ca   : > { %v6257_v10 = vadd.f32 %v2146_v50, %v1858_v13  ;;  %v6259_v62 = vadd.f32 %v2147_v31, %v1859_v23  ;;  %v6261_v17 = vadd.f32 %v2148_v44, %v1860_v34  ;;  %v2336_v47 = vadd.f32 %v2335_v51, %v2334_v54  ;;  %v6954_v50 = vld [vmem:[#allocation82_spill] sm:$0xff]  ;;  %v6957_v54 = vld [vmem:[#allocation72_spill] sm:$0xff] }
 0x2cb   : > { %v2308_v32 = vmul.f32 %v6232_v59, %v6232_v59  ;;  %v2322_v16 = vmul.f32 -50.0, %v2306_v2  ;;  %v2339_v26 = vsel %vm2200_vm0, %v2320_v52, 0.0  ;;  %3605 = vlog2.f32 %v6050_v3  ;;  %v6956_v52 = vld [vmem:[#allocation80_spill] sm:$0xff] }
 0x2cc   : > { %v2151_v4 = vmul.f32 %v6243_v30, %v6250_v27  ;;  %v2338_v0 = vadd.f32 %v2337_v20, %v2336_v47  ;;  %3607 = vlog2.f32 %v6054_v42  ;;  %v2265_v15 = vadd.f32 %v6955_v45, %v6954_v50  ;;  %v6958_v20 = vld [vmem:[#allocation81_spill] sm:$0xff] }
 0x2cd   : > { %v2309_v13 = vmul.f32 %v6247_v24, %v6247_v24  ;;  %v2323_v31 = vmul.f32 -50.0, %v2307_v46  ;;  %v2341_v44 = vsel %vm2200_vm0, %v2321_v58, 0.0  ;;  %3609 = vlog2.f32 %v6058_v21 }
 0x2ce   : > { %v6279_v3 = vadd.f32 %v2149_v48, %v1861_v60  ;;  %v2310_v2 = vmul.f32 %v6257_v10, %v6257_v10  ;;  %v2340_v23 = vadd.f32 %v2339_v26, %v2338_v0  ;;  %3611 = vlog2.f32 %v6070_v29 }
 0x2cf   : > { %v2324_v42 = vmul.f32 -50.0, %v2308_v32  ;;  %v2343_v34 = vsel %vm2200_vm0, %v2322_v16, 0.0  ;;  %3613 = vlog2.f32 %v6085_v40  ;;  %v2267_v8 = vadd.f32 %v6956_v52, %v2265_v15  ;;  %v6960_v16 = vld [vmem:[#allocation76_spill] sm:$0xff] }
 0x2d0   : > { %v6287_v28 = vadd.f32 %v2150_v12, %v1862_v49  ;;  %v6289_v51 = vadd.f32 %v2151_v4, %v1863_v22  ;;  %v2342_v21 = vadd.f32 %v2341_v44, %v2340_v23  ;;  %3615 = vlog2.f32 %v6106_v55 }
 0x2d1   : > { %v2311_v56 = vmul.f32 %v6259_v62, %v6259_v62  ;;  %v2325_v61 = vmul.f32 -50.0, %v2309_v13  ;;  %v2345_v29 = vsel %vm2200_vm0, %v2323_v31, 0.0  ;;  %3617 = vlog2.f32 %v6116_v9  ;;  %v6959_v9 = vld [vmem:[#allocation75_spill] sm:$0xff] }
 0x2d2   : > { %v2312_v40 = vmul.f32 %v6261_v17, %v6261_v17  ;;  %v2344_v48 = vadd.f32 %v2343_v34, %v2342_v21  ;;  %3619 = vlog2.f32 %v6134_v36  ;;  %v2270_v12 = vsel %vm2200_vm0, %v6957_v54, 0.0 }
 0x2d3   : > { %v2313_v55 = vmul.f32 %v6279_v3, %v6279_v3  ;;  %v2326_v46 = vmul.f32 -50.0, %v2310_v2  ;;  %v2347_v58 = vsel %vm2200_vm0, %v2324_v42, 0.0  ;;  %v2269_v47 = vadd.f32 %v6958_v20, %v2267_v8 }
 0x2d4   : > { %v2346_v60 = vadd.f32 %v2345_v29, %v2344_v48  ;;  %3621 = vlog2.f32 %v6149_v38  ;;  %v2272_v32 = vsel %vm2200_vm0, %v6959_v9, 0.0  ;;  %v2274_v36 = vsel %vm2200_vm0, %v6960_v16, 0.0 }
 0x2d5   : > { %v3606_v26 = vpop.eup %3605  ;;  %v2314_v4 = vmul.f32 %v6287_v28, %v6287_v28  ;;  %v2315_v0 = vmul.f32 %v6289_v51, %v6289_v51  ;;  %v2327_v50 = vmul.f32 -50.0, %v2311_v56  ;;  %v2349_v45 = vsel %vm2200_vm0, %v2325_v61, 0.0 }
 0x2d6   : > { %v3608_v15 = vpop.eup %3607  ;;  %v2328_v49 = vmul.f32 -50.0, %v2312_v40  ;;  %v2348_v22 = vadd.f32 %v2347_v58, %v2346_v60  ;;  %v2169_v38 = vmul.f32 0.6931472, %v3606_v26  ;;  %3623 = vlog2.f32 %v6166_v53 }
 0x2d7   : > { %v3610_v13 = vpop.eup %3609  ;;  %v2329_v31 = vmul.f32 -50.0, %v2313_v55  ;;  %v2351_v44 = vsel %vm2200_vm0, %v2326_v46, 0.0  ;;  %v2171_v2 = vmul.f32 0.6931472, %v3608_v15  ;;  %v2271_v23 = vadd.f32 %v2270_v12, %v2269_v47 }
 0x2d8   : > { %v3612_v42 = vpop.eup %3611  ;;  %v2350_v34 = vadd.f32 %v2349_v45, %v2348_v22  ;;  %v2173_v52 = vmul.f32 0.6931472, %v3610_v13  ;;  %3625 = vlog2.f32 %v6170_v6  ;;  %v2201_v8 = vsel %vm2200_vm0, %v2169_v38, 0.0 }
 0x2d9   : > { %v3614_v21 = vpop.eup %3613  ;;  %v2330_v56 = vmul.f32 -50.0, %v2314_v4  ;;  %v2353_v61 = vsel %vm2200_vm0, %v2327_v50, 0.0  ;;  %v2175_v29 = vmul.f32 0.6931472, %v3612_v42  ;;  %v2202_v53 = vsel %vm2200_vm0, %v2171_v2, 0.0  ;;  %v6961_v42 = vld [vmem:[#allocation78_spill] sm:$0xff] }
 0x2da   : > { %v3616_v40 = vpop.eup %3615  ;;  %v2352_v48 = vadd.f32 %v2351_v44, %v2350_v34  ;;  %v2177_v54 = vmul.f32 0.6931472, %v3614_v21  ;;  %3627 = vlog2.f32 %v6183_v63  ;;  %v2203_v12 = vadd.f32 %v2202_v53, %v2201_v8 }
 0x2db   : > { %v3618_v55 = vpop.eup %3617  ;;  %v2355_v46 = vsel %vm2200_vm0, %v2328_v49, 0.0  ;;  %v2179_v58 = vmul.f32 0.6931472, %v3616_v40  ;;  %v2204_v6 = vsel %vm2200_vm0, %v2173_v52, 0.0  ;;  %v2206_v20 = vsel %vm2200_vm0, %v2175_v29, 0.0 }
 0x2dc   : > { %v3620_v47 = vpop.eup %3619  ;;  %v2354_v60 = vadd.f32 %v2353_v61, %v2352_v48  ;;  %3629 = vlog2.f32 %v6187_v14  ;;  %v2205_v9 = vadd.f32 %v2204_v6, %v2203_v12  ;;  %v2273_v16 = vadd.f32 %v2272_v32, %v2271_v23 }
 0x2dd   : > { %v2331_v26 = vmul.f32 -50.0, %v2315_v0  ;;  %v2357_v4 = vsel %vm2200_vm0, %v2329_v31, 0.0  ;;  %v2181_v50 = vmul.f32 0.6931472, %v3618_v55  ;;  %v2208_v63 = vsel %vm2200_vm0, %v2177_v54, 0.0 }
 0x2de   : > { %v3622_v45 = vpop.eup %3621  ;;  %v2356_v15 = vadd.f32 %v2355_v46, %v2354_v60  ;;  %3631 = vlog2.f32 %v6204_v5  ;;  %v2207_v49 = vadd.f32 %v2206_v20, %v2205_v9  ;;  %v2359_v22 = vsel %vm2200_vm0, %v2330_v56, 0.0 }
 0x2df   : > { %v2183_v38 = vmul.f32 0.6931472, %v3620_v47  ;;  %v2210_v13 = vsel %vm2200_vm0, %v2179_v58, 0.0  ;;  %v2252_v14 = vmul.f32 %v6195_v19, %v6195_v19  ;;  %3633 = vlog2.f32 %v6208_v18 }
 0x2e0   : > { %v3624_v32 = vpop.eup %3623  ;;  %v2358_v0 = vadd.f32 %v2357_v4, %v2356_v15  ;;  %v2209_v31 = vadd.f32 %v2208_v63, %v2207_v49  ;;  %v2275_v44 = vadd.f32 %v2274_v36, %v2273_v16  ;;  %v2361_v2 = vsel %vm2200_vm0, %v2331_v26, 0.0 }
 0x2e1   : > { %v2185_v23 = vmul.f32 0.6931472, %v3622_v45  ;;  %v2212_v5 = vsel %vm2200_vm0, %v2181_v50, 0.0  ;;  %v2276_v34 = vsel %vm2200_vm0, %v6961_v42, 0.0  ;;  %3635 = vlog2.f32 %v6243_v30  ;;  %v2500_v30 = vld [vmem:[#allocation3] sm:$0xff] }
 0x2e2   : > { %v3626_v52 = vpop.eup %3625  ;;  %v2360_v8 = vadd.f32 %v2359_v22, %v2358_v0  ;;  %v2211_v21 = vadd.f32 %v2210_v13, %v2209_v31  ;;  %v2187_v19 = vmul.f32 0.6931472, %v3624_v32  ;;  %v2214_v56 = vsel %vm2200_vm0, %v2183_v38, 0.0 }
 0x2e3   : > { %v2277_v36 = vadd.f32 %v2276_v34, %v2275_v44  ;;  %v2189_v53 = vmul.f32 0.6931472, %v3626_v52  ;;  %v2216_v40 = vsel %vm2200_vm0, %v2185_v23, 0.0  ;;  %v2253_v48 = vmul.f32 %v6198_v33, %v6198_v33 }
 0x2e4   : > { %v3628_v61 = vpop.eup %3627  ;;  %v2362_v18 = vadd.f32 %v2361_v2, %v2360_v8  ;;  %v2213_v29 = vadd.f32 %v2212_v5, %v2211_v21  ;;  %v2278_v54 = vsel %vm2200_vm0, %v2252_v14, 0.0  ;;  %v2218_v58 = vsel %vm2200_vm0, %v2187_v19, 0.0 }
 0x2e5   : > { %v2191_v46 = vmul.f32 0.6931472, %v3628_v61  ;;  %v2279_v47 = vadd.f32 %v2278_v54, %v2277_v36  ;;  %v2220_v9 = vsel %vm2200_vm0, %v2189_v53, 0.0  ;;  %v2254_v16 = vmul.f32 %v6216_v41, %v6216_v41  ;;  %v2377_v54 = vld [vmem:[#allocation2 + $0x28] sm:$0xff] }
 0x2e6   : > { %v3630_v12 = vpop.eup %3629  ;;  %2363 = vadd.xlane.f32.xlu1 %v2362_v18  ;;  %v2215_v55 = vadd.f32 %v2214_v56, %v2213_v29  ;;  %v2280_v33 = vsel %vm2200_vm0, %v2253_v48, 0.0  ;;  %v2255_v13 = vmul.f32 %v6226_v11, %v6226_v11  ;;  %v2256_v23 = vmul.f32 %v6250_v27, %v6250_v27  ;;  %v2513_v56 = vld [vmem:[#allocation4] sm:$0xff]  ;;  %v2375_v27 = vld [vmem:[#allocation2 + $0x18] sm:$0xff] }
 0x2e7   : > { %v2193_v60 = vmul.f32 0.6931472, %v3630_v12  ;;  %v2222_v63 = vsel %vm2200_vm0, %v2191_v46, 0.0  ;;  %v2281_v49 = vadd.f32 %v2280_v33, %v2279_v47  ;;  %v2282_v14 = vsel %vm2200_vm0, %v2254_v16, 0.0 }
 0x2e8   : > { %v3632_v6 = vpop.eup %3631  ;;  %v2217_v20 = vadd.f32 %v2216_v40, %v2215_v55  ;;  %v2284_v5 = vsel %vm2200_vm0, %v2255_v13, 0.0  ;;  %v2286_v8 = vsel %vm2200_vm0, %v2256_v23, 0.0 }
 0x2e9   : > { %v3634_v26 = vpop.eup %3633  ;;  %v2195_v50 = vmul.f32 0.6931472, %v3632_v6  ;;  %v2224_v38 = vsel %vm2200_vm0, %v2193_v60, 0.0  ;;  %v2283_v44 = vadd.f32 %v2282_v14, %v2281_v49 }
 0x2ea   : > { %2501 = vadd.xlane.f32.xlu1 %v2500_v30  ;;  %v2219_v4 = vadd.f32 %v2218_v58, %v2217_v20  ;;  %v2197_v22 = vmul.f32 0.6931472, %v3634_v26 }
 0x2eb   : > { %v3636_v45 = vpop.eup %3635  ;;  %v2226_v0 = vsel %vm2200_vm0, %v2195_v50, 0.0  ;;  %v2285_v11 = vadd.f32 %v2284_v5, %v2283_v44  ;;  %v2380_v5 = vld [vmem:[#allocation2 + $0x40] sm:$0xff] }
 0x2ec   : > { %v2221_v15 = vadd.f32 %v2220_v9, %v2219_v4  ;;  %v2199_v32 = vmul.f32 0.6931472, %v3636_v45  ;;  %v2228_v2 = vsel %vm2200_vm0, %v2197_v22, 0.0  ;;  %v2378_v9 = vld [vmem:[#allocation2 + $0x30] sm:$0xff] }
 0x2ed   : > { %v2287_v19 = vadd.f32 %v2286_v8, %v2285_v11  ;;  %v2382_v8 = vld [vmem:[#allocation2 + $0x50] sm:$0xff] }
 0x2ee   : > { %v2223_v41 = vadd.f32 %v2222_v63, %v2221_v15  ;;  %v2230_v34 = vsel %vm2200_vm0, %v2199_v32, 0.0  ;;  %v2373_v32 = vld [vmem:[#allocation2 + $0x8] sm:$0xff] }
 0x2f0   : > { %v2225_v31 = vadd.f32 %v2224_v38, %v2223_v41  ;;  %v2379_v38 = vld [vmem:[#allocation2 + $0x38] sm:$0xff] }
 0x2f2   : > { %v2227_v42 = vadd.f32 %v2226_v0, %v2225_v31 }
 0x2f4   : > { %v2229_v52 = vadd.f32 %v2228_v2, %v2227_v42 }
 0x2f6   : > { %v2231_v21 = vadd.f32 %v2230_v34, %v2229_v52 }
 0x2f8   : > { %2232 = vadd.xlane.f32.xlu0 %v2231_v21 }
 0x2fb   : > { %2390 = vperm.xlu1 %3539, %v6120_v57  }
 0x2fc   : > { %2288 = vadd.xlane.f32.xlu0 %v2287_v19 }
 0x2ff   : > { %2400 = vperm.xlu1 %3539, %v6124_v39  }
 0x300   : > { %2514 = vadd.xlane.f32.xlu0 %v2513_v56  ;;  %v2381_v56 = vld [vmem:[#allocation2 + $0x48] sm:$0xff] }
 0x303   : > { %2405 = vperm.xlu1 %3539, %v6139_v35  }
 0x307   : > { %2410 = vperm.xlu1 %3539, %v6154_v25  }
 0x30b   : > { %2415 = vperm.xlu1 %3539, %v6176_v37   ;;  %v2374_v37 = vld [vmem:[#allocation2 + $0x10] sm:$0xff] }
 0x30f   : > { %2420 = vperm.xlu1 %3539, %v6191_v43  }
 0x313   : > { %2425 = vperm.xlu1 %3539, %v6220_v7  }
 0x316   : > { %2395 = vperm.xlu0 %3540, %v6122_v1   ;;  %v2372_v1 = vld [vmem:[#allocation2] sm:$0xff] }
 0x317   : > { %2430 = vperm.xlu1 %3539, %v6232_v59  }
 0x31a   : > { %2440 = vperm.xlu0 %3540, %v6257_v10  }
 0x31b   : > { %2435 = vperm.xlu1 %3539, %v6247_v24  }
 0x31e   : > { %2450 = vperm.xlu0 %3540, %v6261_v17  }
 0x31f   : > { %2445 = vperm.xlu1 %3539, %v6259_v62  }
 0x322   : > { %2460 = vperm.xlu0 %3540, %v6287_v28  }
 0x323   : > { %2455 = vperm.xlu1 %3539, %v6279_v3  }
 0x327   : > { %2465 = vperm.xlu1 %3539, %v6289_v51   ;;  %v2376_v51 = vld [vmem:[#allocation2 + $0x20] sm:$0xff] }
 0x373   : > { %v2364_v57 = vpop.xlane.xlu1 %2363 }
 0x374   : > { %v2365_v24 = vrot.slane %v2364_v57, 4 }
 0x376   : > { %v2366_v3 = vadd.f32 %v2365_v24, %v2364_v57  ;;  %v2386_v24 = vld [vmem:[#allocation2 + $0x70] sm:$0xff] }
 0x377   : > { %v2502_v39 = vpop.xlane.xlu1 %2501 }
 0x378   : > { %v2503_v43 = vrot.slane %v2502_v39, 4  ;;  %v2367_v40 = vrot.slane %v2366_v3, 2 }
 0x37a   : > { %v2504_v10 = vadd.f32 %v2503_v43, %v2502_v39  ;;  %v2368_v60 = vadd.f32 %v2367_v40, %v2366_v3 }
 0x37b   : > { %v2391_v35 = vpop.permute.xlu1 %2390 }
 0x37c   : > { %v2468_v25 = vadd.f32 %v2391_v35, %v2372_v1  ;;  %v2505_v18 = vrot.slane %v2504_v10, 2  ;;  %v2369_v22 = vrot.slane %v2368_v60, 1  ;;  %v2384_v35 = vld [vmem:[#allocation2 + $0x60] sm:$0xff] }
 0x37e   : > { %2484 = vst.msk [vmem:[%s4446_s9] sm:$0xff] %vm1791_vm15, %v2468_v25  ;;  %v2506_v30 = vadd.f32 %v2505_v18, %v2504_v10  ;;  %v2370_v23 = vadd.f32 %v2369_v22, %v2368_v60  ;;  %v2385_v10 = vld [vmem:[#allocation2 + $0x68] sm:$0xff] }
 0x37f   : > { %v2401_v7 = vpop.permute.xlu1 %2400 }
 0x380   : > { %v2470_v59 = vadd.f32 %v2401_v7, %v2374_v37  ;;  %v2507_v4 = vrot.slane %v2506_v30, 1  ;;  %v2383_v37 = vld [vmem:[#allocation2 + $0x58] sm:$0xff] }
 0x382   : > { %2486 = vst.msk [vmem:[%s4446_s9 + $0x10] sm:$0xff] %vm1791_vm15, %v2470_v59  ;;  %v2508_v31 = vadd.f32 %v2507_v4, %v2506_v30 }
 0x383   : > { %v2406_v62 = vpop.permute.xlu1 %2405 }
 0x384   : > { %v2471_v17 = vadd.f32 %v2406_v62, %v2375_v27 }
 0x385   : > { %v2233_v28 = vpop.xlane.xlu0 %2232 }
 0x386   : > { %v2234_v61 = vrot.slane %v2233_v28, 4  ;;  %2487 = vst.msk [vmem:[%s4446_s9 + $0x18] sm:$0xff] %vm1791_vm15, %v2471_v17 }
 0x387   : > { %v2411_v29 = vpop.permute.xlu1 %2410 }
 0x388   : > { %v2235_v36 = vadd.f32 %v2234_v61, %v2233_v28  ;;  %v2472_v53 = vadd.f32 %v2411_v29, %v2376_v51  ;;  %v2387_v51 = vld [vmem:[#allocation2 + $0x78] sm:$0xff] }
 0x389   : > { %v2289_v48 = vpop.xlane.xlu0 %2288 }
 0x38a   : > { %v2236_v12 = vrot.slane %v2235_v36, 2  ;;  %v2290_v55 = vrot.slane %v2289_v48, 4  ;;  %2488 = vst.msk [vmem:[%s4446_s9 + $0x20] sm:$0xff] %vm1791_vm15, %v2472_v53 }
 0x38b   : > { %v2416_v46 = vpop.permute.xlu1 %2415 }
 0x38c   : > { %v2291_v58 = vadd.f32 %v2290_v55, %v2289_v48  ;;  %v2237_v6 = vadd.f32 %v2236_v12, %v2235_v36  ;;  %v2473_v20 = vadd.f32 %v2416_v46, %v2377_v54 }
 0x38d   : > { %v2515_v47 = vpop.xlane.xlu0 %2514 }
 0x38e   : > { %v2292_v16 = vrot.slane %v2291_v58, 2  ;;  %v2516_v33 = vrot.slane %v2515_v47, 4  ;;  %v2238_v26 = vrot.slane %v2237_v6, 1  ;;  %2489 = vst.msk [vmem:[%s4446_s9 + $0x28] sm:$0xff] %vm1791_vm15, %v2473_v20 }
 0x38f   : > { %v2421_v50 = vpop.permute.xlu1 %2420 }
 0x390   : > { %v2517_v63 = vadd.f32 %v2516_v33, %v2515_v47  ;;  %v2239_v45 = vadd.f32 %v2238_v26, %v2237_v6  ;;  %v2293_v15 = vadd.f32 %v2292_v16, %v2291_v58  ;;  %v2474_v49 = vadd.f32 %v2421_v50, %v2378_v9 }
 0x392   : > { %v2518_v13 = vrot.slane %v2517_v63, 2  ;;  %3147 = vpush %v2239_v45  ;;  %v2294_v14 = vrot.slane %v2293_v15, 1 }
 0x393   : > { %2490 = vst.msk [vmem:[%s4446_s9 + $0x30] sm:$0xff] %vm1791_vm15, %v2474_v49  ;;  %v2426_v41 = vpop.permute.xlu1 %2425 }
 0x394   : > { %v2295_v0 = vadd.f32 %v2294_v14, %v2293_v15  ;;  %v2519_v44 = vadd.f32 %v2518_v13, %v2517_v63  ;;  %v2475_v2 = vadd.f32 %v2426_v41, %v2379_v38 }
 0x395   : > { %v2396_v42 = vpop.permute.xlu0 %2395 }
 0x396   : > { %3149 = vpush %v2295_v0  ;;  %v2520_v34 = vrot.slane %v2519_v44, 1  ;;  %v2469_v52 = vadd.f32 %v2396_v42, %v2373_v32 }
 0x397   : > { %2491 = vst.msk [vmem:[%s4446_s9 + $0x38] sm:$0xff] %vm1791_vm15, %v2475_v2  ;;  %v2431_v11 = vpop.permute.xlu1 %2430 }
 0x398   : > { %3151 = vpush %v2370_v23  ;;  %v2521_v21 = vadd.f32 %v2520_v34, %v2519_v44  ;;  %v2476_v19 = vadd.f32 %v2431_v11, %v2380_v5 }
 0x399   : > { %3153 = vpush %v2508_v31  ;;  %v2441_v57 = vpop.permute.xlu0 %2440 }
 0x39a   : > { %2485 = vst.msk [vmem:[%s4446_s9 + $0x8] sm:$0xff] %vm1791_vm15, %v2469_v52  ;;  %2492 = vst.msk [vmem:[%s4446_s9 + $0x40] sm:$0xff] %vm1791_vm15, %v2476_v19  ;;  %v2478_v39 = vadd.f32 %v2441_v57, %v2382_v8 }
 0x39b   : > { %3155 = vpush %v2521_v21  ;;  %v2436_v1 = vpop.permute.xlu1 %2435 }
 0x39c   : > { %v2477_v25 = vadd.f32 %v2436_v1, %v2381_v56  ;;  %2494 = vst.msk [vmem:[%s4446_s9 + $0x50] sm:$0xff] %vm1791_vm15, %v2478_v39 }
 0x39d   : > { %v2451_v43 = vpop.permute.xlu0 %2450 }
 0x39e   : > { %2493 = vst.msk [vmem:[%s4446_s9 + $0x48] sm:$0xff] %vm1791_vm15, %v2477_v25  ;;  %v2480_v7 = vadd.f32 %v2451_v43, %v2384_v35 }
 0x39f   : > { %v2446_v59 = vpop.permute.xlu1 %2445 }
 0x3a0   : > { %v2479_v27 = vadd.f32 %v2446_v59, %v2383_v37  ;;  %2496 = vst.msk [vmem:[%s4446_s9 + $0x60] sm:$0xff] %vm1791_vm15, %v2480_v7 }
 0x3a1   : > { %v2461_v62 = vpop.permute.xlu0 %2460 }
 0x3a2   : > { %2495 = vst.msk [vmem:[%s4446_s9 + $0x58] sm:$0xff] %vm1791_vm15, %v2479_v27  ;;  %v2482_v17 = vadd.f32 %v2461_v62, %v2386_v24 }
 0x3a3   : > { %v2456_v3 = vpop.permute.xlu1 %2455 }
 0x3a4   : > { %v2481_v28 = vadd.f32 %v2456_v3, %v2385_v10  ;;  %2498 = vst.msk [vmem:[%s4446_s9 + $0x70] sm:$0xff] %vm1791_vm15, %v2482_v17 }
 0x3a6   : > { %2497 = vst.msk [vmem:[%s4446_s9 + $0x68] sm:$0xff] %vm1791_vm15, %v2481_v28 }
 0x3a7   : > { %v2466_v61 = vpop.permute.xlu1 %2465 }
 0x3a8   : > { %v2483_v18 = vadd.f32 %v2466_v61, %v2387_v51 }
 0x3aa   : > { %2499 = vst.msk [vmem:[%s4446_s9 + $0x78] sm:$0xff] %vm1791_vm15, %v2483_v18 }
 0x3c3   : > { %s3148_s14 = spop %3147 }
 0x3c7   : > { %s3150_s29 = spop %3149 }
 0x3c8   : > { %s2297_s21 = smul.f32 0.5, %s3150_s29 }
 0x3c9   : > { %s3152_s26 = spop %3151 }
 0x3ca   : > { %s2298_s25 = sadd.f32 %s3148_s14, %s2297_s21  ;;  %s3154_s19 = spop %3153 }
 0x3cc   : > { %s3156_s20 = spop %3155  ;;  %s2299_s28 = ssub.f32 0.0, %s2298_s25 }
 0x3cd   : > { %s2523_s15 = sadd.f32 %s3156_s20, %s3152_s26 }
 0x3ce   : > { %s2510_s27 = sadd.f32 %s3154_s19, %s2299_s28 }
 0x3cf   : > { %v2524_v29 = vstv %s2523_s15 }
 0x3d0   : > { %v2511_v36 = vstv %s2510_s27  ;;  %2525 = vst [vmem:[%s965_s30] sm:$0x1] %v2524_v29 }
 0x3d1   : > { %2512 = vst [vmem:[%s959_s11] sm:$0x1] %v2511_v36 }
 0x3d2 PF: > { %s6962_s12 = sld [smem:[#allocation84_spill]]  ;;  %s2552_s29 = sshll.u32 %s959_s11, 4  ;;  %s6421_s29 = int_to_ptr.vmem [resolvable:$true] %s2552_s29 }
 0x3d3   : > { %s6965_s25 = sld [smem:[#allocation85_spill]]  ;;  %s2532_s20 = scalar_lea.sflag [#allocation9], %s4418_s1 }
 0x3d4   : > { %s3637_s28 = scalar_lea.vmem %s6421_s29, 16  ;;  %s3975_s15 = smov [#allocation8]  }
 0x3d5   : > { %p3638_p8 = scmp.ne.s32.totalorder %s6421_s29, %s3637_s28  ;;  %s3641_s27 = sshll.u32 %s3975_s15, 4  ;;  %s3642_s27 = int_to_ptr.vmem [resolvable:$false] %s3641_s27 }
 0x3d6   : > { %s3643_s11 = scalar_lea.vmem %s3642_s27, 32  ;;  %p3644_p11 = scmp.lt.s32.totalorder %s6421_s29, %s3642_s27 }
 0x3d7   : > { %p3639_p9 = pnand %p3638_p8, %p4099_p7  ;;  %p3645_p13 = scmp.lt.s32.totalorder %s3643_s11, %s3637_s28 }
 0x3d8   : > { %s6963_s8 = smov %s6962_s12  ;;  %s6417_s14 = scalar_lea.hbm %s6962_s12, %s4422_s22 }
 0x3d9   : > { %s6427_s19 = scalar_lea.hbm %s6965_s25, %s4422_s22  ;;  %p3640_p10 = pneg %p3639_p9 }
 0x3da   : > { %p3646_p0 = por %p3645_p13, %p3644_p11 }
 0x3dc   : > { %p3647_p1 = pnand %p3646_p0, %p3640_p10 }
 0x3de   : > { %3650 = shalt.err (!%p3647_p1)
}
 0x3df   : > { %s3651_s22 = scalar_lea.hbm %s6417_s14, 16  ;;  %s3655_s12 = scalar_lea.hbm %s6963_s8, 32 }
 0x3e0   : > { %p3652_p2 = scmp.ne.s32.totalorder %s6417_s14, %s3651_s22  ;;  %p3656_p6 = scmp.lt.u32.totalorder %s6417_s14, %s6963_s8 }
 0x3e1   : > { %p3657_p3 = scmp.lt.u32.totalorder %s3655_s12, %s3651_s22  ;;  %p3659_p9 = scmp.lt.u32.totalorder %s3651_s22, %s6417_s14 }
 0x3e2   : > { %p3653_p4 = pnand %p3652_p2, %p4099_p7 }
 0x3e3   : > { %p3658_p8 = por %p3657_p3, %p3656_p6 }
 0x3e4   : > { %p3654_p5 = pneg %p3653_p4 }
 0x3e5   : > { %p3660_p10 = por %p3659_p9, %p3658_p8 }
 0x3e7   : > { %p3661_p11 = pnand %p3660_p10, %p3654_p5 }
 0x3e9   : > { %3664 = shalt.err (!%p3661_p11)
}
 0x3ea   : > { %3157 = dma.vmem_to_hbm [thread:$0]  (%p4099_p7), %s6421_s29, 16, %s6417_s14, %s2532_s20  }
 0x3eb   : > { %s2565_s28 = sshll.u32 %s965_s30, 4  ;;  %s2536_s15 = scalar_lea.sflag [#allocation11], %s4418_s1  ;;  %s2566_s28 = int_to_ptr.vmem [resolvable:$true] %s2565_s28 }
 0x3ec   : > { %s3665_s27 = scalar_lea.vmem %s2566_s28, 16  ;;  %s3976_s11 = smov [#allocation10]  }
 0x3ed   : > { %p3666_p13 = scmp.ne.s32.totalorder %s2566_s28, %s3665_s27  ;;  %s3669_s22 = sshll.u32 %s3976_s11, 4  ;;  %s3670_s22 = int_to_ptr.vmem [resolvable:$false] %s3669_s22 }
 0x3ee   : > { %s3671_s23 = scalar_lea.vmem %s3670_s22, 32  ;;  %p3672_p2 = scmp.lt.s32.totalorder %s2566_s28, %s3670_s22 }
 0x3ef   : > { %p3667_p0 = pnand %p3666_p13, %p4099_p7  ;;  %p3673_p4 = scmp.lt.s32.totalorder %s3671_s23, %s3665_s27 }
 0x3f1   : > { %p3668_p1 = pneg %p3667_p0  ;;  %p3674_p5 = por %p3673_p4, %p3672_p2 }
 0x3f3   : > { %p3675_p6 = pnand %p3674_p5, %p3668_p1 }
 0x3f5   : > { %3678 = shalt.err (!%p3675_p6)
}
 0x3f6   : > { %s3679_s1 = scalar_lea.hbm %s6427_s19, 16  ;;  %s3683_s29 = scalar_lea.hbm %s6965_s25, 32 }
 0x3f7   : > { %p3680_p3 = scmp.ne.s32.totalorder %s6427_s19, %s3679_s1  ;;  %p3684_p10 = scmp.lt.u32.totalorder %s6427_s19, %s6965_s25 }
 0x3f8   : > { %p3685_p11 = scmp.lt.u32.totalorder %s3683_s29, %s3679_s1  ;;  %p3687_p0 = scmp.lt.u32.totalorder %s3679_s1, %s6427_s19 }
 0x3f9   : > { %p3681_p8 = pnand %p3680_p3, %p4099_p7 }
 0x3fa   : > { %p3686_p13 = por %p3685_p11, %p3684_p10 }
 0x3fb   : > { %p3682_p9 = pneg %p3681_p8 }
 0x3fc   : > { %p3688_p1 = por %p3687_p0, %p3686_p13 }
 0x3fe   : > { %p3689_p2 = pnand %p3688_p1, %p3682_p9 }
 0x400   : > { %3692 = shalt.err (!%p3689_p2)
}
 0x401   : > { %3158 = dma.vmem_to_hbm [thread:$0]  (%p4099_p7), %s2566_s28, 16, %s6427_s19, %s2536_s15  }
 0x402 PF: > { %s6966_s12 = sld [smem:[#allocation14_spill]]  ;;  %p3168_p4 = scmp.ge.s32.totalorder %s3875_s18, 2 }
 0x404   : > { %p3162_p5 = pnand %p3168_p4, %p4107_p12 }
 0x408   : > { %s2585_s26 = sand.u32 1, %s6966_s12  }
 0x409   : > { %s2586_s27 = scalar_lea.sflag [#allocation9], %s2585_s26 }
 0x40a   : > { %3830 = dma.done.wait (!%p3162_p5), %s2586_s27, 16  }
 0x40b   : > { %3832 = vsyncadd (!%p3162_p5), %s2586_s27, 4294967280  ;;  %s2594_s11 = scalar_lea.sflag [#allocation11], %s2585_s26 }
 0x40c   : > { %3834 = dma.done.wait (!%p3162_p5), %s2594_s11, 16  }
 0x40d   : > { %3836 = vsyncadd (!%p3162_p5), %s2594_s11, 4294967280  ;;  %s26_s18 = sadd.s32 1, %s3875_s18   ;;  %s6968_s24 = sld [smem:[#allocation15_spill]] }
 0x40e   : > { %p23_p6 = scmp.ge.s32.totalorder %s26_s18, 6   ;;  %s6969_s11 = sld [smem:[#allocation20_spill]] }
 0x40f   : > { %s6970_s19 = sld [smem:[#allocation21_spill]]  ;;  %s6971_s28 = sld [smem:[#allocation16_spill]] }
 0x410   : > { %s6972_s22 = sld [smem:[#allocation17_spill]]  ;;  %s6973_s30 = smov %s3843_s10 }
 0x411   : > { %s6975_s12 = smov %s3855_s13  ;;  %s6977_s14 = smov %s3867_s16 }
 0x412   : > { %s6978_s15 = smov %s3871_s17  ;;  %25 = sbr.rel (!%p23_p6) target bundleno = 12 (0xc), region = 397 }
 0x413   : > { %s6974_s10 = smov %s6968_s24 }
 0x415   : > { %s6976_s13 = smov %s6970_s19  ;;  %s6979_s16 = smov %s6971_s28 }
 0x416   : > { %s6980_s17 = smov %s6972_s22 }
 0x419   :  { %2598 = vsyncpa [#allocation9], 1 }
 0x41a   :  { %2600 = vsyncpa [#allocation9 + $0x1], 1 }
 0x41b   :  { %2601 = vsyncpa [#allocation11], 1 }
 0x41c   :  { %2603 = vsyncpa [#allocation11 + $0x1], 1 }

</bundles_post_ra>
